<compile_context>
chip_gen: v7x
topology: tpu7x:2x2x1
jax: 0.10.0
libtpu: 0.0.40
codegen_flags: <defaults>
</compile_context>

<pallas_src>
import numpy as np
import jax
import jax.numpy as jnp
from jax.experimental import pallas as pl
from jax.experimental.pallas import tpu as pltpu

# ------------------------- configuration -------------------------
NMODES = 2          # dual polarization
M_PBC = 9           # PBC taps (odd)
RHO = 1.0           # PBC pruning parameter
M_NN = 15           # FNO taps (odd)  -> self.M = max(M_PBC, M_NN) = 15
MODES = 4           # FNO spectral modes kept
WIDTH = 32          # FNO channel width
FC = 64             # FNO head hidden size
F_DIM = 64          # padded feature-slab rows (2 planes * 2 modes * 15 taps = 60 -> 64)


def pbc_index(M, rho):
    """Triplet index set {(m, n)} for the perturbation features."""
    L = M // 2
    idx = []
    for m in range(-L, L + 1):
        for n in range(m, L + 1):                    # symmetric triplets merged
            if abs(m * n) <= rho * L and -L <= m + n <= L:
                idx.append((m, n))
    return np.array(idx, dtype=np.int32)


_PBC_IDX = pbc_index(M_PBC, RHO)
H_PBC = _PBC_IDX.shape[0]                 # 25 triplets for (M=9, rho=1)
HP = ((H_PBC + 7) // 8) * 8               # sublane-padded triplet count (32)
SEL_ROWS = 12 * HP                        # (Am,An,Bm) x (re,im) x 2 modes, HP rows each
CTR = M_NN // 2                           # centre tap inside the 15-tap window


def feat(plane, mode, tap):
    """Row index inside the [F_DIM, B] feature slab (plane-major, then mode, then tap)."""
    return plane * (NMODES * M_NN) + mode * M_NN + tap


# ------------------------- fused Pallas kernel -------------------------
def fused_kernel(xf_ref, aux_ref, sel_ref, cr_ref, ci_ref, c00_ref, wmask_ref,
                 l1t_ref, b1v_ref, k2ct_ref, b2cv_ref, w1t_ref, b1h_ref,
                 w2t_ref, b2h_ref, out_ref):
    """One batch tile; every tensor carries batch on the lane axis (last dim = TB)."""
    f32 = jnp.float32
    bf16 = jnp.bfloat16

    xf = xf_ref[...]                        # [F_DIM, TB] f32, pre-scaled by sqrt(P)
    aux = aux_ref[...]                      # [8, TB]: x0_re(2), x0_im(2), 1/sqrt(P), pad
    x0r, x0i, isp = aux[0:NMODES], aux[NMODES:2 * NMODES], aux[4:5]

    xf_bf = xf.astype(bf16)                 # shared bf16 view for both MXU consumers

    # ---------------- AM-PBC path ----------------
    # all static triplet gathers as ONE 0/1 selection matmul, K = F_DIM (MXU)
    G = jnp.dot(sel_ref[...], xf_bf, preferred_element_type=f32)      # [SEL_ROWS, TB]
    AMR, AMI = G[0 * HP:2 * HP], G[2 * HP:4 * HP]     # mode0 rows [0:HP), mode1 [HP:2HP)
    ANR, ANI = G[4 * HP:6 * HP], G[6 * HP:8 * HP]
    BMR, BMI = G[8 * HP:10 * HP], G[10 * HP:12 * HP]

    # S = sum_p A_n[p] * conj(B[p])   (shared across output modes)
    s_r = (ANR[:HP] * BMR[:HP] + ANI[:HP] * BMI[:HP]
           + ANR[HP:] * BMR[HP:] + ANI[HP:] * BMI[HP:])
    s_i = (ANI[:HP] * BMR[:HP] - ANR[:HP] * BMI[:HP]
           + ANI[HP:] * BMR[HP:] - ANR[HP:] * BMI[HP:])

    # T = C (.) S  -- coefficient broadcast hoisted once instead of per mode
    cr_b = jnp.broadcast_to(cr_ref[...], s_r.shape)
    ci_b = jnp.broadcast_to(ci_ref[...], s_r.shape)
    t_r = cr_b * s_r - ci_b * s_i
    t_i = cr_b * s_i + ci_b * s_r

    # d[p] = sum_h Am[p][h] * T[h]   (complex)
    d_r, d_i = [], []
    for p in range(NMODES):
        amr, ami = AMR[p * HP:(p + 1) * HP], AMI[p * HP:(p + 1) * HP]
        d_r.append(jnp.sum(amr * t_r - ami * t_i, axis=0, keepdims=True))   # [1, TB]
        d_i.append(jnp.sum(amr * t_i + ami * t_r, axis=0, keepdims=True))
    d_r = jnp.concatenate(d_r, axis=0)      # [2, TB]
    d_i = jnp.concatenate(d_i, axis=0)

    # nonlinear phase ~ power inside the PBC window (slab is pre-scaled, P folded in)
    pw = jnp.sum(xf * xf * wmask_ref[...], axis=0, keepdims=True)     # [1, TB]
    phi = c00_ref[...] * pw                                           # [2, TB]
    cph, sph = jnp.cos(phi), jnp.sin(phi)

    # ---------------- FNO path (fused dense operators, bf16 MXU / f32 acc) ----------------
    h1 = jnp.dot(l1t_ref[...], xf_bf, preferred_element_type=f32) + b1v_ref[...]
    h1 = jax.nn.gelu(h1, approximate=True)                            # [480, TB] f32
    hc = (jnp.dot(k2ct_ref[...], h1.astype(bf16), preferred_element_type=f32)
          + b2cv_ref[...])                                            # [32, TB]
    h3 = jax.nn.gelu(jnp.dot(w1t_ref[...], hc.astype(bf16), preferred_element_type=f32)
                     + b1h_ref[...], approximate=True)                # [64, TB]
    dnn = (jnp.dot(w2t_ref[...], h3.astype(bf16), preferred_element_type=f32)
           + b2h_ref[...])                                            # [16, TB], rows 0-3 valid

    # ---------------- combine:  y = (x0*e^{i phi} + delta + fno_ctr) / sqrt(P) ----------------
    out_r = isp * (x0r * cph - x0i * sph + d_r + dnn[0:NMODES])
    out_i = isp * (x0r * sph + x0i * cph + d_i + dnn[NMODES:2 * NMODES])
    out_ref[...] = jnp.concatenate([out_r, out_i], axis=0)            # [4, TB]


# ------------------------- wrapper -------------------------
def _pick_tb(B):
    """Lane-dense batch tile: big enough to fill the 256-wide MXU (v6e/v7x) and amortize
    per-step overhead, but keep >= 2 grid steps so v7x's two TensorCores both get work."""
    tb = 512
    while tb > 128 and pl.cdiv(B, tb) < 2:
        tb //= 2
    return tb


def eq_ampbc_add_fno(x, task_info, kp, tb=None):
    """x: [B, W, NMODES] complex64, task_info: [B, 4] -> [B, NMODES] complex64."""
    B = x.shape[0]
    c = x.shape[1] // 2
    tb = tb or _pick_tb(B)

    P = (10.0 ** (task_info[:, 0] / 10.0) / NMODES).astype(jnp.float32)
    sp = jnp.sqrt(P)
    isp = 1.0 / sp

    # [F_DIM, B] feature slab, pre-scaled by sqrt(P); row = plane*30 + mode*15 + tap
    xw = x[:, c - CTR: c + CTR + 1, :]                                   # [B, 15, 2]
    xr = jnp.transpose(xw.real, (2, 1, 0)).reshape(NMODES * M_NN, B)
    xi = jnp.transpose(xw.imag, (2, 1, 0)).reshape(NMODES * M_NN, B)
    xf = (jnp.concatenate([xr, xi], axis=0).astype(jnp.float32) * sp[None, :])   # [60, B]
    xf = jnp.pad(xf, ((0, F_DIM - 2 * NMODES * M_NN), (0, 0)))                   # [64, B]

    # aux block: scaled centre taps (kept f32 for accuracy) + 1/sqrt(P)
    rows = np.array([feat(0, 0, CTR), feat(0, 1, CTR), feat(1, 0, CTR), feat(1, 1, CTR)])
    aux = jnp.concatenate([xf[rows, :], isp[None, :].astype(jnp.float32),
                           jnp.zeros((3, B), jnp.float32)], axis=0)              # [8, B]

    Bp = tb * pl.cdiv(B, tb)
    if Bp != B:
        xf = jnp.pad(xf, ((0, 0), (0, Bp - B)))
        aux = jnp.pad(aux, ((0, 0), (0, Bp - B)))

    weights = (kp["sel"], kp["cr"], kp["ci"], kp["c00"], kp["wmask"],
               kp["l1t"], kp["b1v"], kp["k2ct"], kp["b2cv"],
               kp["w1t"], kp["b1h"], kp["w2t"], kp["b2h"])

    def bcast(arr):  # constant-index weight block: fetched once, reused every grid step
        nd = arr.ndim
        return pl.BlockSpec(arr.shape, lambda b, _nd=nd: (0,) * _nd)

    in_specs = [pl.BlockSpec((F_DIM, tb), lambda b: (0, b)),
                pl.BlockSpec((8, tb), lambda b: (0, b))] + [bcast(w) for w in weights]

    out = pl.pallas_call(
        fused_kernel,
        grid=(Bp // tb,),
        in_specs=in_specs,
        out_specs=pl.BlockSpec((2 * NMODES, tb), lambda b: (0, b)),
        out_shape=jax.ShapeDtypeStruct((2 * NMODES, Bp), jnp.float32),
        compiler_params=pltpu.CompilerParams(dimension_semantics=("parallel",)),
    )(xf, aux, *weights)

    out = out[:, :B]                                                 # [4, B]
    return (out[:NMODES] + 1j * out[NMODES:]).T                      # [B, NMODES] complex64


# ------------------------- host-side parameter preparation -------------------------
def build_kernel_params(p):
    """Precompute kernel operands: merged PBC selection matrix + fused FNO linear operators."""
    # --- PBC: one selection matrix over the full feature slab (K = F_DIM) ---
    idx = np.asarray(p["pbc_idx"])
    sel = np.zeros((SEL_ROWS, F_DIM), np.float32)
    for i, (m, n) in enumerate(idx):
        for mode in range(NMODES):
            r = mode * HP + i
            sel[0 * 2 * HP + r, feat(0, mode, CTR + m)] = 1.0          # Am real
            sel[1 * 2 * HP + r, feat(1, mode, CTR + m)] = 1.0          # Am imag
            sel[2 * 2 * HP + r, feat(0, mode, CTR + n)] = 1.0          # An real
            sel[3 * 2 * HP + r, feat(1, mode, CTR + n)] = 1.0          # An imag
            sel[4 * 2 * HP + r, feat(0, mode, CTR + m + n)] = 1.0      # Bm real
            sel[5 * 2 * HP + r, feat(1, mode, CTR + m + n)] = 1.0      # Bm imag

    cr = np.zeros((HP, 1), np.float32)
    ci = np.zeros((HP, 1), np.float32)
    cr[:H_PBC, 0] = np.asarray(p["pbc_cr"]).reshape(-1)
    ci[:H_PBC, 0] = np.asarray(p["pbc_ci"]).reshape(-1)
    c00 = np.asarray(p["pbc_c00"]).reshape(NMODES, 1).astype(np.float32)

    wmask = np.zeros((F_DIM, 1), np.float32)
    for plane in range(2):
        for mode in range(NMODES):
            for tap in range(CTR - M_PBC // 2, CTR + M_PBC // 2 + 1):
                wmask[feat(plane, mode, tap), 0] = 1.0

    # --- FNO: fold (fc0 + spectral block 1) and (spectral block 2 @ centre tap) ---
    M, Wd = M_NN, WIDTH
    fr = np.asarray(p["fr"], np.float64)
    fi = np.asarray(p["fi"], np.float64)
    gr = np.asarray(p["gr"], np.float64)
    gi = np.asarray(p["gi"], np.float64)

    def block_operator(swr, swi, cw):
        swr = np.asarray(swr, np.float64)
        swi = np.asarray(swi, np.float64)
        cw = np.asarray(cw, np.float64)
        K = (np.einsum("km,nk,kio->mino", fr, gr, swr)
             + np.einsum("km,nk,kio->mino", fr, gi, swi)
             - np.einsum("km,nk,kio->mino", fi, gr, swi)
             + np.einsum("km,nk,kio->mino", fi, gi, swr))
        K += np.einsum("mn,io->mino", np.eye(M), cw)
        return K.reshape(M * Wd, M * Wd)        # rows: in (m*W+i), cols: out (n*W+o)

    K1 = block_operator(p["swr0"], p["swi0"], p["cw0"])
    K2 = block_operator(p["swr1"], p["swi1"], p["cw1"])
    w0 = np.asarray(p["w0"], np.float64)                     # [C4, W]
    b0 = np.asarray(p["b0"], np.float64).reshape(-1)
    cb0 = np.asarray(p["cb0"], np.float64).reshape(-1)
    cb1 = np.asarray(p["cb1"], np.float64).reshape(-1)

    # kernel input-feature order: (plane(real,imag), mode, tap) -> 60 rows, padded to F_DIM
    W0_big = np.zeros((F_DIM, M * Wd), np.float64)
    for plane in range(2):
        for mode in range(NMODES):
            ch = plane * NMODES + mode
            for tap in range(M):
                W0_big[feat(plane, mode, tap), tap * Wd:(tap + 1) * Wd] = w0[ch]
    L1 = W0_big @ K1                                         # [F_DIM, 480]
    bias1 = np.tile(b0, M) @ K1 + np.tile(cb0, M)            # [480]
    K2c = K2[:, CTR * Wd:(CTR + 1) * Wd]                     # [480, 32]

    w2t = np.zeros((16, FC), np.float64)                     # pad output rows 4 -> 16
    w2t[:2 * NMODES] = np.asarray(p["w2"], np.float64).T
    b2h = np.zeros((16, 1), np.float64)
    b2h[:2 * NMODES, 0] = np.asarray(p["b2"], np.float64).reshape(-1)

    asf32 = lambda a: jnp.asarray(np.asarray(a), dtype=jnp.float32)
    asbf16 = lambda a: jnp.asarray(np.asarray(a), dtype=jnp.bfloat16)
    return {
        "sel": asbf16(sel), "cr": asf32(cr), "ci": asf32(ci),
        "c00": asf32(c00), "wmask": asf32(wmask),
        "l1t": asbf16(L1.T), "b1v": asf32(bias1.reshape(-1, 1)),
        "k2ct": asbf16(K2c.T), "b2cv": asf32(cb1.reshape(-1, 1)),
        "w1t": asbf16(np.asarray(p["w1"]).T), "b1h": asf32(np.asarray(p["b1"]).reshape(-1, 1)),
        "w2t": asbf16(w2t), "b2h": asf32(b2h),
    }


# ------------------------- deterministic parameter init -------------------------
def init_params(key):
    ks = jax.random.split(key, 12)
    H = H_PBC
    C4 = 2 * NMODES

    def dense(k, shape, scale):
        return scale * jax.random.normal(k, shape, jnp.float32)

    p = {"pbc_idx": _PBC_IDX}
    p["pbc_cr"] = dense(ks[0], (1, 1, H), 0.01)
    p["pbc_ci"] = dense(ks[1], (1, 1, H), 0.01)
    p["pbc_c00"] = dense(ks[2], (1, NMODES), 0.01)

    p["w0"] = dense(ks[3], (C4, WIDTH), 1.0 / np.sqrt(C4))
    p["b0"] = jnp.zeros((1, WIDTH), jnp.float32)
    p["swr0"] = dense(ks[4], (MODES, WIDTH, WIDTH), 1.0 / WIDTH)
    p["swi0"] = dense(ks[5], (MODES, WIDTH, WIDTH), 1.0 / WIDTH)
    p["cw0"] = dense(ks[6], (WIDTH, WIDTH), 1.0 / np.sqrt(WIDTH))
    p["cb0"] = jnp.zeros((1, WIDTH), jnp.float32)
    p["swr1"] = dense(ks[7], (MODES, WIDTH, WIDTH), 1.0 / WIDTH)
    p["swi1"] = dense(ks[8], (MODES, WIDTH, WIDTH), 1.0 / WIDTH)
    p["cw1"] = dense(ks[9], (WIDTH, WIDTH), 1.0 / np.sqrt(WIDTH))
    p["cb1"] = jnp.zeros((1, WIDTH), jnp.float32)
    p["w1"] = dense(ks[10], (WIDTH, FC), 1.0 / np.sqrt(WIDTH))
    p["b1"] = jnp.zeros((1, FC), jnp.float32)
    p["w2"] = dense(ks[11], (FC, C4), 1.0 / np.sqrt(FC))
    p["b2"] = jnp.zeros((1, C4), jnp.float32)

    # dense DFT matrices replacing rfft/irfft of SpectralConv1d (exact, MODES < M_NN/2)
    n = np.arange(M_NN)
    k = np.arange(MODES)
    ang_f = 2.0 * np.pi * np.outer(k, n) / M_NN
    p["fr"] = jnp.asarray(np.cos(ang_f), jnp.float32)
    p["fi"] = jnp.asarray(-np.sin(ang_f), jnp.float32)
    ang_g = 2.0 * np.pi * np.outer(n, k) / M_NN
    wk = np.ones(MODES)
    wk[1:] = 2.0
    p["gr"] = jnp.asarray(np.cos(ang_g) * wk / M_NN, jnp.float32)
    p["gi"] = jnp.asarray(-np.sin(ang_g) * wk / M_NN, jnp.float32)
    return p


# ------------------------- plain-numpy reference (unfused) for self-check -------------------------
def reference(x, task_info, p):
    x = np.asarray(x)
    ti = np.asarray(task_info)
    B, W, _ = x.shape
    c = W // 2
    P = 10.0 ** (ti[:, 0] / 10.0) / NMODES
    sp = np.sqrt(P)

    # PBC
    xp = x[:, c - M_PBC // 2: c + M_PBC // 2 + 1, :] * sp[:, None, None]
    idx = np.asarray(p["pbc_idx"])
    L = M_PBC // 2
    Am = xp[:, idx[:, 0] + L, :]
    An = xp[:, idx[:, 1] + L, :]
    Bm = xp[:, idx[:, 0] + idx[:, 1] + L, :]
    S = np.sum(An * np.conj(Bm), axis=-1)
    F = Am * S[:, :, None]
    C = np.asarray(p["pbc_cr"]).reshape(-1) + 1j * np.asarray(p["pbc_ci"]).reshape(-1)
    delta = np.einsum("h,bhp->bp", C, F)
    pw = np.sum(np.abs(xp) ** 2, axis=(1, 2))
    phi = np.asarray(p["pbc_c00"]).reshape(1, NMODES) * pw[:, None]
    x0 = xp[:, L, :]
    y_pbc = (x0 * np.exp(1j * phi) + delta) / sp[:, None]

    # FNO
    xn = x[:, c - M_NN // 2: c + M_NN // 2 + 1, :] * sp[:, None, None]
    x0n = xn[:, M_NN // 2, :]
    h = np.concatenate([xn.real, xn.imag], axis=-1).astype(np.float32)
    h = h @ np.asarray(p["w0"]) + np.asarray(p["b0"])

    def gelu(v):
        return 0.5 * v * (1.0 + np.tanh(np.sqrt(2.0 / np.pi) * (v + 0.044715 * v ** 3)))

    def block(h, swr, swi, cw, cb):
        yr = np.einsum("km,bmw->bkw", np.asarray(p["fr"]), h)
        yi = np.einsum("km,bmw->bkw", np.asarray(p["fi"]), h)
        zr = (np.einsum("bki,kio->bko", yr, np.asarray(swr)) -
              np.einsum("bki,kio->bko", yi, np.asarray(swi)))
        zi = (np.einsum("bki,kio->bko", yr, np.asarray(swi)) +
              np.einsum("bki,kio->bko", yi, np.asarray(swr)))
        hs = (np.einsum("mk,bkw->bmw", np.asarray(p["gr"]), zr) +
              np.einsum("mk,bkw->bmw", np.asarray(p["gi"]), zi))
        hc = h @ np.asarray(cw) + np.asarray(cb)
        return hs + hc

    h = gelu(block(h, p["swr0"], p["swi0"], p["cw0"], p["cb0"]))
    h = block(h, p["swr1"], p["swi1"], p["cw1"], p["cb1"])
    h = gelu(h @ np.asarray(p["w1"]) + np.asarray(p["b1"]))
    h = h @ np.asarray(p["w2"]) + np.asarray(p["b2"])
    ctr = h[:, M_NN // 2, :]
    y_nn = (x0n + (ctr[:, :NMODES] + 1j * ctr[:, NMODES:])) / sp[:, None]

    return y_pbc + y_nn - x[:, c, :]


# ------------------------- main -------------------------
if __name__ == "__main__":
    key = jax.random.PRNGKey(0)
    kx, kpar = jax.random.split(key, 2)
    B, WLEN = 256, 16                                 # window >= M = max(9, 15) = 15
    xr_ = jax.random.normal(kx, (B, WLEN, NMODES), jnp.float32)
    xi_ = jax.random.normal(jax.random.fold_in(kx, 1), (B, WLEN, NMODES), jnp.float32)
    x = (xr_ + 1j * xi_).astype(jnp.complex64)
    pdbm = jnp.linspace(-2.0, 4.0, B).astype(jnp.float32)      # launch power [dBm]
    task_info = jnp.stack([pdbm,
                           jnp.zeros(B, jnp.float32),
                           jnp.zeros(B, jnp.float32),
                           jnp.zeros(B, jnp.float32)], axis=-1)   # [B, 4]

    params = init_params(kpar)
    kparams = build_kernel_params(params)

    y = eq_ampbc_add_fno(x, task_info, kparams)
    y = jax.block_until_ready(y)

    assert y.shape == (B, NMODES)
    assert bool(jnp.all(jnp.isfinite(y.real))) and bool(jnp.all(jnp.isfinite(y.imag)))

    y_ref = reference(x, task_info, params)
    y_np = np.asarray(y)
    # bf16 MXU operands -> slightly looser elementwise tolerance, plus a global L2 check
    np.testing.assert_allclose(y_np, y_ref, rtol=5e-2, atol=5e-2)
    rel = np.linalg.norm(y_np - y_ref) / np.linalg.norm(y_ref)
    assert rel < 2e-2, f"relative L2 error too large: {rel}"
    print("KERNEL_OK")
</pallas_src>

<mosaic_0001>
module attributes {stable_mosaic.version = 11 : i64} {
  func.func @fused_kernel(%arg0: i32, %arg1: memref<64x128xf32, #tpu.memory_space<vmem>>, %arg2: memref<8x128xf32, #tpu.memory_space<vmem>>, %arg3: memref<384x64xbf16, #tpu.memory_space<vmem>>, %arg4: memref<32x1xf32, #tpu.memory_space<vmem>>, %arg5: memref<32x1xf32, #tpu.memory_space<vmem>>, %arg6: memref<2x1xf32, #tpu.memory_space<vmem>>, %arg7: memref<64x1xf32, #tpu.memory_space<vmem>>, %arg8: memref<480x64xbf16, #tpu.memory_space<vmem>>, %arg9: memref<480x1xf32, #tpu.memory_space<vmem>>, %arg10: memref<32x480xbf16, #tpu.memory_space<vmem>>, %arg11: memref<32x1xf32, #tpu.memory_space<vmem>>, %arg12: memref<64x32xbf16, #tpu.memory_space<vmem>>, %arg13: memref<64x1xf32, #tpu.memory_space<vmem>>, %arg14: memref<16x64xbf16, #tpu.memory_space<vmem>>, %arg15: memref<16x1xf32, #tpu.memory_space<vmem>>, %arg16: memref<4x128xf32, #tpu.memory_space<vmem>>) attributes {dimension_semantics = [#tpu.dimension_semantics<parallel>], iteration_bounds = array<i64: 2>, scalar_prefetch = 0 : i64, scratch_operands = 0 : i64, tpu.core_type = #tpu.core_type<tc>, window_params = [{transform_indices = @transform_0, window_bounds = array<i64: 64, 128>}, {transform_indices = @transform_1, window_bounds = array<i64: 8, 128>}, {pipeline_mode = #tpu.pipeline_mode<synchronous>, transform_indices = @transform_2, window_bounds = array<i64: 384, 64>}, {pipeline_mode = #tpu.pipeline_mode<synchronous>, transform_indices = @transform_3, window_bounds = array<i64: 32, 1>}, {pipeline_mode = #tpu.pipeline_mode<synchronous>, transform_indices = @transform_4, window_bounds = array<i64: 32, 1>}, {pipeline_mode = #tpu.pipeline_mode<synchronous>, transform_indices = @transform_5, window_bounds = array<i64: 2, 1>}, {pipeline_mode = #tpu.pipeline_mode<synchronous>, transform_indices = @transform_6, window_bounds = array<i64: 64, 1>}, {pipeline_mode = #tpu.pipeline_mode<synchronous>, transform_indices = @transform_7, window_bounds = array<i64: 480, 64>}, {pipeline_mode = #tpu.pipeline_mode<synchronous>, transform_indices = @transform_8, window_bounds = array<i64: 480, 1>}, {pipeline_mode = #tpu.pipeline_mode<synchronous>, transform_indices = @transform_9, window_bounds = array<i64: 32, 480>}, {pipeline_mode = #tpu.pipeline_mode<synchronous>, transform_indices = @transform_10, window_bounds = array<i64: 32, 1>}, {pipeline_mode = #tpu.pipeline_mode<synchronous>, transform_indices = @transform_11, window_bounds = array<i64: 64, 32>}, {pipeline_mode = #tpu.pipeline_mode<synchronous>, transform_indices = @transform_12, window_bounds = array<i64: 64, 1>}, {pipeline_mode = #tpu.pipeline_mode<synchronous>, transform_indices = @transform_13, window_bounds = array<i64: 16, 64>}, {pipeline_mode = #tpu.pipeline_mode<synchronous>, transform_indices = @transform_14, window_bounds = array<i64: 16, 1>}, {transform_indices = @transform_15, window_bounds = array<i64: 4, 128>}]} {
    %c0 = arith.constant 0 : index
    %c0_0 = arith.constant 0 : index
    %0 = vector.load %arg1[%c0, %c0_0] : memref<64x128xf32, #tpu.memory_space<vmem>>, vector<64x128xf32>
    %c0_1 = arith.constant 0 : index
    %c0_2 = arith.constant 0 : index
    %1 = vector.load %arg2[%c0_1, %c0_2] : memref<8x128xf32, #tpu.memory_space<vmem>>, vector<8x128xf32>
    %2 = vector.extract_strided_slice %1 {offsets = [0, 0], sizes = [2, 128], strides = [1, 1]} : vector<8x128xf32> to vector<2x128xf32>
    %3 = vector.extract_strided_slice %1 {offsets = [2, 0], sizes = [2, 128], strides = [1, 1]} : vector<8x128xf32> to vector<2x128xf32>
    %4 = vector.extract_strided_slice %1 {offsets = [4, 0], sizes = [1, 128], strides = [1, 1]} : vector<8x128xf32> to vector<1x128xf32>
    %5 = arith.truncf %0 : vector<64x128xf32> to vector<64x128xbf16>
    %c0_3 = arith.constant 0 : index
    %c0_4 = arith.constant 0 : index
    %6 = vector.load %arg3[%c0_3, %c0_4] : memref<384x64xbf16, #tpu.memory_space<vmem>>, vector<384x64xbf16>
    %cst = arith.constant dense<0.000000e+00> : vector<384x128xf32>
    %7 = tpu.matmul %6, %5, %cst {dimension_numbers = #tpu.dot_dimension_numbers<[1], [0], [0], [1], [0, 0, 1, 1], [], []>} : vector<384x64xbf16>, vector<64x128xbf16>, vector<384x128xf32> -> vector<384x128xf32>
    %8 = vector.extract_strided_slice %7 {offsets = [0, 0], sizes = [64, 128], strides = [1, 1]} : vector<384x128xf32> to vector<64x128xf32>
    %9 = vector.extract_strided_slice %7 {offsets = [64, 0], sizes = [64, 128], strides = [1, 1]} : vector<384x128xf32> to vector<64x128xf32>
    %10 = vector.extract_strided_slice %7 {offsets = [128, 0], sizes = [64, 128], strides = [1, 1]} : vector<384x128xf32> to vector<64x128xf32>
    %11 = vector.extract_strided_slice %7 {offsets = [192, 0], sizes = [64, 128], strides = [1, 1]} : vector<384x128xf32> to vector<64x128xf32>
    %12 = vector.extract_strided_slice %7 {offsets = [256, 0], sizes = [64, 128], strides = [1, 1]} : vector<384x128xf32> to vector<64x128xf32>
    %13 = vector.extract_strided_slice %7 {offsets = [320, 0], sizes = [64, 128], strides = [1, 1]} : vector<384x128xf32> to vector<64x128xf32>
    %14 = vector.extract_strided_slice %10 {offsets = [0, 0], sizes = [32, 128], strides = [1, 1]} : vector<64x128xf32> to vector<32x128xf32>
    %15 = vector.extract_strided_slice %12 {offsets = [0, 0], sizes = [32, 128], strides = [1, 1]} : vector<64x128xf32> to vector<32x128xf32>
    %16 = arith.mulf %14, %15 : vector<32x128xf32>
    %17 = vector.extract_strided_slice %11 {offsets = [0, 0], sizes = [32, 128], strides = [1, 1]} : vector<64x128xf32> to vector<32x128xf32>
    %18 = vector.extract_strided_slice %13 {offsets = [0, 0], sizes = [32, 128], strides = [1, 1]} : vector<64x128xf32> to vector<32x128xf32>
    %19 = arith.mulf %17, %18 : vector<32x128xf32>
    %20 = arith.addf %16, %19 : vector<32x128xf32>
    %21 = vector.extract_strided_slice %10 {offsets = [32, 0], sizes = [32, 128], strides = [1, 1]} : vector<64x128xf32> to vector<32x128xf32>
    %22 = vector.extract_strided_slice %12 {offsets = [32, 0], sizes = [32, 128], strides = [1, 1]} : vector<64x128xf32> to vector<32x128xf32>
    %23 = arith.mulf %21, %22 : vector<32x128xf32>
    %24 = arith.addf %20, %23 : vector<32x128xf32>
    %25 = vector.extract_strided_slice %11 {offsets = [32, 0], sizes = [32, 128], strides = [1, 1]} : vector<64x128xf32> to vector<32x128xf32>
    %26 = vector.extract_strided_slice %13 {offsets = [32, 0], sizes = [32, 128], strides = [1, 1]} : vector<64x128xf32> to vector<32x128xf32>
    %27 = arith.mulf %25, %26 : vector<32x128xf32>
    %28 = arith.addf %24, %27 : vector<32x128xf32>
    %29 = vector.extract_strided_slice %11 {offsets = [0, 0], sizes = [32, 128], strides = [1, 1]} : vector<64x128xf32> to vector<32x128xf32>
    %30 = vector.extract_strided_slice %12 {offsets = [0, 0], sizes = [32, 128], strides = [1, 1]} : vector<64x128xf32> to vector<32x128xf32>
    %31 = arith.mulf %29, %30 : vector<32x128xf32>
    %32 = vector.extract_strided_slice %10 {offsets = [0, 0], sizes = [32, 128], strides = [1, 1]} : vector<64x128xf32> to vector<32x128xf32>
    %33 = vector.extract_strided_slice %13 {offsets = [0, 0], sizes = [32, 128], strides = [1, 1]} : vector<64x128xf32> to vector<32x128xf32>
    %34 = arith.mulf %32, %33 : vector<32x128xf32>
    %35 = arith.subf %31, %34 : vector<32x128xf32>
    %36 = vector.extract_strided_slice %11 {offsets = [32, 0], sizes = [32, 128], strides = [1, 1]} : vector<64x128xf32> to vector<32x128xf32>
    %37 = vector.extract_strided_slice %12 {offsets = [32, 0], sizes = [32, 128], strides = [1, 1]} : vector<64x128xf32> to vector<32x128xf32>
    %38 = arith.mulf %36, %37 : vector<32x128xf32>
    %39 = arith.addf %35, %38 : vector<32x128xf32>
    %40 = vector.extract_strided_slice %10 {offsets = [32, 0], sizes = [32, 128], strides = [1, 1]} : vector<64x128xf32> to vector<32x128xf32>
    %41 = vector.extract_strided_slice %13 {offsets = [32, 0], sizes = [32, 128], strides = [1, 1]} : vector<64x128xf32> to vector<32x128xf32>
    %42 = arith.mulf %40, %41 : vector<32x128xf32>
    %43 = arith.subf %39, %42 : vector<32x128xf32>
    %c0_5 = arith.constant 0 : index
    %c0_6 = arith.constant 0 : index
    %44 = vector.load %arg4[%c0_5, %c0_6] : memref<32x1xf32, #tpu.memory_space<vmem>>, vector<32x1xf32>
    %45 = vector.shape_cast %44 : vector<32x1xf32> to vector<32x1xf32>
    %46 = vector.broadcast %45 : vector<32x1xf32> to vector<32x128xf32>
    %c0_7 = arith.constant 0 : index
    %c0_8 = arith.constant 0 : index
    %47 = vector.load %arg5[%c0_7, %c0_8] : memref<32x1xf32, #tpu.memory_space<vmem>>, vector<32x1xf32>
    %48 = vector.shape_cast %47 : vector<32x1xf32> to vector<32x1xf32>
    %49 = vector.broadcast %48 : vector<32x1xf32> to vector<32x128xf32>
    %50 = arith.mulf %46, %28 : vector<32x128xf32>
    %51 = arith.mulf %49, %43 : vector<32x128xf32>
    %52 = arith.subf %50, %51 : vector<32x128xf32>
    %53 = arith.mulf %46, %43 : vector<32x128xf32>
    %54 = arith.mulf %49, %28 : vector<32x128xf32>
    %55 = arith.addf %53, %54 : vector<32x128xf32>
    %56 = vector.extract_strided_slice %8 {offsets = [0, 0], sizes = [32, 128], strides = [1, 1]} : vector<64x128xf32> to vector<32x128xf32>
    %57 = vector.extract_strided_slice %9 {offsets = [0, 0], sizes = [32, 128], strides = [1, 1]} : vector<64x128xf32> to vector<32x128xf32>
    %58 = arith.mulf %56, %52 : vector<32x128xf32>
    %59 = arith.mulf %57, %55 : vector<32x128xf32>
    %60 = arith.subf %58, %59 : vector<32x128xf32>
    %cst_9 = arith.constant dense<0.000000e+00> : vector<128xf32>
    %61 = vector.multi_reduction <add>, %60, %cst_9 [0] : vector<32x128xf32> to vector<128xf32>
    %62 = vector.shape_cast %61 : vector<128xf32> to vector<1x128xf32>
    %63 = arith.mulf %56, %55 : vector<32x128xf32>
    %64 = arith.mulf %57, %52 : vector<32x128xf32>
    %65 = arith.addf %63, %64 : vector<32x128xf32>
    %cst_10 = arith.constant dense<0.000000e+00> : vector<128xf32>
    %66 = vector.multi_reduction <add>, %65, %cst_10 [0] : vector<32x128xf32> to vector<128xf32>
    %67 = vector.shape_cast %66 : vector<128xf32> to vector<1x128xf32>
    %68 = vector.extract_strided_slice %8 {offsets = [32, 0], sizes = [32, 128], strides = [1, 1]} : vector<64x128xf32> to vector<32x128xf32>
    %69 = vector.extract_strided_slice %9 {offsets = [32, 0], sizes = [32, 128], strides = [1, 1]} : vector<64x128xf32> to vector<32x128xf32>
    %70 = arith.mulf %68, %52 : vector<32x128xf32>
    %71 = arith.mulf %69, %55 : vector<32x128xf32>
    %72 = arith.subf %70, %71 : vector<32x128xf32>
    %cst_11 = arith.constant dense<0.000000e+00> : vector<128xf32>
    %73 = vector.multi_reduction <add>, %72, %cst_11 [0] : vector<32x128xf32> to vector<128xf32>
    %74 = vector.shape_cast %73 : vector<128xf32> to vector<1x128xf32>
    %75 = arith.mulf %68, %55 : vector<32x128xf32>
    %76 = arith.mulf %69, %52 : vector<32x128xf32>
    %77 = arith.addf %75, %76 : vector<32x128xf32>
    %cst_12 = arith.constant dense<0.000000e+00> : vector<128xf32>
    %78 = vector.multi_reduction <add>, %77, %cst_12 [0] : vector<32x128xf32> to vector<128xf32>
    %79 = vector.shape_cast %78 : vector<128xf32> to vector<1x128xf32>
    %80 = tpu.concatenate %62, %74 in 0 : vector<1x128xf32>, vector<1x128xf32> -> vector<2x128xf32>
    %81 = tpu.concatenate %67, %79 in 0 : vector<1x128xf32>, vector<1x128xf32> -> vector<2x128xf32>
    %82 = arith.mulf %0, %0 : vector<64x128xf32>
    %c0_13 = arith.constant 0 : index
    %c0_14 = arith.constant 0 : index
    %83 = vector.load %arg7[%c0_13, %c0_14] : memref<64x1xf32, #tpu.memory_space<vmem>>, vector<64x1xf32>
    %84 = vector.broadcast %83 : vector<64x1xf32> to vector<64x128xf32>
    %85 = arith.mulf %82, %84 : vector<64x128xf32>
    %cst_15 = arith.constant dense<0.000000e+00> : vector<128xf32>
    %86 = vector.multi_reduction <add>, %85, %cst_15 [0] : vector<64x128xf32> to vector<128xf32>
    %87 = vector.shape_cast %86 : vector<128xf32> to vector<1x128xf32>
    %c0_16 = arith.constant 0 : index
    %c0_17 = arith.constant 0 : index
    %88 = vector.load %arg6[%c0_16, %c0_17] : memref<2x1xf32, #tpu.memory_space<vmem>>, vector<2x1xf32>
    %89 = vector.broadcast %88 : vector<2x1xf32> to vector<2x128xf32>
    %90 = vector.broadcast %87 : vector<1x128xf32> to vector<2x128xf32>
    %91 = arith.mulf %89, %90 : vector<2x128xf32>
    %92 = math.cos %91 : vector<2x128xf32>
    %93 = math.sin %91 : vector<2x128xf32>
    %c0_18 = arith.constant 0 : index
    %c0_19 = arith.constant 0 : index
    %94 = vector.load %arg8[%c0_18, %c0_19] : memref<480x64xbf16, #tpu.memory_space<vmem>>, vector<480x64xbf16>
    %cst_20 = arith.constant dense<0.000000e+00> : vector<480x128xf32>
    %95 = tpu.matmul %94, %5, %cst_20 {dimension_numbers = #tpu.dot_dimension_numbers<[1], [0], [0], [1], [0, 0, 1, 1], [], []>} : vector<480x64xbf16>, vector<64x128xbf16>, vector<480x128xf32> -> vector<480x128xf32>
    %c0_21 = arith.constant 0 : index
    %c0_22 = arith.constant 0 : index
    %96 = vector.load %arg9[%c0_21, %c0_22] : memref<480x1xf32, #tpu.memory_space<vmem>>, vector<480x1xf32>
    %97 = vector.broadcast %96 : vector<480x1xf32> to vector<480x128xf32>
    %98 = arith.addf %95, %97 : vector<480x128xf32>
    %99 = arith.mulf %98, %98 : vector<480x128xf32>
    %100 = arith.mulf %98, %99 : vector<480x128xf32>
    %cst_23 = arith.constant 4.471500e-02 : f32
    %101 = vector.broadcast %cst_23 : f32 to vector<480x128xf32>
    %102 = arith.mulf %101, %100 : vector<480x128xf32>
    %103 = arith.addf %98, %102 : vector<480x128xf32>
    %cst_24 = arith.constant 0.797884583 : f32
    %104 = vector.broadcast %cst_24 : f32 to vector<480x128xf32>
    %105 = arith.mulf %104, %103 : vector<480x128xf32>
    %106 = math.tanh %105 : vector<480x128xf32>
    %cst_25 = arith.constant 1.000000e+00 : f32
    %107 = vector.broadcast %cst_25 : f32 to vector<480x128xf32>
    %108 = arith.addf %107, %106 : vector<480x128xf32>
    %cst_26 = arith.constant 5.000000e-01 : f32
    %109 = vector.broadcast %cst_26 : f32 to vector<480x128xf32>
    %110 = arith.mulf %109, %108 : vector<480x128xf32>
    %111 = arith.mulf %98, %110 : vector<480x128xf32>
    %c0_27 = arith.constant 0 : index
    %c0_28 = arith.constant 0 : index
    %112 = vector.load %arg10[%c0_27, %c0_28] : memref<32x480xbf16, #tpu.memory_space<vmem>>, vector<32x480xbf16>
    %113 = arith.truncf %111 : vector<480x128xf32> to vector<480x128xbf16>
    %cst_29 = arith.constant dense<0.000000e+00> : vector<32x128xf32>
    %114 = tpu.matmul %112, %113, %cst_29 {dimension_numbers = #tpu.dot_dimension_numbers<[1], [0], [0], [1], [0, 0, 1, 1], [], []>} : vector<32x480xbf16>, vector<480x128xbf16>, vector<32x128xf32> -> vector<32x128xf32>
    %c0_30 = arith.constant 0 : index
    %c0_31 = arith.constant 0 : index
    %115 = vector.load %arg11[%c0_30, %c0_31] : memref<32x1xf32, #tpu.memory_space<vmem>>, vector<32x1xf32>
    %116 = vector.broadcast %115 : vector<32x1xf32> to vector<32x128xf32>
    %117 = arith.addf %114, %116 : vector<32x128xf32>
    %c0_32 = arith.constant 0 : index
    %c0_33 = arith.constant 0 : index
    %118 = vector.load %arg12[%c0_32, %c0_33] : memref<64x32xbf16, #tpu.memory_space<vmem>>, vector<64x32xbf16>
    %119 = arith.truncf %117 : vector<32x128xf32> to vector<32x128xbf16>
    %cst_34 = arith.constant dense<0.000000e+00> : vector<64x128xf32>
    %120 = tpu.matmul %118, %119, %cst_34 {dimension_numbers = #tpu.dot_dimension_numbers<[1], [0], [0], [1], [0, 0, 1, 1], [], []>} : vector<64x32xbf16>, vector<32x128xbf16>, vector<64x128xf32> -> vector<64x128xf32>
    %c0_35 = arith.constant 0 : index
    %c0_36 = arith.constant 0 : index
    %121 = vector.load %arg13[%c0_35, %c0_36] : memref<64x1xf32, #tpu.memory_space<vmem>>, vector<64x1xf32>
    %122 = vector.broadcast %121 : vector<64x1xf32> to vector<64x128xf32>
    %123 = arith.addf %120, %122 : vector<64x128xf32>
    %124 = arith.mulf %123, %123 : vector<64x128xf32>
    %125 = arith.mulf %123, %124 : vector<64x128xf32>
    %cst_37 = arith.constant 4.471500e-02 : f32
    %126 = vector.broadcast %cst_37 : f32 to vector<64x128xf32>
    %127 = arith.mulf %126, %125 : vector<64x128xf32>
    %128 = arith.addf %123, %127 : vector<64x128xf32>
    %cst_38 = arith.constant 0.797884583 : f32
    %129 = vector.broadcast %cst_38 : f32 to vector<64x128xf32>
    %130 = arith.mulf %129, %128 : vector<64x128xf32>
    %131 = math.tanh %130 : vector<64x128xf32>
    %cst_39 = arith.constant 1.000000e+00 : f32
    %132 = vector.broadcast %cst_39 : f32 to vector<64x128xf32>
    %133 = arith.addf %132, %131 : vector<64x128xf32>
    %cst_40 = arith.constant 5.000000e-01 : f32
    %134 = vector.broadcast %cst_40 : f32 to vector<64x128xf32>
    %135 = arith.mulf %134, %133 : vector<64x128xf32>
    %136 = arith.mulf %123, %135 : vector<64x128xf32>
    %c0_41 = arith.constant 0 : index
    %c0_42 = arith.constant 0 : index
    %137 = vector.load %arg14[%c0_41, %c0_42] : memref<16x64xbf16, #tpu.memory_space<vmem>>, vector<16x64xbf16>
    %138 = arith.truncf %136 : vector<64x128xf32> to vector<64x128xbf16>
    %cst_43 = arith.constant dense<0.000000e+00> : vector<16x128xf32>
    %139 = tpu.matmul %137, %138, %cst_43 {dimension_numbers = #tpu.dot_dimension_numbers<[1], [0], [0], [1], [0, 0, 1, 1], [], []>} : vector<16x64xbf16>, vector<64x128xbf16>, vector<16x128xf32> -> vector<16x128xf32>
    %c0_44 = arith.constant 0 : index
    %c0_45 = arith.constant 0 : index
    %140 = vector.load %arg15[%c0_44, %c0_45] : memref<16x1xf32, #tpu.memory_space<vmem>>, vector<16x1xf32>
    %141 = vector.broadcast %140 : vector<16x1xf32> to vector<16x128xf32>
    %142 = arith.addf %139, %141 : vector<16x128xf32>
    %143 = arith.mulf %2, %92 : vector<2x128xf32>
    %144 = arith.mulf %3, %93 : vector<2x128xf32>
    %145 = arith.subf %143, %144 : vector<2x128xf32>
    %146 = arith.addf %145, %80 : vector<2x128xf32>
    %147 = vector.extract_strided_slice %142 {offsets = [0, 0], sizes = [2, 128], strides = [1, 1]} : vector<16x128xf32> to vector<2x128xf32>
    %148 = arith.addf %146, %147 : vector<2x128xf32>
    %149 = vector.broadcast %4 : vector<1x128xf32> to vector<2x128xf32>
    %150 = arith.mulf %149, %148 : vector<2x128xf32>
    %151 = arith.mulf %2, %93 : vector<2x128xf32>
    %152 = arith.mulf %3, %92 : vector<2x128xf32>
    %153 = arith.addf %151, %152 : vector<2x128xf32>
    %154 = arith.addf %153, %81 : vector<2x128xf32>
    %155 = vector.extract_strided_slice %142 {offsets = [2, 0], sizes = [2, 128], strides = [1, 1]} : vector<16x128xf32> to vector<2x128xf32>
    %156 = arith.addf %154, %155 : vector<2x128xf32>
    %157 = vector.broadcast %4 : vector<1x128xf32> to vector<2x128xf32>
    %158 = arith.mulf %157, %156 : vector<2x128xf32>
    %159 = tpu.concatenate %150, %158 in 0 : vector<2x128xf32>, vector<2x128xf32> -> vector<4x128xf32>
    %c0_46 = arith.constant 0 : index
    %c0_47 = arith.constant 0 : index
    %160 = vector.load %arg16[%c0_46, %c0_47] : memref<4x128xf32, #tpu.memory_space<vmem>>, vector<4x128xf32>
    tpu.vector_store %arg16[%c0_46, %c0_47], %159 {strides = array<i32>} : memref<4x128xf32, #tpu.memory_space<vmem>>, vector<4x128xf32>,
    return
  }
  func.func @transform_0(%arg0: i32) -> (i32, i32) {
    %c0_i32 = arith.constant 0 : i32
    %c0_i32_0 = arith.constant 0 : i32
    return %c0_i32, %arg0 : i32, i32
  }
  func.func @transform_1(%arg0: i32) -> (i32, i32) {
    %c0_i32 = arith.constant 0 : i32
    %c0_i32_0 = arith.constant 0 : i32
    return %c0_i32, %arg0 : i32, i32
  }
  func.func @transform_2(%arg0: i32) -> (i32, i32) {
    %c0_i32 = arith.constant 0 : i32
    %c0_i32_0 = arith.constant 0 : i32
    %c0_i32_1 = arith.constant 0 : i32
    return %c0_i32, %c0_i32_0 : i32, i32
  }
  func.func @transform_3(%arg0: i32) -> (i32, i32) {
    %c0_i32 = arith.constant 0 : i32
    %c0_i32_0 = arith.constant 0 : i32
    %c0_i32_1 = arith.constant 0 : i32
    return %c0_i32, %c0_i32_0 : i32, i32
  }
  func.func @transform_4(%arg0: i32) -> (i32, i32) {
    %c0_i32 = arith.constant 0 : i32
    %c0_i32_0 = arith.constant 0 : i32
    %c0_i32_1 = arith.constant 0 : i32
    return %c0_i32, %c0_i32_0 : i32, i32
  }
  func.func @transform_5(%arg0: i32) -> (i32, i32) {
    %c0_i32 = arith.constant 0 : i32
    %c0_i32_0 = arith.constant 0 : i32
    %c0_i32_1 = arith.constant 0 : i32
    return %c0_i32, %c0_i32_0 : i32, i32
  }
  func.func @transform_6(%arg0: i32) -> (i32, i32) {
    %c0_i32 = arith.constant 0 : i32
    %c0_i32_0 = arith.constant 0 : i32
    %c0_i32_1 = arith.constant 0 : i32
    return %c0_i32, %c0_i32_0 : i32, i32
  }
  func.func @transform_7(%arg0: i32) -> (i32, i32) {
    %c0_i32 = arith.constant 0 : i32
    %c0_i32_0 = arith.constant 0 : i32
    %c0_i32_1 = arith.constant 0 : i32
    return %c0_i32, %c0_i32_0 : i32, i32
  }
  func.func @transform_8(%arg0: i32) -> (i32, i32) {
    %c0_i32 = arith.constant 0 : i32
    %c0_i32_0 = arith.constant 0 : i32
    %c0_i32_1 = arith.constant 0 : i32
    return %c0_i32, %c0_i32_0 : i32, i32
  }
  func.func @transform_9(%arg0: i32) -> (i32, i32) {
    %c0_i32 = arith.constant 0 : i32
    %c0_i32_0 = arith.constant 0 : i32
    %c0_i32_1 = arith.constant 0 : i32
    return %c0_i32, %c0_i32_0 : i32, i32
  }
  func.func @transform_10(%arg0: i32) -> (i32, i32) {
    %c0_i32 = arith.constant 0 : i32
    %c0_i32_0 = arith.constant 0 : i32
    %c0_i32_1 = arith.constant 0 : i32
    return %c0_i32, %c0_i32_0 : i32, i32
  }
  func.func @transform_11(%arg0: i32) -> (i32, i32) {
    %c0_i32 = arith.constant 0 : i32
    %c0_i32_0 = arith.constant 0 : i32
    %c0_i32_1 = arith.constant 0 : i32
    return %c0_i32, %c0_i32_0 : i32, i32
  }
  func.func @transform_12(%arg0: i32) -> (i32, i32) {
    %c0_i32 = arith.constant 0 : i32
    %c0_i32_0 = arith.constant 0 : i32
    %c0_i32_1 = arith.constant 0 : i32
    return %c0_i32, %c0_i32_0 : i32, i32
  }
  func.func @transform_13(%arg0: i32) -> (i32, i32) {
    %c0_i32 = arith.constant 0 : i32
    %c0_i32_0 = arith.constant 0 : i32
    %c0_i32_1 = arith.constant 0 : i32
    return %c0_i32, %c0_i32_0 : i32, i32
  }
  func.func @transform_14(%arg0: i32) -> (i32, i32) {
    %c0_i32 = arith.constant 0 : i32
    %c0_i32_0 = arith.constant 0 : i32
    %c0_i32_1 = arith.constant 0 : i32
    return %c0_i32, %c0_i32_0 : i32, i32
  }
  func.func @transform_15(%arg0: i32) -> (i32, i32) {
    %c0_i32 = arith.constant 0 : i32
    %c0_i32_0 = arith.constant 0 : i32
    return %c0_i32, %arg0 : i32, i32
  }
}

</mosaic_0001>

<bundles_post_ra>
// kernel: tpu_custom_call.1
= control target key start
LH: loop header
LB: loop body
LE: loop exit
PB: predicated region body
PF: predicated region fallthrough
CT: control target
= control target key end

     0   :  { %s6554_s0 = inlined_call_operand.vmem [shape: f32[64,256], index: 0, kind: input, shape index: {}]   ;;  %s6555_s1 = inlined_call_operand.vmem [shape: f32[8,256], index: 1, kind: input, shape index: {}]   ;;  %s6556_s2 = inlined_call_operand.vmem [shape: bf16[384,64], index: 2, kind: input, shape index: {}]   ;;  %s6557_s3 = inlined_call_operand.vmem [shape: f32[32,1], index: 3, kind: input, shape index: {}]   ;;  %s6558_s4 = inlined_call_operand.vmem [shape: f32[32,1], index: 4, kind: input, shape index: {}]   ;;  %s6559_s5 = inlined_call_operand.vmem [shape: f32[2,1], index: 5, kind: input, shape index: {}]   ;;  %s6560_s6 = inlined_call_operand.vmem [shape: f32[64,1], index: 6, kind: input, shape index: {}]   ;;  %s6561_s7 = inlined_call_operand.vmem [shape: bf16[480,64], index: 7, kind: input, shape index: {}]   ;;  %s6562_s8 = inlined_call_operand.vmem [shape: f32[480,1], index: 8, kind: input, shape index: {}]   ;;  %s6563_s9 = inlined_call_operand.vmem [shape: bf16[32,480], index: 9, kind: input, shape index: {}]   ;;  %s6564_s10 = inlined_call_operand.vmem [shape: f32[32,1], index: 10, kind: input, shape index: {}]   ;;  %s6565_s11 = inlined_call_operand.vmem [shape: bf16[64,32], index: 11, kind: input, shape index: {}]   ;;  %s6566_s12 = inlined_call_operand.vmem [shape: f32[64,1], index: 12, kind: input, shape index: {}]   ;;  %s6567_s13 = inlined_call_operand.vmem [shape: bf16[16,64], index: 13, kind: input, shape index: {}]   ;;  %s6568_s14 = inlined_call_operand.vmem [shape: f32[16,1], index: 14, kind: input, shape index: {}]   ;;  %s6569_s15 = inlined_call_operand.hbm [shape: f32[4,256], index: 15, kind: output, shape index: {}]  }
   0x1   :  { %6638 = sst [smem:[#allocation118_spill]] %s6554_s0 }
   0x2   :  { %20 = vsyncpa [#allocation4], 0 }
   0x3   :  { %22 = vsyncpa [#allocation4 + $0x1], 0  ;;  %s4482_s18 = smov 0   ;;  %s4484_s19 = smov 0  }
   0x4   :  { %s4486_s20 = smov 0   ;;  %s4488_s21 = smov 0  }
   0x5 LB: > { %6639 = sst [smem:[#allocation6_spill]] %s4378_s18  ;;  %s4503_s22 = sadd.s32 4294967295, %s4390_s21   ;;  %s4390_s21 = sphi %s4488_s21, %s6949_s21   ;;  %s4386_s20 = sphi %s4486_s20, %s6952_s20   ;;  %s4382_s19 = sphi %s4484_s19, %s6951_s19   ;;  %s4378_s18 = sphi %s4482_s18, %s6950_s18  }
   0x6   : > { %6640 = sst [smem:[#allocation7_spill]] %s4382_s19  ;;  %s3657_s23 = sadd.s32 4294967294, %s4390_s21  }
   0x7   : > { %6641 = sst [smem:[#allocation8_spill]] %s4386_s20  ;;  %s4507_s24 = sadd.s32 1, %s4390_s21  }
   0x8   : > { %6642 = sst [smem:[#allocation9_spill]] %s4390_s21  ;;  %s35_s25 = sadd.s32 1, %s4386_s20 }
   0x9   : > { %6643 = sst [smem:[#allocation10_spill]] %s4507_s24  ;;  %s32_s26 = ssub.s32 %s4390_s21, %s4507_s24 }
   0xa   : > { %p42_p0 = scmp.ne.s32.totalorder %s4386_s20, %s4382_s19  ;;  %p33_p1 = scmp.eq.s32.totalorder %s32_s26, 0 }
   0xb   : > { %p43_p2 = scmp.eq.s32.totalorder %s4390_s21, 0  ;;  %p371_p3 = scmp.eq.s32.totalorder %s4503_s22, 1 }
   0xc   : > { %p376_p4 = scmp.ne.s32.totalorder %s4382_s19, %s4378_s18  ;;  %p377_p7 = scmp.eq.s32.totalorder %s3657_s23, 1 }
   0xd   : > { %s4519_s27 = scalar_select %p33_p1, %s4386_s20, %s35_s25  }
   0xe   : > { %p44_p5 = por %p43_p2, %p42_p0  ;;  %p4521_p6 = por %p371_p3, %p42_p0 }
   0xf   : > { %6644 = sst [smem:[#allocation11_spill]] %s4519_s27  ;;  %p4525_p8 = por %p377_p7, %p376_p4 }
  0x10   : > { %p3659_p9 = scmp.ge.s32.totalorder %s4390_s21, 2 }
  0x11   : > { %s6646_s29 = scalar_select %p4525_p8, 1, 0 }
  0x12   : > { %432 = sbr.rel (%p3659_p9) target bundleno = 39 (0x27), region = 68 }
  0x13   : > { %6647 = sst [smem:[#allocation12_spill]] %s6646_s29 }
  0x19   : > { %435 = sbr.rel (!%p44_p5) target bundleno = 39 (0x27), region = 72  ;;  %s437_s30 = sand.u32 (%p44_p5), 1, %s4386_s20  }
  0x1a   : > { %s3661_s16 = sshll.u32 (%p44_p5), %s4390_s21, 3  ;;  %s3660_s17 = sshll.u32 (%p44_p5), %s437_s30, 6 }
  0x1b   : > { %s6648_s0 = sld [smem:[#allocation118_spill]] (%p44_p5)  ;;  %s439_s23 = scalar_lea.vmem (%p44_p5), [#allocation2], %s3660_s17 }
  0x21   : > { %s441_s27 = scalar_lea.vmem %s6648_s0, %s3661_s16 }
  0x22   : > { %v483_v0 = vld [vmem:[%s441_s27] sm:$0xff]  ;;  %v485_v1 = vld [vmem:[%s441_s27 + $0x10] sm:$0xff] }
  0x23   : > { %v487_v2 = vld [vmem:[%s441_s27 + $0x20] sm:$0xff]  ;;  %484 = vst [vmem:[%s439_s23] sm:$0xff] %v483_v0  ;;  %486 = vst [vmem:[%s439_s23 + $0x8] sm:$0xff] %v485_v1  ;;  %v489_v3 = vld [vmem:[%s441_s27 + $0x30] sm:$0xff] }
  0x24   : > { %488 = vst [vmem:[%s439_s23 + $0x10] sm:$0xff] %v487_v2  ;;  %v491_v4 = vld [vmem:[%s441_s27 + $0x40] sm:$0xff]  ;;  %v493_v5 = vld [vmem:[%s441_s27 + $0x50] sm:$0xff]  ;;  %490 = vst [vmem:[%s439_s23 + $0x18] sm:$0xff] %v489_v3 }
  0x25   : > { %492 = vst [vmem:[%s439_s23 + $0x20] sm:$0xff] %v491_v4  ;;  %494 = vst [vmem:[%s439_s23 + $0x28] sm:$0xff] %v493_v5  ;;  %v495_v6 = vld [vmem:[%s441_s27 + $0x60] sm:$0xff]  ;;  %v497_v7 = vld [vmem:[%s441_s27 + $0x70] sm:$0xff] }
  0x26   : > { %496 = vst [vmem:[%s439_s23 + $0x30] sm:$0xff] %v495_v6  ;;  %498 = vst [vmem:[%s439_s23 + $0x38] sm:$0xff] %v497_v7 }
  0x27 PF: > { %p3662_p10 = scmp.ge.s32.totalorder %s4390_s21, 1  ;;  %p510_p11 = scmp.lt.s32.totalorder %s4390_s21, 3 }
  0x29   : > { %p511_p12 = pnand %p3662_p10, %p510_p11 }
  0x2b   : > { %514 = sbr.rel (%p511_p12) target bundleno = 1260 (0x4ec), region = 114 }
  0x32   : > { %v1652_v8 = vld [vmem:[%s6562_s8 + $0x110] sm:$0xff]  ;;  %v1650_v9 = vld [vmem:[%s6562_s8 + $0x100] sm:$0xff]  ;;  %s4546_s27 = sand.u32 1, %s4382_s19   ;;  %v6577_v10 = vmov 0   ;;  %v1653_v11 = vld [vmem:[%s6562_s8 + $0x118] sm:$0xff]  ;;  %vm754_vm0 = vcmask 523264  }
  0x33   : > { %4108 = vset.pattern.permute.xlu1 %v6577_v10  ;;  %4107 = vset.pattern.permute.xlu0 %v6577_v10  ;;  %s3663_s26 = sshll.u32 %s4546_s27, 6  ;;  %v1651_v12 = vld [vmem:[%s6562_s8 + $0x108] sm:$0xff]  ;;  %v1654_v19 = vld [vmem:[%s6562_s8 + $0x120] sm:$0xff]  ;;  %v1657_v25 = vld [vmem:[%s6562_s8 + $0x138] sm:$0xff]  ;;  %vm3131_vm1 = vcmask 785408   ;;  %vm1264_vm2 = vcmask 1040384  }
  0x34   : > { %1850 = vperm.xlu1 %4108, %v1652_v8   ;;  %1840 = vperm.xlu0 %4107, %v1650_v9   ;;  %s4557_s17 = scalar_lea.vmem [#allocation2], %s3663_s26  ;;  %v1655_v18 = vld [vmem:[%s6562_s8 + $0x128] sm:$0xff]  ;;  %v4109_v23 = vld [vmem:[%s6556_s2] sm:$0xff]   ;;  %v1656_v29 = vld [vmem:[%s6562_s8 + $0x130] sm:$0xff]  ;;  %vm3314_vm3 = vcmask 261120   ;;  %vm4394_vm4 = vmmov 0  }
  0x35   : > { %v573_v13 = vld [vmem:[%s4557_s17] sm:$0xff]  ;;  %v574_v14 = vld [vmem:[%s4557_s17 + $0x8] sm:$0xff]  ;;  %v575_v15 = vld [vmem:[%s4557_s17 + $0x10] sm:$0xff]  ;;  %3915 = vmatprep.mubr.msk.bf16.mxu0 %vm754_vm0, %v4109_v23  ;;  %p568_p13 = scmp.lt.s32.totalorder %s4503_s22, 1  ;;  %s3664_s21 = sshll.u32 %s4546_s27, 2 }
  0x36   : > { %v582_v16 = vpack.c.bf16 %v574_v14, %v573_v13  ;;  %v576_v17 = vld [vmem:[%s4557_s17 + $0x18] sm:$0xff]  ;;  %v577_v21 = vld [vmem:[%s4557_s17 + $0x20] sm:$0xff]  ;;  %v578_v22 = vld [vmem:[%s4557_s17 + $0x28] sm:$0xff]  ;;  %s3803_s24 = sshll.u32 %s4503_s22, 6  ;;  %s567_s18 = scalar_lea.vmem [#allocation3], %s3664_s21 }
  0x37   : > { %v583_v20 = vpack.c.bf16 %v576_v17, %v575_v15  ;;  %v4110_v24 = vld [vmem:[%s6561_s7] sm:$0xff]   ;;  %v584_v26 = vpack.c.bf16 %v578_v22, %v577_v21  ;;  %v579_v27 = vld [vmem:[%s4557_s17 + $0x30] sm:$0xff]  ;;  %v580_v28 = vld [vmem:[%s4557_s17 + $0x38] sm:$0xff]  ;;  %s3580_s29 = sshll.u32 %s567_s18, 4  ;;  %s6510_s25 = scalar_lea.hbm %s6569_s15, %s3803_s24  ;;  %s6512_s29 = int_to_ptr.vmem [resolvable:$true] %s3580_s29 }
  0x38   : > { %1855 = vperm.xlu1 %4108, %v1653_v11   ;;  %1845 = vperm.xlu0 %4107, %v1651_v12   ;;  %v585_v30 = vpack.c.bf16 %v580_v28, %v579_v27  ;;  %v1659_v31 = vld [vmem:[%s6562_s8 + $0x148] sm:$0xff]  ;;  %v1658_v32 = vld [vmem:[%s6562_s8 + $0x140] sm:$0xff]  ;;  %v4113_v37 = vld [vmem:[%s6556_s2 + $0x10] sm:$0xff]   ;;  %s3567_s0 = scalar_lea.sflag [#allocation4], %s4546_s27 }
  0x39   : > { %3907 = vmatprep.subr.bf16.mxu0 %v582_v16  ;;  %3963 = vmatprep.subr.bf16.mxu1 %v582_v16  ;;  %v1635_v33 = vld [vmem:[%s6562_s8 + $0x88] sm:$0xff]  ;;  %v1634_v34 = vld [vmem:[%s6562_s8 + $0x80] sm:$0xff]  ;;  %v4114_v38 = vld [vmem:[%s6561_s7 + $0x10] sm:$0xff]  }
  0x3a   : > { %3908 = vmatpush3.bf16.msra.mxu0 %v582_v16  ;;  %3964 = vmatpush3.bf16.msra.mxu1 %v582_v16  ;;  %v4111_v35 = vld [vmem:[%s6556_s2 + $0x8] sm:$0xff]   ;;  %v1618_v40 = vld [vmem:[%s6562_s8] sm:$0xff]  ;;  %v1661_v41 = vld [vmem:[%s6562_s8 + $0x158] sm:$0xff] }
  0x3b   : > { %3909 = vmatprep.subr.bf16.mxu0 %v583_v20  ;;  %3965 = vmatprep.subr.bf16.mxu1 %v583_v20  ;;  %v4112_v36 = vld [vmem:[%s6561_s7 + $0x8] sm:$0xff]   ;;  %v1660_v42 = vld [vmem:[%s6562_s8 + $0x150] sm:$0xff]  ;;  %v4115_v43 = vld [vmem:[%s6556_s2 + $0x18] sm:$0xff]  }
  0x3c   : > { %1865 = vperm.xlu1 %4108, %v1655_v18   ;;  %1860 = vperm.xlu0 %4107, %v1654_v19   ;;  %v1619_v39 = vld [vmem:[%s6562_s8 + $0x8] sm:$0xff]  ;;  %v4116_v44 = vld [vmem:[%s6561_s7 + $0x18] sm:$0xff]   ;;  %v4117_v45 = vld [vmem:[%s6556_s2 + $0x20] sm:$0xff]  }
  0x3d   : > { %3971 = vmatprep.mubr.msk.bf16.mxu1 %vm754_vm0, %v4110_v24  ;;  %v4118_v46 = vld [vmem:[%s6561_s7 + $0x20] sm:$0xff]   ;;  %v1637_v47 = vld [vmem:[%s6562_s8 + $0x98] sm:$0xff]  ;;  %v1636_v48 = vld [vmem:[%s6562_s8 + $0x90] sm:$0xff] }
  0x3e   : > { %3910 = vmatpush3.bf16.msra.mxu0 %v583_v20  ;;  %3966 = vmatpush3.bf16.msra.mxu1 %v583_v20  ;;  %v1621_v49 = vld [vmem:[%s6562_s8 + $0x18] sm:$0xff]  ;;  %v1620_v50 = vld [vmem:[%s6562_s8 + $0x10] sm:$0xff]  ;;  %v4119_v51 = vld [vmem:[%s6556_s2 + $0x28] sm:$0xff]  }
  0x3f   : > { %3911 = vmatprep.subr.bf16.mxu0 %v584_v26  ;;  %3967 = vmatprep.subr.bf16.mxu1 %v584_v26  ;;  %v4120_v52 = vld [vmem:[%s6561_s7 + $0x28] sm:$0xff]   ;;  %v4121_v53 = vld [vmem:[%s6556_s2 + $0x30] sm:$0xff]   ;;  %v1662_v56 = vld [vmem:[%s6562_s8 + $0x160] sm:$0xff] }
  0x40   : > { %1875 = vperm.xlu1 %4108, %v1657_v25   ;;  %1870 = vperm.xlu0 %4107, %v1656_v29   ;;  %v4122_v54 = vld [vmem:[%s6561_s7 + $0x30] sm:$0xff]   ;;  %v1663_v55 = vld [vmem:[%s6562_s8 + $0x168] sm:$0xff]  ;;  %v1638_v58 = vld [vmem:[%s6562_s8 + $0xa0] sm:$0xff] }
  0x41   : > { %v1639_v57 = vld [vmem:[%s6562_s8 + $0xa8] sm:$0xff]  ;;  %v4123_v59 = vld [vmem:[%s6556_s2 + $0x38] sm:$0xff]   ;;  %v4125_v61 = vld [vmem:[%s6556_s2 + $0x40] sm:$0xff]  }
  0x42   : > { %3912 = vmatpush3.bf16.msra.mxu0 %v584_v26  ;;  %3968 = vmatpush3.bf16.msra.mxu1 %v584_v26  ;;  %v4124_v60 = vld [vmem:[%s6561_s7 + $0x38] sm:$0xff]   ;;  %v4126_v62 = vld [vmem:[%s6561_s7 + $0x40] sm:$0xff]   ;;  %v1623_v63 = vld [vmem:[%s6562_s8 + $0x28] sm:$0xff] }
  0x43   : > { %3913 = vmatprep.subr.bf16.mxu0 %v585_v30  ;;  %3969 = vmatprep.subr.bf16.mxu1 %v585_v30  ;;  %v1622_v0 = vld [vmem:[%s6562_s8 + $0x20] sm:$0xff]  ;;  %v1665_v1 = vld [vmem:[%s6562_s8 + $0x178] sm:$0xff]  ;;  %v1664_v2 = vld [vmem:[%s6562_s8 + $0x170] sm:$0xff] }
  0x44   : > { %1885 = vperm.xlu1 %4108, %v1659_v31   ;;  %1880 = vperm.xlu0 %4107, %v1658_v32   ;;  %v4127_v3 = vld [vmem:[%s6556_s2 + $0x48] sm:$0xff]   ;;  %v4129_v5 = vld [vmem:[%s6556_s2 + $0x50] sm:$0xff]   ;;  %v1641_v7 = vld [vmem:[%s6562_s8 + $0xb8] sm:$0xff] }
  0x45   : > { %v4128_v4 = vld [vmem:[%s6561_s7 + $0x48] sm:$0xff]   ;;  %v4130_v6 = vld [vmem:[%s6561_s7 + $0x50] sm:$0xff]   ;;  %v1625_v9 = vld [vmem:[%s6562_s8 + $0x38] sm:$0xff] }
  0x46   : > { %3914 = vmatpush3.bf16.msra.mxu0 %v585_v30  ;;  %3970 = vmatpush3.bf16.msra.mxu1 %v585_v30  ;;  %v1640_v8 = vld [vmem:[%s6562_s8 + $0xb0] sm:$0xff]  ;;  %v4131_v12 = vld [vmem:[%s6556_s2 + $0x58] sm:$0xff]   ;;  %v4133_v14 = vld [vmem:[%s6556_s2 + $0x60] sm:$0xff]  }
  0x47   : > { %3187 = vmatprep.subr.bf16.mxu1 %v6577_v10  ;;  %v1624_v11 = vld [vmem:[%s6562_s8 + $0x30] sm:$0xff]  ;;  %v4132_v13 = vld [vmem:[%s6561_s7 + $0x58] sm:$0xff]   ;;  %v4134_v15 = vld [vmem:[%s6561_s7 + $0x60] sm:$0xff]  }
  0x48   : > { %1765 = vperm.xlu1 %4108, %v1635_v33   ;;  %1760 = vperm.xlu0 %4107, %v1634_v34   ;;  %v1667_v16 = vld [vmem:[%s6562_s8 + $0x188] sm:$0xff]  ;;  %v1666_v17 = vld [vmem:[%s6562_s8 + $0x180] sm:$0xff]  ;;  %v4137_v22 = vld [vmem:[%s6556_s2 + $0x70] sm:$0xff]  }
  0x49   : > { %3916 = vmatmul.mubr.msk.bf16.vlgmr.msra.gmra.mrb[0].mxu0 %vm754_vm0, %v4111_v35  ;;  %3972 = vmatmul.mubr.msk.bf16.vlgmr.msra.gmra.mrb[0].mxu1 %vm754_vm0, %v4112_v36  ;;  %v1643_v18 = vld [vmem:[%s6562_s8 + $0xc8] sm:$0xff]  ;;  %v1642_v19 = vld [vmem:[%s6562_s8 + $0xc0] sm:$0xff]  ;;  %v4138_v23 = vld [vmem:[%s6561_s7 + $0x70] sm:$0xff]  }
  0x4a   : > { %3919 = vmatprep.mubr.msk.bf16.mxu0 %vm754_vm0, %v4113_v37  ;;  %3975 = vmatprep.mubr.msk.bf16.mxu1 %vm754_vm0, %v4114_v38  ;;  %v4135_v20 = vld [vmem:[%s6556_s2 + $0x68] sm:$0xff]   ;;  %v1626_v25 = vld [vmem:[%s6562_s8 + $0x40] sm:$0xff]  ;;  %v1669_v26 = vld [vmem:[%s6562_s8 + $0x198] sm:$0xff] }
  0x4b   : > { %v4136_v21 = vld [vmem:[%s6561_s7 + $0x68] sm:$0xff]   ;;  %v1668_v27 = vld [vmem:[%s6562_s8 + $0x190] sm:$0xff]  ;;  %v4139_v28 = vld [vmem:[%s6556_s2 + $0x78] sm:$0xff]  }
  0x4c   : > { %1685 = vperm.xlu1 %4108, %v1619_v39   ;;  %1680 = vperm.xlu0 %4107, %v1618_v40   ;;  %v1627_v24 = vld [vmem:[%s6562_s8 + $0x48] sm:$0xff]  ;;  %v4140_v29 = vld [vmem:[%s6561_s7 + $0x78] sm:$0xff]   ;;  %v4141_v30 = vld [vmem:[%s6556_s2 + $0x80] sm:$0xff]  }
  0x4d   : > { %v4142_v31 = vld [vmem:[%s6561_s7 + $0x80] sm:$0xff]   ;;  %v1645_v32 = vld [vmem:[%s6562_s8 + $0xd8] sm:$0xff]  ;;  %v1644_v33 = vld [vmem:[%s6562_s8 + $0xd0] sm:$0xff] }
  0x4e   : > { %v1629_v34 = vld [vmem:[%s6562_s8 + $0x58] sm:$0xff]  ;;  %v1628_v35 = vld [vmem:[%s6562_s8 + $0x50] sm:$0xff]  ;;  %v4143_v36 = vld [vmem:[%s6556_s2 + $0x88] sm:$0xff]  }
  0x4f   : > { %v4144_v37 = vld [vmem:[%s6561_s7 + $0x88] sm:$0xff]   ;;  %v4145_v38 = vld [vmem:[%s6556_s2 + $0x90] sm:$0xff]  }
  0x50   : > { %1895 = vperm.xlu1 %4108, %v1661_v41   ;;  %1890 = vperm.xlu0 %4107, %v1660_v42   ;;  %v4146_v39 = vld [vmem:[%s6561_s7 + $0x90] sm:$0xff]   ;;  %v1671_v40 = vld [vmem:[%s6562_s8 + $0x1a8] sm:$0xff]  ;;  %v1670_v41 = vld [vmem:[%s6562_s8 + $0x1a0] sm:$0xff] }
  0x51   : > { %3920 = vmatmul.mubr.msk.bf16.gmra.mrb[4].mxu0 %vm754_vm0, %v4115_v43  ;;  %3976 = vmatmul.mubr.msk.bf16.gmra.mrb[4].mxu1 %vm754_vm0, %v4116_v44  ;;  %v1647_v42 = vld [vmem:[%s6562_s8 + $0xe8] sm:$0xff]  ;;  %v1646_v43 = vld [vmem:[%s6562_s8 + $0xe0] sm:$0xff]  ;;  %v4147_v44 = vld [vmem:[%s6556_s2 + $0x98] sm:$0xff]  }
  0x52   : > { %3923 = vmatprep.mubr.msk.bf16.mxu0 %vm754_vm0, %v4117_v45  ;;  %3979 = vmatprep.mubr.msk.bf16.mxu1 %vm754_vm0, %v4118_v46  ;;  %v4148_v45 = vld [vmem:[%s6561_s7 + $0x98] sm:$0xff]   ;;  %v4149_v46 = vld [vmem:[%s6556_s2 + $0xa0] sm:$0xff]  }
  0x54   : > { %1775 = vperm.xlu1 %4108, %v1637_v47   ;;  %1770 = vperm.xlu0 %4107, %v1636_v48   ;;  %v4150_v47 = vld [vmem:[%s6561_s7 + $0xa0] sm:$0xff]   ;;  %v1631_v48 = vld [vmem:[%s6562_s8 + $0x68] sm:$0xff] }
  0x58   : > { %1695 = vperm.xlu1 %4108, %v1621_v49   ;;  %1690 = vperm.xlu0 %4107, %v1620_v50   ;;  %v1630_v49 = vld [vmem:[%s6562_s8 + $0x60] sm:$0xff]  ;;  %v1673_v50 = vld [vmem:[%s6562_s8 + $0x1b8] sm:$0xff] }
  0x59   : > { %3924 = vmatmul.mubr.msk.bf16.gmra.mrb[8].mxu0 %vm754_vm0, %v4119_v51  ;;  %3980 = vmatmul.mubr.msk.bf16.gmra.mrb[8].mxu1 %vm754_vm0, %v4120_v52  ;;  %v1672_v51 = vld [vmem:[%s6562_s8 + $0x1b0] sm:$0xff]  ;;  %v4151_v52 = vld [vmem:[%s6556_s2 + $0xa8] sm:$0xff]  }
  0x5a   : > { %3927 = vmatprep.mubr.msk.bf16.mxu0 %vm754_vm0, %v4121_v53  ;;  %3983 = vmatprep.mubr.msk.bf16.mxu1 %vm754_vm0, %v4122_v54  ;;  %v4152_v53 = vld [vmem:[%s6561_s7 + $0xa8] sm:$0xff]   ;;  %v4153_v54 = vld [vmem:[%s6556_s2 + $0xb0] sm:$0xff]  }
  0x5c   : > { %1905 = vperm.xlu1 %4108, %v1663_v55   ;;  %1900 = vperm.xlu0 %4107, %v1662_v56   ;;  %v4154_v55 = vld [vmem:[%s6561_s7 + $0xb0] sm:$0xff]   ;;  %v1649_v56 = vld [vmem:[%s6562_s8 + $0xf8] sm:$0xff] }
  0x60   : > { %1785 = vperm.xlu1 %4108, %v1639_v57   ;;  %1780 = vperm.xlu0 %4107, %v1638_v58   ;;  %v1648_v57 = vld [vmem:[%s6562_s8 + $0xf0] sm:$0xff]  ;;  %v1633_v58 = vld [vmem:[%s6562_s8 + $0x78] sm:$0xff] }
  0x61   : > { %3928 = vmatmul.mubr.msk.bf16.gmra.mrb[12].mxu0 %vm754_vm0, %v4123_v59  ;;  %3984 = vmatmul.mubr.msk.bf16.gmra.mrb[12].mxu1 %vm754_vm0, %v4124_v60  ;;  %v1632_v59 = vld [vmem:[%s6562_s8 + $0x70] sm:$0xff]  ;;  %v4155_v60 = vld [vmem:[%s6556_s2 + $0xb8] sm:$0xff]  }
  0x62   : > { %3931 = vmatprep.mubr.msk.bf16.mxu0 %vm754_vm0, %v4125_v61  ;;  %3987 = vmatprep.mubr.msk.bf16.mxu1 %vm754_vm0, %v4126_v62  ;;  %v4156_v61 = vld [vmem:[%s6561_s7 + $0xb8] sm:$0xff]   ;;  %v4157_v62 = vld [vmem:[%s6561_s7 + $0xc0] sm:$0xff]  }
  0x64   : > { %1705 = vperm.xlu1 %4108, %v1623_v63   ;;  %1700 = vperm.xlu0 %4107, %v1622_v0   ;;  %v1675_v63 = vld [vmem:[%s6562_s8 + $0x1c8] sm:$0xff]  ;;  %v1674_v0 = vld [vmem:[%s6562_s8 + $0x1c0] sm:$0xff] }
  0x68   : > { %1915 = vperm.xlu1 %4108, %v1665_v1   ;;  %1910 = vperm.xlu0 %4107, %v1664_v2   ;;  %v1677_v1 = vld [vmem:[%s6562_s8 + $0x1d8] sm:$0xff]  ;;  %v1676_v2 = vld [vmem:[%s6562_s8 + $0x1d0] sm:$0xff] }
  0x69   : > { %3932 = vmatmul.mubr.msk.bf16.gmra.mrb[16].mxu0 %vm754_vm0, %v4127_v3  ;;  %3988 = vmatmul.mubr.msk.bf16.gmra.mrb[16].mxu1 %vm754_vm0, %v4128_v4  ;;  %v4158_v3 = vld [vmem:[%s6561_s7 + $0xc8] sm:$0xff]   ;;  %v4159_v4 = vld [vmem:[%s6561_s7 + $0xd0] sm:$0xff]  }
  0x6a   : > { %3935 = vmatprep.mubr.msk.bf16.mxu0 %vm754_vm0, %v4129_v5  ;;  %3991 = vmatprep.mubr.msk.bf16.mxu1 %vm754_vm0, %v4130_v6  ;;  %v3070_v5 = vld [vmem:[%s6564_s10 + $0x8] sm:$0xff]  ;;  %v3069_v6 = vld [vmem:[%s6564_s10] sm:$0xff] }
  0x6c   : > { %1795 = vperm.xlu1 %4108, %v1641_v7   ;;  %1790 = vperm.xlu0 %4107, %v1640_v8   ;;  %v3072_v7 = vld [vmem:[%s6564_s10 + $0x18] sm:$0xff]  ;;  %v3071_v8 = vld [vmem:[%s6564_s10 + $0x10] sm:$0xff] }
  0x70   : > { %1715 = vperm.xlu1 %4108, %v1625_v9   ;;  %1710 = vperm.xlu0 %4107, %v1624_v11   ;;  %v4160_v9 = vld [vmem:[%s6561_s7 + $0xd8] sm:$0xff]   ;;  %v4161_v11 = vld [vmem:[%s6561_s7 + $0xe0] sm:$0xff]  }
  0x71   : > { %3936 = vmatmul.mubr.msk.bf16.gmra.mrb[20].mxu0 %vm754_vm0, %v4131_v12  ;;  %3992 = vmatmul.mubr.msk.bf16.gmra.mrb[20].mxu1 %vm754_vm0, %v4132_v13  ;;  %v3247_v12 = vld [vmem:[%s6566_s12 + $0x8] sm:$0xff]  ;;  %v3246_v13 = vld [vmem:[%s6566_s12] sm:$0xff] }
  0x72   : > { %3939 = vmatprep.mubr.msk.bf16.mxu0 %vm754_vm0, %v4133_v14  ;;  %3995 = vmatprep.mubr.msk.bf16.mxu1 %vm754_vm0, %v4134_v15 }
  0x74   : > { %1925 = vperm.xlu1 %4108, %v1667_v16   ;;  %1920 = vperm.xlu0 %4107, %v1666_v17   ;;  %v3249_v16 = vld [vmem:[%s6566_s12 + $0x18] sm:$0xff]  ;;  %v3248_v17 = vld [vmem:[%s6566_s12 + $0x10] sm:$0xff] }
  0x78   : > { %1805 = vperm.xlu1 %4108, %v1643_v18   ;;  %1800 = vperm.xlu0 %4107, %v1642_v19   ;;  %v4162_v18 = vld [vmem:[%s6561_s7 + $0xe8] sm:$0xff]  }
  0x79   : > { %3940 = vmatmul.mubr.msk.bf16.gmra.mrb[24].mxu0 %vm754_vm0, %v4135_v20  ;;  %3996 = vmatmul.mubr.msk.bf16.gmra.mrb[24].mxu1 %vm754_vm0, %v4136_v21  ;;  %v3251_v21 = vld [vmem:[%s6566_s12 + $0x28] sm:$0xff] }
  0x7a   : > { %3943 = vmatprep.mubr.msk.bf16.mxu0 %vm754_vm0, %v4137_v22  ;;  %3999 = vmatprep.mubr.msk.bf16.mxu1 %vm754_vm0, %v4138_v23  ;;  %v3250_v22 = vld [vmem:[%s6566_s12 + $0x20] sm:$0xff] }
  0x7c   : > { %1725 = vperm.xlu1 %4108, %v1627_v24   ;;  %1720 = vperm.xlu0 %4107, %v1626_v25   ;;  %v3253_v25 = vld [vmem:[%s6566_s12 + $0x38] sm:$0xff] }
  0x80   : > { %1935 = vperm.xlu1 %4108, %v1669_v26   ;;  %1930 = vperm.xlu0 %4107, %v1668_v27   ;;  %v3252_v26 = vld [vmem:[%s6566_s12 + $0x30] sm:$0xff] }
  0x81   : > { %3944 = vmatmul.mubr.msk.bf16.gmra.mrb[28].mxu0 %vm754_vm0, %v4139_v28  ;;  %4000 = vmatmul.mubr.msk.bf16.gmra.mrb[28].mxu1 %vm754_vm0, %v4140_v29  ;;  %v1276_v29 = vld [vmem:[%s6560_s6 + $0x8] sm:$0xff] }
  0x82   : > { %3947 = vmatprep.mubr.msk.bf16.mxu0 %vm754_vm0, %v4141_v30  ;;  %4003 = vmatprep.mubr.msk.bf16.mxu1 %vm754_vm0, %v4142_v31  ;;  %v1275_v30 = vld [vmem:[%s6560_s6] sm:$0xff] }
  0x84   : > { %1815 = vperm.xlu1 %4108, %v1645_v32   ;;  %1810 = vperm.xlu0 %4107, %v1644_v33   ;;  %v1278_v33 = vld [vmem:[%s6560_s6 + $0x18] sm:$0xff] }
  0x88   : > { %1735 = vperm.xlu1 %4108, %v1629_v34   ;;  %1730 = vperm.xlu0 %4107, %v1628_v35   ;;  %v1277_v34 = vld [vmem:[%s6560_s6 + $0x10] sm:$0xff] }
  0x89   : > { %3948 = vmatmul.mubr.msk.bf16.gmra.mrb[32].mxu0 %vm754_vm0, %v4143_v36  ;;  %4004 = vmatmul.mubr.msk.bf16.gmra.mrb[32].mxu1 %vm754_vm0, %v4144_v37  ;;  %v1280_v37 = vld [vmem:[%s6560_s6 + $0x28] sm:$0xff] }
  0x8a   : > { %3951 = vmatprep.mubr.msk.bf16.mxu0 %vm754_vm0, %v4145_v38  ;;  %4007 = vmatprep.mubr.msk.bf16.mxu1 %vm754_vm0, %v4146_v39  ;;  %v1279_v38 = vld [vmem:[%s6560_s6 + $0x20] sm:$0xff] }
  0x8c   : > { %1945 = vperm.xlu1 %4108, %v1671_v40   ;;  %1940 = vperm.xlu0 %4107, %v1670_v41   ;;  %v1282_v41 = vld [vmem:[%s6560_s6 + $0x38] sm:$0xff] }
  0x90   : > { %1825 = vperm.xlu1 %4108, %v1647_v42   ;;  %1820 = vperm.xlu0 %4107, %v1646_v43   ;;  %v1281_v42 = vld [vmem:[%s6560_s6 + $0x30] sm:$0xff] }
  0x91   : > { %3952 = vmatmul.mubr.msk.bf16.gmra.mrb[36].mxu0 %vm754_vm0, %v4147_v44  ;;  %4008 = vmatmul.mubr.msk.bf16.gmra.mrb[36].mxu1 %vm754_vm0, %v4148_v45  ;;  %v1344_v44 = vld [vmem:[%s6559_s5] sm:$0x3] }
  0x92   : > { %3955 = vmatprep.mubr.msk.bf16.mxu0 %vm754_vm0, %v4149_v46  ;;  %4011 = vmatprep.mubr.msk.bf16.mxu1 %vm754_vm0, %v4150_v47  ;;  %v1108_v45 = vld [vmem:[%s6557_s3] sm:$0xff] }
  0x94   : > { %1745 = vperm.xlu1 %4108, %v1631_v48   ;;  %1740 = vperm.xlu0 %4107, %v1630_v49   ;;  %v1109_v48 = vld [vmem:[%s6557_s3 + $0x8] sm:$0xff]  ;;  %v1132_v49 = vld [vmem:[%s6558_s4] sm:$0xff] }
  0x98   : > { %1955 = vperm.xlu1 %4108, %v1673_v50   ;;  %1950 = vperm.xlu0 %4107, %v1672_v51  }
  0x99   : > { %3956 = vmatmul.mubr.msk.bf16.gmra.mrb[40].mxu0 %vm754_vm0, %v4151_v52  ;;  %4012 = vmatmul.mubr.msk.bf16.gmra.mrb[40].mxu1 %vm754_vm0, %v4152_v53  ;;  %v1133_v52 = vld [vmem:[%s6558_s4 + $0x8] sm:$0xff]  ;;  %v1110_v53 = vld [vmem:[%s6557_s3 + $0x10] sm:$0xff] }
  0x9a   : > { %3959 = vmatprep.mubr.msk.bf16.mxu0 %vm754_vm0, %v4153_v54  ;;  %4015 = vmatprep.mubr.msk.bf16.mxu1 %vm754_vm0, %v4154_v55  ;;  %v1134_v55 = vld [vmem:[%s6558_s4 + $0x10] sm:$0xff] }
  0x9c   : > { %1835 = vperm.xlu1 %4108, %v1649_v56   ;;  %1830 = vperm.xlu0 %4107, %v1648_v57   ;;  %v1111_v56 = vld [vmem:[%s6557_s3 + $0x18] sm:$0xff] }
  0xa0   : > { %1755 = vperm.xlu1 %4108, %v1633_v58   ;;  %1750 = vperm.xlu0 %4107, %v1632_v59   ;;  %v1135_v59 = vld [vmem:[%s6558_s4 + $0x18] sm:$0xff] }
  0xa1   : > { %3960 = vmatmul.mubr.msk.bf16.gmra.mrb[44].mxu0 %vm754_vm0, %v4155_v60  ;;  %4016 = vmatmul.mubr.msk.bf16.gmra.mrb[44].mxu1 %vm754_vm0, %v4156_v61  ;;  %v3470_v60 = vld [vmem:[%s6568_s14] sm:$0xff] }
  0xa2   : > { %4019 = vmatprep.mubr.msk.bf16.mxu1 %vm754_vm0, %v4157_v62 }
  0xa4   : > { %1965 = vperm.xlu1 %4108, %v1675_v63   ;;  %1960 = vperm.xlu0 %4107, %v1674_v0  }
  0xa8   : > { %1975 = vperm.xlu1 %4108, %v1677_v1   ;;  %1970 = vperm.xlu0 %4107, %v1676_v2  }
  0xa9   : > { %4020 = vmatmul.mubr.msk.bf16.gmra.mrb[48].mxu1 %vm754_vm0, %v4158_v3 }
  0xaa   : > { %4023 = vmatprep.mubr.msk.bf16.mxu1 %vm754_vm0, %v4159_v4 }
  0xac   : > { %3080 = vperm.xlu1 %4108, %v3070_v5   ;;  %3075 = vperm.xlu0 %4107, %v3069_v6  }
  0xb0   : > { %3090 = vperm.xlu1 %4108, %v3072_v7   ;;  %3085 = vperm.xlu0 %4107, %v3071_v8  }
  0xb1   : > { %4024 = vmatmul.mubr.msk.bf16.gmra.mrb[52].mxu1 %vm754_vm0, %v4160_v9 }
  0xb2   : > { %4027 = vmatprep.mubr.msk.bf16.mxu1 %vm754_vm0, %v4161_v11 }
  0xb3   : > { %v4966_v14 = vpop.permute.xlu1 %1850  ;;  %v4968_v15 = vpop.permute.xlu0 %1840 }
  0xb4   : > { %3261 = vperm.xlu1 %4108, %v3247_v12   ;;  %3256 = vperm.xlu0 %4107, %v3246_v13  }
  0xb7   : > { %v4979_v19 = vpop.permute.xlu1 %1855  ;;  %v4981_v20 = vpop.permute.xlu0 %1845 }
  0xb8   : > { %6649 = vst [vmem:[#allocation13_spill] sm:$0xff] %v4979_v19  ;;  %6650 = vst [vmem:[#allocation14_spill] sm:$0xff] %v4981_v20  ;;  %3271 = vperm.xlu1 %4108, %v3249_v16   ;;  %3266 = vperm.xlu0 %4107, %v3248_v17  }
  0xb9   : > { %4028 = vmatmul.mubr.msk.bf16.gmra.mrb[56].mxu1 %vm754_vm0, %v4162_v18 }
  0xbb   : > { %v4990_v23 = vpop.permute.xlu1 %1865  ;;  %v4992_v24 = vpop.permute.xlu0 %1860 }
  0xbc   : > { %6651 = vst [vmem:[#allocation15_spill] sm:$0xff] %v4990_v23  ;;  %6652 = vst [vmem:[#allocation16_spill] sm:$0xff] %v4992_v24  ;;  %3281 = vperm.xlu1 %4108, %v3251_v21   ;;  %3276 = vperm.xlu0 %4107, %v3250_v22  }
  0xbf   : > { %v5000_v27 = vpop.permute.xlu1 %1875  ;;  %v5002_v28 = vpop.permute.xlu0 %1870 }
  0xc0   : > { %6653 = vst [vmem:[#allocation17_spill] sm:$0xff] %v5000_v27  ;;  %6654 = vst [vmem:[#allocation18_spill] sm:$0xff] %v5002_v28  ;;  %3291 = vperm.xlu1 %4108, %v3253_v25   ;;  %3286 = vperm.xlu0 %4107, %v3252_v26  }
  0xc3   : > { %v5010_v31 = vpop.permute.xlu1 %1885  ;;  %v5012_v32 = vpop.permute.xlu0 %1880 }
  0xc4   : > { %6655 = vst [vmem:[#allocation19_spill] sm:$0xff] %v5010_v31  ;;  %6656 = vst [vmem:[#allocation20_spill] sm:$0xff] %v5012_v32  ;;  %1290 = vperm.xlu1 %4108, %v1276_v29   ;;  %1285 = vperm.xlu0 %4107, %v1275_v30  }
  0xc7   : > { %v5020_v35 = vpop.permute.xlu1 %1765  ;;  %v5022_v36 = vpop.permute.xlu0 %1760 }
  0xc8   : > { %1300 = vperm.xlu1 %4108, %v1278_v33   ;;  %1295 = vperm.xlu0 %4107, %v1277_v34  }
  0xcb   : > { %v5030_v39 = vpop.permute.xlu0 %1680  ;;  %v5032_v40 = vpop.permute.xlu1 %1685 }
  0xcc   : > { %1310 = vperm.xlu1 %4108, %v1280_v37   ;;  %1305 = vperm.xlu0 %4107, %v1279_v38  }
  0xcf   : > { %v5040_v43 = vpop.permute.xlu0 %1890  ;;  %v5048_v46 = vpop.permute.xlu1 %1895 }
  0xd0   : > { %6657 = vst [vmem:[#allocation21_spill] sm:$0xff] %v5040_v43  ;;  %1320 = vperm.xlu1 %4108, %v1282_v41   ;;  %1315 = vperm.xlu0 %4107, %v1281_v42   ;;  %6658 = vst [vmem:[#allocation22_spill] sm:$0xff] %v5048_v46 }
  0xd3   : > { %v5050_v47 = vpop.permute.xlu0 %1770  ;;  %v5060_v51 = vpop.permute.xlu1 %1775 }
  0xd4   : > { %1347 = vperm.xlu0 %4107, %v1344_v44   ;;  %1114 = vperm.xlu1 %4108, %v1108_v45  }
  0xd7   : > { %v5058_v50 = vpop.permute.xlu0 %1690  ;;  %v5076_v57 = vpop.permute.xlu1 %1695 }
  0xd8   : > { %1119 = vperm.xlu0 %4107, %v1109_v48   ;;  %1138 = vperm.xlu1 %4108, %v1132_v49  }
  0xdb   : > { %v5068_v54 = vpop.permute.xlu0 %1900  ;;  %v5086_v61 = vpop.permute.xlu1 %1905 }
  0xdc   : > { %6659 = vst [vmem:[#allocation23_spill] sm:$0xff] %v5068_v54  ;;  %1143 = vperm.xlu0 %4107, %v1133_v52   ;;  %1124 = vperm.xlu1 %4108, %v1110_v53   ;;  %6660 = vst [vmem:[#allocation24_spill] sm:$0xff] %v5086_v61 }
  0xdf   : > { %v5078_v58 = vpop.permute.xlu0 %1780  ;;  %v5090_v63 = vpop.permute.xlu1 %1785 }
  0xe0   : > { %1148 = vperm.xlu0 %4107, %v1134_v55   ;;  %1129 = vperm.xlu1 %4108, %v1111_v56  }
  0xe3   : > { %v5088_v62 = vpop.permute.xlu0 %1700  ;;  %v5094_v1 = vpop.permute.xlu1 %1705 }
  0xe4   : > { %1153 = vperm.xlu0 %4107, %v1135_v59   ;;  %3474 = vperm.xlu1 %4108, %v3470_v60  }
  0xe7   : > { %v5092_v0 = vpop.permute.xlu0 %1910  ;;  %v5098_v3 = vpop.permute.xlu1 %1915 }
  0xe8   : > { %6661 = vst [vmem:[#allocation25_spill] sm:$0xff] %v5092_v0  ;;  %6662 = vst [vmem:[#allocation26_spill] sm:$0xff] %v5098_v3 }
  0xeb   : > { %v5096_v2 = vpop.permute.xlu0 %1790  ;;  %v5100_v5 = vpop.permute.xlu1 %1795 }
  0xef   : > { %v1711_v4 = vpop.permute.xlu0 %1710  ;;  %v5104_v7 = vpop.permute.xlu1 %1715 }
  0xf3   : > { %v5102_v6 = vpop.permute.xlu0 %1920  ;;  %v5108_v9 = vpop.permute.xlu1 %1925 }
  0xf4   : > { %6663 = vst [vmem:[#allocation27_spill] sm:$0xff] %v5102_v6  ;;  %6664 = vst [vmem:[#allocation28_spill] sm:$0xff] %v5108_v9 }
  0xf7   : > { %v5106_v8 = vpop.permute.xlu0 %1800  ;;  %v5112_v12 = vpop.permute.xlu1 %1805 }
  0xfb   : > { %v5110_v11 = vpop.permute.xlu0 %1720  ;;  %v5116_v16 = vpop.permute.xlu1 %1725 }
  0xff   : > { %v5114_v13 = vpop.permute.xlu0 %1930  ;;  %v5120_v18 = vpop.permute.xlu1 %1935 }
 0x100   : > { %6665 = vst [vmem:[#allocation29_spill] sm:$0xff] %v5114_v13  ;;  %6666 = vst [vmem:[#allocation30_spill] sm:$0xff] %v5120_v18 }
 0x103   : > { %v5118_v17 = vpop.permute.xlu0 %1810  ;;  %v5132_v38 = vpop.permute.xlu1 %1815 }
 0x107   : > { %v5122_v21 = vpop.permute.xlu0 %1730  ;;  %v1736_v56 = vpop.permute.xlu1 %1735 }
 0x10b   : > { %v5134_v41 = vpop.permute.xlu0 %1940 }
 0x10c   : > { %6671 = vst [vmem:[#allocation35_spill] sm:$0xff] %v5134_v41 }
 0x10f   : > { %v5144_v59 = vpop.permute.xlu0 %1820 }
 0x110   : > { %6676 = vst [vmem:[#allocation40_spill] sm:$0xff] %v5144_v59 }
 0x113   : > { %v5162_v61 = vpop.permute.xlu0 %1740 }
 0x11c   : > { %v3973_v22 = vpop.f32.mrb[0].mxu1  ;;  %v5124_v25 = vpop.f32.mrb[0].mxu0 }
 0x11d   : > { %6667 = vst [vmem:[#allocation31_spill] sm:$0xff] %v5124_v25  ;;  %v2252_v26 = vpop.f32.mrb[1].mxu1  ;;  %v5126_v29 = vpop.f32.mrb[1].mxu0  ;;  %v5151_v13 = vadd.f32 %v3973_v22, %v5058_v50 }
 0x11e   : > { %6668 = vst [vmem:[#allocation32_spill] sm:$0xff] %v5126_v29  ;;  %v3974_v30 = vpop.f32.mrb[2].mxu1  ;;  %v5128_v33 = vpop.f32.mrb[2].mxu0 }
 0x11f   : > { %6669 = vst [vmem:[#allocation33_spill] sm:$0xff] %v5128_v33  ;;  %v2255_v34 = vpop.f32.mrb[3].mxu1  ;;  %v5130_v37 = vpop.f32.mrb[3].mxu0  ;;  %v5171_v22 = vadd.f32 %v3974_v30, %v5076_v57 }
 0x120   : > { %6670 = vst [vmem:[#allocation34_spill] sm:$0xff] %v5130_v37  ;;  %v5160_v33 = vpop.permute.xlu1 %1945  ;;  %v5192_v30 = vadd.f32 %v2255_v34, %v5032_v40  ;;  %v5196_v25 = vpop.permute.xlu0 %1950 }
 0x121   : > { %6681 = vst [vmem:[#allocation45_spill] sm:$0xff] %v5160_v33  ;;  %v2494_v57 = vmul.f32 %v5171_v22, %v5171_v22  ;;  %6687 = vst [vmem:[#allocation51_spill] sm:$0xff] %v5196_v25 }
 0x122   : > { %v2492_v31 = vmul.f32 %v5192_v30, %v5192_v30 }
 0x124   : > { %v3977_v42 = vpop.f32.mrb[4].mxu1  ;;  %v5136_v45 = vpop.f32.mrb[4].mxu0  ;;  %v2552_v43 = vmul.f32 %v2492_v31, %v5192_v30 }
 0x125   : > { %v2268_v44 = vpop.f32.mrb[5].mxu1  ;;  %6672 = vst [vmem:[#allocation36_spill] sm:$0xff] %v5136_v45  ;;  %v5138_v49 = vpop.f32.mrb[5].mxu0 }
 0x126   : > { %v3978_v48 = vpop.f32.mrb[6].mxu1  ;;  %6673 = vst [vmem:[#allocation37_spill] sm:$0xff] %v5138_v49  ;;  %v5140_v53 = vpop.f32.mrb[6].mxu0  ;;  %v2493_v49 = vmul.f32 %v5151_v13, %v5151_v13 }
 0x127   : > { %v2271_v52 = vpop.f32.mrb[7].mxu1  ;;  %6674 = vst [vmem:[#allocation38_spill] sm:$0xff] %v5140_v53  ;;  %v5142_v55 = vpop.f32.mrb[7].mxu0  ;;  %v5156_v53 = vadd.f32 %v2252_v26, %v5030_v39  ;;  %v5209_v40 = vadd.f32 %v3978_v48, %v5104_v7 }
 0x128   : > { %6675 = vst [vmem:[#allocation39_spill] sm:$0xff] %v5142_v55  ;;  %v5186_v45 = vpop.permute.xlu1 %1825 }
 0x129   : > { %v2491_v50 = vmul.f32 %v5156_v53, %v5156_v53  ;;  %6685 = vst [vmem:[#allocation49_spill] sm:$0xff] %v5186_v45  ;;  %v2612_v45 = vmul.f32 0.044715, %v2552_v43 }
 0x12c   : > { %v3981_v60 = vpop.f32.mrb[8].mxu1  ;;  %v5146_v9 = vpop.f32.mrb[8].mxu0 }
 0x12d   : > { %v2284_v10 = vpop.f32.mrb[9].mxu1  ;;  %6677 = vst [vmem:[#allocation41_spill] sm:$0xff] %v5146_v9  ;;  %v5148_v18 = vpop.f32.mrb[9].mxu0  ;;  %v2551_v9 = vmul.f32 %v2491_v50, %v5156_v53  ;;  %v2554_v50 = vmul.f32 %v2494_v57, %v5171_v22  ;;  %v5227_v7 = vadd.f32 %v3981_v60, %v5122_v21 }
 0x12e   : > { %v3982_v41 = vpop.f32.mrb[10].mxu1  ;;  %6678 = vst [vmem:[#allocation42_spill] sm:$0xff] %v5148_v18  ;;  %v5153_v37 = vpop.f32.mrb[10].mxu0  ;;  %v2553_v18 = vmul.f32 %v2493_v49, %v5151_v13  ;;  %v5201_v49 = vadd.f32 %v2268_v44, %v5088_v62  ;;  %v5216_v62 = vadd.f32 %v2271_v52, %v5094_v1  ;;  %v5233_v1 = vadd.f32 %v2284_v10, %v5110_v11 }
 0x12f   : > { %v2287_v6 = vpop.f32.mrb[11].mxu1  ;;  %6679 = vst [vmem:[#allocation43_spill] sm:$0xff] %v5153_v37  ;;  %v5158_v55 = vpop.f32.mrb[11].mxu0  ;;  %v2611_v0 = vmul.f32 0.044715, %v2551_v9 }
 0x130   : > { %6680 = vst [vmem:[#allocation44_spill] sm:$0xff] %v5158_v55  ;;  %v2495_v44 = vmul.f32 %v5201_v49, %v5201_v49  ;;  %v5229_v57 = vpop.permute.xlu0 %1830  ;;  %v2614_v32 = vmul.f32 0.044715, %v2554_v50  ;;  %v2499_v31 = vmul.f32 %v5233_v1, %v5233_v1  ;;  %v5254_v50 = vadd.f32 %v2287_v6, %v5116_v16 }
 0x131   : > { %6690 = vst [vmem:[#allocation54_spill] sm:$0xff] %v5229_v57  ;;  %v2671_v46 = vadd.f32 %v2611_v0, %v5156_v53  ;;  %v2501_v0 = vmul.f32 %v5227_v7, %v5227_v7 }
 0x132   : > { %v2555_v10 = vmul.f32 %v2495_v44, %v5201_v49  ;;  %v2559_v43 = vmul.f32 %v2499_v31, %v5233_v1 }
 0x133   : > { %v2561_v24 = vmul.f32 %v2501_v0, %v5227_v7  ;;  %v2672_v0 = vadd.f32 %v2612_v45, %v5192_v30 }
 0x134   : > { %v5166_v29 = vpop.f32.mrb[12].mxu1  ;;  %v5175_v39 = vpop.f32.mrb[12].mxu0  ;;  %v2615_v16 = vmul.f32 0.044715, %v2555_v10 }
 0x135   : > { %v5173_v37 = vpop.f32.mrb[13].mxu1  ;;  %6682 = vst [vmem:[#allocation46_spill] sm:$0xff] %v5175_v39  ;;  %v5179_v33 = vpop.f32.mrb[13].mxu0 }
 0x136   : > { %v5177_v26 = vpop.f32.mrb[14].mxu1  ;;  %6683 = vst [vmem:[#allocation47_spill] sm:$0xff] %v5179_v33  ;;  %v5184_v3 = vpop.f32.mrb[14].mxu0  ;;  %v5198_v33 = vadd.f32 %v3977_v42, %v1711_v4 }
 0x137   : > { %v5181_v55 = vpop.f32.mrb[15].mxu1  ;;  %6684 = vst [vmem:[#allocation48_spill] sm:$0xff] %v5184_v3  ;;  %v5194_v39 = vpop.f32.mrb[15].mxu0  ;;  %v2613_v3 = vmul.f32 0.044715, %v2553_v18 }
 0x138   : > { %6686 = vst [vmem:[#allocation50_spill] sm:$0xff] %v5194_v39  ;;  %v2497_v4 = vmul.f32 %v5198_v33, %v5198_v33  ;;  %v5222_v42 = vpop.permute.xlu1 %1745  ;;  %v1751_v23 = vpop.permute.xlu0 %1750 }
 0x139   : > { %v2673_v25 = vadd.f32 %v2613_v3, %v5151_v13  ;;  %v2496_v3 = vmul.f32 %v5216_v62, %v5216_v62 }
 0x13a   : > { %v2557_v60 = vmul.f32 %v2497_v4, %v5198_v33  ;;  %v2731_v4 = vmul.f32 0.7978846, %v2671_v46  ;;  %v5269_v46 = vadd.f32 %v5166_v29, %v1751_v23 }
 0x13b   : > { %v2733_v11 = vmul.f32 0.7978846, %v2673_v25  ;;  %v2556_v27 = vmul.f32 %v2496_v3, %v5216_v62 }
 0x13c   : > { %v5203_v54 = vpop.f32.mrb[16].mxu1  ;;  %v5211_v39 = vpop.f32.mrb[16].mxu0  ;;  %v2617_v25 = vmul.f32 0.044715, %v2557_v60 }
 0x13d   : > { %v2316_v34 = vpop.f32.mrb[17].mxu1  ;;  %6688 = vst [vmem:[#allocation52_spill] sm:$0xff] %v5211_v39  ;;  %v5220_v9 = vpop.f32.mrb[17].mxu0  ;;  %v5246_v39 = vadd.f32 %v3982_v41, %v1736_v56  ;;  %4180 = vtanh.f32 %v2733_v11  ;;  %v2616_v11 = vmul.f32 0.044715, %v2556_v27 }
 0x13e   : > { %v5218_v18 = vpop.f32.mrb[18].mxu1  ;;  %6689 = vst [vmem:[#allocation53_spill] sm:$0xff] %v5220_v9  ;;  %v5235_v52 = vpop.f32.mrb[18].mxu0  ;;  %v2498_v9 = vmul.f32 %v5209_v40, %v5209_v40  ;;  %v5277_v60 = vadd.f32 %v2316_v34, %v5022_v36  ;;  %4182 = vtanh.f32 %v2731_v4  ;;  %v2677_v29 = vadd.f32 %v2617_v25, %v5198_v33 }
 0x13f   : > { %v2319_v48 = vpop.f32.mrb[19].mxu1  ;;  %6691 = vst [vmem:[#allocation55_spill] sm:$0xff] %v5235_v52  ;;  %v5241_v21 = vpop.f32.mrb[19].mxu0  ;;  %v2674_v52 = vadd.f32 %v2614_v32, %v5171_v22  ;;  %v2502_v6 = vmul.f32 %v5246_v39, %v5246_v39  ;;  %v2675_v36 = vadd.f32 %v2615_v16, %v5201_v49  ;;  %v2621_v34 = vmul.f32 0.044715, %v2561_v24 }
 0x140   : > { %6692 = vst [vmem:[#allocation56_spill] sm:$0xff] %v5241_v21  ;;  %v2558_v41 = vmul.f32 %v2498_v9, %v5209_v40  ;;  %v5262_v44 = vpop.permute.xlu1 %1955  ;;  %v2500_v9 = vmul.f32 %v5254_v50, %v5254_v50  ;;  %v5287_v28 = vadd.f32 %v2319_v48, %v5020_v35  ;;  %v5301_v25 = vadd.f32 %v5173_v37, %v5162_v61 }
 0x141   : > { %6693 = vst [vmem:[#allocation57_spill] sm:$0xff] %v5262_v44  ;;  %v2734_v10 = vmul.f32 0.7978846, %v2674_v52  ;;  %v2562_v31 = vmul.f32 %v2502_v6, %v5246_v39  ;;  %v2505_v52 = vmul.f32 %v5269_v46, %v5269_v46  ;;  %v2507_v35 = vmul.f32 %v5277_v60, %v5277_v60 }
 0x142   : > { %v2618_v44 = vmul.f32 0.044715, %v2558_v41  ;;  %v2619_v41 = vmul.f32 0.044715, %v2559_v43  ;;  %v2560_v27 = vmul.f32 %v2500_v9, %v5254_v50  ;;  %6698 = vst [vmem:[#allocation62_spill] sm:$0xff] %v5301_v25  ;;  %v2508_v16 = vmul.f32 %v5287_v28, %v5287_v28 }
 0x143   : > { %4184 = vtanh.f32 %v2734_v10  ;;  %v2732_v24 = vmul.f32 0.7978846, %v2672_v0  ;;  %v2737_v9 = vmul.f32 0.7978846, %v2677_v29  ;;  %v2676_v61 = vadd.f32 %v2616_v11, %v5216_v62 }
 0x144   : > { %v5256_v21 = vpop.f32.mrb[20].mxu1  ;;  %v5282_v23 = vpop.f32.mrb[20].mxu0  ;;  %v2678_v6 = vadd.f32 %v2618_v44, %v5209_v40  ;;  %v2622_v37 = vmul.f32 0.044715, %v2562_v31  ;;  %v2735_v44 = vmul.f32 0.7978846, %v2675_v36  ;;  %v2681_v0 = vadd.f32 %v2621_v34, %v5227_v7 }
 0x145   : > { %v5260_v56 = vpop.f32.mrb[21].mxu1  ;;  %6694 = vst [vmem:[#allocation58_spill] sm:$0xff] %v5282_v23  ;;  %v5289_v59 = vpop.f32.mrb[21].mxu0  ;;  %v2679_v29 = vadd.f32 %v2619_v41, %v5233_v1  ;;  %v2503_v11 = vmul.f32 %v5301_v25, %v5301_v25  ;;  %4186 = vtanh.f32 %v2732_v24  ;;  %v5335_v36 = vadd.f32 %v5218_v18, %v5060_v51 }
 0x146   : > { %v5271_v32 = vpop.f32.mrb[22].mxu1  ;;  %6695 = vst [vmem:[#allocation59_spill] sm:$0xff] %v5289_v59  ;;  %v5294_v45 = vpop.f32.mrb[22].mxu0  ;;  %v5317_v59 = vadd.f32 %v5203_v54, %v5050_v47  ;;  %v2567_v47 = vmul.f32 %v2507_v35, %v5277_v60  ;;  %v2738_v31 = vmul.f32 0.7978846, %v2678_v6  ;;  %v2568_v34 = vmul.f32 %v2508_v16, %v5287_v28 }
 0x147   : > { %v5279_v3 = vpop.f32.mrb[23].mxu1  ;;  %6696 = vst [vmem:[#allocation60_spill] sm:$0xff] %v5294_v45  ;;  %v5296_v4 = vpop.permute.xlu1 %1835  ;;  %4188 = vtanh.f32 %v2737_v9  ;;  %v2736_v41 = vmul.f32 0.7978846, %v2676_v61  ;;  %v2741_v6 = vmul.f32 0.7978846, %v2681_v0  ;;  %v2510_v61 = vmul.f32 %v5335_v36, %v5335_v36 }
 0x148   : > { %6697 = vst [vmem:[#allocation61_spill] sm:$0xff] %v5296_v4  ;;  %v5312_v43 = vpop.f32.mrb[23].mxu0  ;;  %6700 = vst [vmem:[#allocation64_spill] sm:$0xff] %v5317_v59  ;;  %v2565_v4 = vmul.f32 %v2505_v52, %v5269_v46  ;;  %v2509_v35 = vmul.f32 %v5317_v59, %v5317_v59  ;;  %4190 = vtanh.f32 %v2735_v44  ;;  %v2739_v18 = vmul.f32 0.7978846, %v2679_v29 }
 0x149   : > { %6699 = vst [vmem:[#allocation63_spill] sm:$0xff] %v5312_v43  ;;  %v2620_v43 = vmul.f32 0.044715, %v2560_v27  ;;  %v2682_v27 = vadd.f32 %v2622_v37, %v5246_v39  ;;  %v2627_v19 = vmul.f32 0.044715, %v2567_v47  ;;  %4192 = vtanh.f32 %v2738_v31 }
 0x14a   : > { %v2628_v37 = vmul.f32 0.044715, %v2568_v34  ;;  %4194 = vtanh.f32 %v2736_v41  ;;  %v5364_v34 = vadd.f32 %v5181_v55, %v5222_v42 }
 0x14b   : > { %v1756_v51 = vpop.permute.xlu1 %1755  ;;  %v2680_v16 = vadd.f32 %v2620_v43, %v5254_v50  ;;  %v2742_v0 = vmul.f32 0.7978846, %v2682_v27  ;;  %v2569_v43 = vmul.f32 %v2509_v35, %v5317_v59  ;;  %4196 = vtanh.f32 %v2741_v6 }
 0x14c   : > { %v5305_v48 = vpop.f32.mrb[24].mxu1  ;;  %v5321_v10 = vpop.f32.mrb[24].mxu0  ;;  %v5348_v9 = vadd.f32 %v5177_v26, %v1756_v51  ;;  %6710 = vst [vmem:[#allocation74_spill] sm:$0xff] %v5364_v34  ;;  %4198 = vtanh.f32 %v2739_v18  ;;  %v2687_v27 = vadd.f32 %v2627_v19, %v5277_v60  ;;  %v2688_v6 = vadd.f32 %v2628_v37, %v5287_v28 }
 0x14d   : > { %v5310_v45 = vpop.f32.mrb[25].mxu1  ;;  %6701 = vst [vmem:[#allocation65_spill] sm:$0xff] %v5321_v10  ;;  %v5331_v54 = vpop.f32.mrb[25].mxu0  ;;  %4200 = vtanh.f32 %v2742_v0  ;;  %v2629_v42 = vmul.f32 0.044715, %v2569_v43 }
 0x14e   : > { %v5319_v23 = vpop.f32.mrb[26].mxu1  ;;  %6702 = vst [vmem:[#allocation66_spill] sm:$0xff] %v5331_v54  ;;  %v5338_v52 = vpop.f32.mrb[26].mxu0  ;;  %v2625_v54 = vmul.f32 0.044715, %v2565_v4  ;;  %6705 = vst [vmem:[#allocation69_spill] sm:$0xff] %v5348_v9 }
 0x14f   : > { %v5325_v20 = vpop.f32.mrb[27].mxu1  ;;  %6703 = vst [vmem:[#allocation67_spill] sm:$0xff] %v5338_v52  ;;  %v4181_v10 = vpop.eup %4180  ;;  %v2563_v52 = vmul.f32 %v2503_v11, %v5301_v25  ;;  %v2747_v37 = vmul.f32 0.7978846, %v2687_v27 }
 0x150   : > { %v5343_v57 = vpop.f32.mrb[27].mxu0  ;;  %v4183_v24 = vpop.eup %4182  ;;  %v2853_v4 = vadd.f32 1.0, %v4181_v10  ;;  %v2685_v31 = vadd.f32 %v2625_v54, %v5269_v46  ;;  %v2740_v10 = vmul.f32 0.7978846, %v2680_v16  ;;  %v2570_v54 = vmul.f32 %v2510_v61, %v5335_v36 }
 0x151   : > { %6704 = vst [vmem:[#allocation68_spill] sm:$0xff] %v5343_v57  ;;  %v4185_v47 = vpop.eup %4184  ;;  %v2851_v26 = vadd.f32 1.0, %v4183_v24  ;;  %v2623_v41 = vmul.f32 0.044715, %v2563_v52  ;;  %v2506_v24 = vmul.f32 %v5348_v9, %v5348_v9 }
 0x152   : > { %v4187_v52 = vpop.eup %4186  ;;  %v2913_v16 = vmul.f32 0.5, %v2853_v4  ;;  %v2854_v19 = vadd.f32 1.0, %v4185_v47  ;;  %4202 = vtanh.f32 %v2740_v10  ;;  %v2748_v4 = vmul.f32 0.7978846, %v2688_v6 }
 0x153   : > { %v2683_v61 = vadd.f32 %v2623_v41, %v5301_v25  ;;  %v2566_v43 = vmul.f32 %v2506_v24, %v5348_v9  ;;  %v5396_v10 = vadd.f32 %v5260_v56, %v5078_v58 }
 0x154   : > { %v5352_v57 = vpop.f32.mrb[28].mxu1  ;;  %v5354_v44 = vpop.f32.mrb[28].mxu0  ;;  %v5403_v24 = vmul.f32 %v2913_v16, %v5151_v13 }
 0x155   : > { %6706 = vst [vmem:[#allocation70_spill] sm:$0xff] %v5352_v57  ;;  %6707 = vst [vmem:[#allocation71_spill] sm:$0xff] %v5354_v44  ;;  %v5357_v29 = vpop.f32.mrb[29].mxu1  ;;  %v5359_v11 = vpop.f32.mrb[29].mxu0  ;;  %v2852_v57 = vadd.f32 1.0, %v4187_v52 }
 0x156   : > { %6708 = vst [vmem:[#allocation72_spill] sm:$0xff] %v5357_v29  ;;  %6709 = vst [vmem:[#allocation73_spill] sm:$0xff] %v5359_v11  ;;  %v5366_v51 = vpop.f32.mrb[30].mxu1  ;;  %v5371_v44 = vpop.permute.xlu0 %1960  ;;  %v2745_v11 = vmul.f32 0.7978846, %v2685_v31 }
 0x157   : > { %6711 = vst [vmem:[#allocation75_spill] sm:$0xff] %v5366_v51  ;;  %v5369_v35 = vpop.f32.mrb[31].mxu1  ;;  %6713 = vst [vmem:[#allocation77_spill] sm:$0xff] %v5371_v44  ;;  %v5377_v55 = vpop.f32.mrb[30].mxu0  ;;  %v2504_v44 = vmul.f32 %v5364_v34, %v5364_v34  ;;  %v2911_v51 = vmul.f32 0.5, %v2851_v26  ;;  %v2689_v26 = vadd.f32 %v2629_v42, %v5317_v59 }
 0x158   : > { %6712 = vst [vmem:[#allocation76_spill] sm:$0xff] %v5369_v35  ;;  %6714 = vst [vmem:[#allocation78_spill] sm:$0xff] %v5377_v55  ;;  %v5379_v18 = vpop.f32.mrb[31].mxu0  ;;  %v4189_v35 = vpop.eup %4188  ;;  %4204 = vtanh.f32 %v2745_v11  ;;  %v2626_v16 = vmul.f32 0.044715, %v2566_v43 }
 0x159   : > { %6715 = vst [vmem:[#allocation79_spill] sm:$0xff] %v5379_v18  ;;  %v5383_v29 = vpop.permute.xlu1 %1965  ;;  %v4191_v0 = vpop.eup %4190  ;;  %v2630_v18 = vmul.f32 0.044715, %v2570_v54  ;;  %6719 = vst [vmem:[#allocation83_spill] sm:$0xff] %v5403_v24  ;;  %v2914_v54 = vmul.f32 0.5, %v2854_v19  ;;  %v2564_v52 = vmul.f32 %v2504_v44, %v5364_v34  ;;  %v5411_v58 = vmul.f32 %v2911_v51, %v5156_v53 }
 0x15a   : > { %6716 = vst [vmem:[#allocation80_spill] sm:$0xff] %v5383_v29  ;;  %v4193_v29 = vpop.eup %4192  ;;  %v5405_v6 = vpop.permute.xlu0 %1970  ;;  %v2857_v56 = vadd.f32 1.0, %v4189_v35  ;;  %4206 = vtanh.f32 %v2747_v37  ;;  %v2855_v13 = vadd.f32 1.0, %v4191_v0  ;;  %v2749_v24 = vmul.f32 0.7978846, %v2689_v26 }
 0x15b   : > { %6720 = vst [vmem:[#allocation84_spill] sm:$0xff] %v5405_v6  ;;  %v4195_v42 = vpop.eup %4194  ;;  %v2690_v19 = vadd.f32 %v2630_v18, %v5335_v36  ;;  %4208 = vtanh.f32 %v2748_v4  ;;  %v2858_v6 = vadd.f32 1.0, %v4193_v29  ;;  %v2511_v53 = vmul.f32 %v5396_v10, %v5396_v10 }
 0x15c   : > { %v5386_v55 = vpop.f32.mrb[32].mxu1  ;;  %v5391_v31 = vpop.f32.mrb[32].mxu0  ;;  %v5422_v51 = vadd.f32 %v5279_v3, %v5090_v63  ;;  %v5425_v35 = vmul.f32 %v2914_v54, %v5171_v22  ;;  %v2856_v37 = vadd.f32 1.0, %v4195_v42  ;;  %v2624_v0 = vmul.f32 0.044715, %v2564_v52 }
 0x15d   : > { %v5389_v47 = vpop.f32.mrb[33].mxu1  ;;  %6717 = vst [vmem:[#allocation81_spill] sm:$0xff] %v5391_v31  ;;  %v5400_v27 = vpop.f32.mrb[33].mxu0  ;;  %v2743_v31 = vmul.f32 0.7978846, %v2683_v61  ;;  %v2912_v61 = vmul.f32 0.5, %v2852_v57  ;;  %v5431_v29 = vadd.f32 %v5256_v21, %v5096_v2  ;;  %v2686_v57 = vadd.f32 %v2626_v16, %v5348_v9 }
 0x15e   : > { %v5398_v41 = vpop.f32.mrb[34].mxu1  ;;  %6718 = vst [vmem:[#allocation82_spill] sm:$0xff] %v5400_v27  ;;  %v5413_v27 = vpop.f32.mrb[34].mxu0  ;;  %v2917_v43 = vmul.f32 0.5, %v2857_v56  ;;  %v2915_v63 = vmul.f32 0.5, %v2855_v13  ;;  %v2918_v42 = vmul.f32 0.5, %v2858_v6  ;;  %v2571_v56 = vmul.f32 %v2511_v53, %v5396_v10 }
 0x15f   : > { %v5408_v25 = vpop.f32.mrb[35].mxu1  ;;  %v4197_v59 = vpop.eup %4196  ;;  %4210 = vtanh.f32 %v2743_v31  ;;  %v2750_v54 = vmul.f32 0.7978846, %v2690_v19  ;;  %v5446_v21 = vmul.f32 %v2912_v61, %v5192_v30  ;;  %v2916_v13 = vmul.f32 0.5, %v2856_v37 }
 0x160   : > { %v5416_v11 = vpop.f32.mrb[35].mxu0  ;;  %v4199_v44 = vpop.eup %4198  ;;  %4212 = vtanh.f32 %v2749_v24  ;;  %v2684_v16 = vadd.f32 %v2624_v0, %v5364_v34  ;;  %v5454_v24 = vmul.f32 %v2917_v43, %v5198_v33  ;;  %v2746_v34 = vmul.f32 0.7978846, %v2686_v57 }
 0x161   : > { %6721 = vst [vmem:[#allocation85_spill] sm:$0xff] %v5416_v11  ;;  %v4201_v18 = vpop.eup %4200  ;;  %v5427_v4 = vpop.permute.xlu1 %1975  ;;  %v2861_v11 = vadd.f32 1.0, %v4197_v59  ;;  %v2859_v22 = vadd.f32 1.0, %v4199_v44  ;;  %v2512_v59 = vmul.f32 %v5422_v51, %v5422_v51  ;;  %4214 = vtanh.f32 %v2750_v54 }
 0x162   : > { %6722 = vst [vmem:[#allocation86_spill] sm:$0xff] %v5427_v4  ;;  %v5435_v3 = vpop.permute.xlu0 %3075  ;;  %v4203_v52 = vpop.eup %4202  ;;  %v2862_v44 = vadd.f32 1.0, %v4201_v18  ;;  %v5460_v4 = vadd.f32 %v5271_v32, %v5100_v5  ;;  %v5472_v43 = vmul.f32 %v2918_v42, %v5209_v40  ;;  %v2631_v32 = vmul.f32 0.044715, %v2571_v56 }
 0x163   : > { %6723 = vst [vmem:[#allocation87_spill] sm:$0xff] %v5435_v3  ;;  %v2921_v53 = vmul.f32 0.5, %v2861_v11  ;;  %v2513_v3 = vmul.f32 %v5431_v29, %v5431_v29  ;;  %v4205_v37 = vpop.eup %4204  ;;  %v2919_v0 = vmul.f32 0.5, %v2859_v22  ;;  %v2860_v18 = vadd.f32 1.0, %v4203_v52 }
 0x164   : > { %v5433_v26 = vpop.f32.mrb[36].mxu1  ;;  %v5443_v2 = vpop.f32.mrb[36].mxu0  ;;  %v5469_v11 = vmul.f32 %v2915_v63, %v5201_v49  ;;  %v5478_v22 = vmul.f32 %v2916_v13, %v5216_v62  ;;  %v2922_v57 = vmul.f32 0.5, %v2862_v44  ;;  %v2744_v54 = vmul.f32 0.7978846, %v2684_v16 }
 0x165   : > { %v5441_v31 = vpop.f32.mrb[37].mxu1  ;;  %v5451_v6 = vpop.f32.mrb[37].mxu0  ;;  %v5482_v52 = vadd.f32 %v5305_v48, %v5118_v17  ;;  %v5485_v49 = vmul.f32 %v2921_v53, %v5227_v7  ;;  %v2865_v40 = vadd.f32 1.0, %v4205_v37  ;;  %v2573_v63 = vmul.f32 %v2513_v3, %v5431_v29 }
 0x166   : > { %v5449_v19 = vpop.f32.mrb[38].mxu1  ;;  %6724 = vst [vmem:[#allocation88_spill] sm:$0xff] %v5451_v6  ;;  %v5464_v61 = vpop.f32.mrb[38].mxu0  ;;  %v2572_v6 = vmul.f32 %v2512_v59, %v5422_v51  ;;  %v2514_v42 = vmul.f32 %v5460_v4, %v5460_v4  ;;  %v5495_v62 = vmul.f32 %v2919_v0, %v5233_v1  ;;  %v2920_v13 = vmul.f32 0.5, %v2860_v18 }
 0x167   : > { %v5462_v30 = vpop.f32.mrb[39].mxu1  ;;  %6725 = vst [vmem:[#allocation89_spill] sm:$0xff] %v5464_v61  ;;  %v5466_v9 = vpop.f32.mrb[39].mxu0  ;;  %6727 = vst [vmem:[#allocation91_spill] sm:$0xff] %v5482_v52  ;;  %4216 = vtanh.f32 %v2746_v34  ;;  %v2691_v3 = vadd.f32 %v2631_v32, %v5396_v10  ;;  %v5504_v53 = vadd.f32 %v5310_v45, %v5106_v8  ;;  %v5511_v0 = vmul.f32 %v2922_v57, %v5246_v39 }
 0x168   : > { %v4207_v33 = vpop.eup %4206  ;;  %v5474_v5 = vpop.permute.xlu1 %3080  ;;  %6728 = vst [vmem:[#allocation92_spill] sm:$0xff] %v5485_v49  ;;  %v2632_v16 = vmul.f32 0.044715, %v2572_v6  ;;  %4218 = vtanh.f32 %v2744_v54  ;;  %v2517_v34 = vmul.f32 %v5482_v52, %v5482_v52  ;;  %v2925_v45 = vmul.f32 0.5, %v2865_v40 }
 0x169   : > { %6726 = vst [vmem:[#allocation90_spill] sm:$0xff] %v5474_v5  ;;  %v4209_v61 = vpop.eup %4208  ;;  %v5497_v44 = vpop.permute.xlu0 %3085  ;;  %v2867_v17 = vadd.f32 1.0, %v4207_v33  ;;  %6731 = vst [vmem:[#allocation95_spill] sm:$0xff] %v5511_v0  ;;  %v5525_v39 = vmul.f32 %v2920_v13, %v5254_v50  ;;  %v5531_v54 = vadd.f32 %v5319_v23, %v5132_v38  ;;  %v2751_v40 = vmul.f32 0.7978846, %v2691_v3 }
 0x16a   : > { %6729 = vst [vmem:[#allocation93_spill] sm:$0xff] %v5497_v44  ;;  %v4211_v48 = vpop.eup %4210  ;;  %v2868_v37 = vadd.f32 1.0, %v4209_v61  ;;  %v2633_v61 = vmul.f32 0.044715, %v2573_v63  ;;  %v2574_v44 = vmul.f32 %v2514_v42, %v5460_v4  ;;  %v2692_v63 = vadd.f32 %v2632_v16, %v5422_v51 }
 0x16b   : > { %v2927_v18 = vmul.f32 0.5, %v2867_v17  ;;  %v4213_v32 = vpop.eup %4212  ;;  %v5527_v57 = vadd.f32 1.0, %v4211_v48  ;;  %6733 = vst [vmem:[#allocation97_spill] sm:$0xff] %v5531_v54  ;;  %v5535_v17 = vadd.f32 %v5325_v20, %v5112_v12  ;;  %v2515_v42 = vmul.f32 %v5504_v53, %v5504_v53 }
 0x16c   : > { %v5490_v56 = vpop.f32.mrb[40].mxu1  ;;  %v5492_v59 = vpop.f32.mrb[40].mxu0  ;;  %v2928_v49 = vmul.f32 0.5, %v2868_v37  ;;  %v2577_v48 = vmul.f32 %v2517_v34, %v5482_v52  ;;  %v3039_v23 = vpack.c.bf16 %v5446_v21, %v5411_v58  ;;  %v2869_v20 = vadd.f32 1.0, %v4213_v32  ;;  %v6741_v32 = vld [vmem:[#allocation13_spill] sm:$0xff] }
 0x16d   : > { %v5499_v7 = vpop.f32.mrb[41].mxu1  ;;  %v5508_v1 = vpop.f32.mrb[41].mxu0  ;;  %v2987_v38 = vmul.f32 %v2927_v18, %v5277_v60  ;;  %v5548_v12 = vmul.f32 %v2925_v45, %v5269_v46  ;;  %v2693_v3 = vadd.f32 %v2633_v61, %v5431_v29  ;;  %v2634_v16 = vmul.f32 0.044715, %v2574_v44 }
 0x16e   : > { %v5506_v5 = vpop.f32.mrb[42].mxu1  ;;  %6730 = vst [vmem:[#allocation94_spill] sm:$0xff] %v5508_v1  ;;  %v5517_v6 = vpop.f32.mrb[42].mxu0  ;;  %v2988_v37 = vmul.f32 %v2928_v49, %v5287_v28  ;;  %v5553_v28 = vadd.f32 %v5386_v55, %v4966_v14  ;;  %v2518_v60 = vmul.f32 %v5531_v54, %v5531_v54  ;;  %v2516_v58 = vmul.f32 %v5535_v17, %v5535_v17 }
 0x16f   : > { %v5515_v33 = vpop.f32.mrb[43].mxu1  ;;  %v5519_v8 = vpop.permute.xlu1 %3090  ;;  %6735 = vst [vmem:[#allocation99_spill] sm:$0xff] %v5548_v12  ;;  %v5565_v46 = vadd.f32 %v5389_v47, %v4968_v15  ;;  %v2752_v55 = vmul.f32 0.7978846, %v2692_v63  ;;  %v2575_v18 = vmul.f32 %v2515_v42, %v5504_v53  ;;  %v5576_v45 = vadd.f32 %v5398_v41, %v6741_v32  ;;  %v6742_v15 = vld [vmem:[#allocation54_spill] sm:$0xff] }
 0x170   : > { %6732 = vst [vmem:[#allocation96_spill] sm:$0xff] %v5519_v8  ;;  %v5522_v1 = vpop.f32.mrb[43].mxu0  ;;  %v4215_v50 = vpop.eup %4214  ;;  %v3047_v21 = vpack.c.bf16 %v2988_v37, %v2987_v38  ;;  %4220 = vtanh.f32 %v2751_v40  ;;  %v2637_v12 = vmul.f32 0.044715, %v2577_v48  ;;  %v6743_v47 = vld [vmem:[#allocation70_spill] sm:$0xff]  ;;  %v2929_v38 = vmul.f32 0.5, %v2869_v20 }
 0x171   : > { %v5541_v13 = vpop.permute.xlu0 %3256  ;;  %v2870_v61 = vadd.f32 1.0, %v4215_v50  ;;  %v4217_v8 = vpop.eup %4216  ;;  %v5580_v37 = vadd.f32 %v6743_v47, %v6742_v15  ;;  %v2525_v63 = vmul.f32 %v5553_v28, %v5553_v28  ;;  %v6747_v42 = vld [vmem:[#allocation14_spill] sm:$0xff]  ;;  %v6748_v50 = vld [vmem:[#allocation83_spill] sm:$0xff]  ;;  %v2578_v47 = vmul.f32 %v2518_v60, %v5531_v54 }
 0x172   : > { %6734 = vst [vmem:[#allocation98_spill] sm:$0xff] %v5541_v13  ;;  %3868 = vmatprep.subr.bf16.mxu0 %v3047_v21  ;;  %v5590_v41 = vadd.f32 %v5408_v25, %v6747_v42  ;;  %v3040_v48 = vpack.c.bf16 %v5425_v35, %v6748_v50  ;;  %v4219_v20 = vpop.eup %4218  ;;  %v4165_v35 = vld [vmem:[%s6563_s9 + $0x4] ss:$16 sps:$4 sm:$0xff]   ;;  %v2526_v42 = vmul.f32 %v5576_v45, %v5576_v45  ;;  %4222 = vtanh.f32 %v2752_v55 }
 0x173   : > { %v5571_v14 = vpop.permute.xlu1 %3261  ;;  %6744 = vst [vmem:[#allocation13_spill] sm:$0xff] %v5580_v37  ;;  %3869 = vmatpush3.bf16.msra.mxu0 %v3039_v23  ;;  %v2930_v40 = vmul.f32 0.5, %v2870_v61  ;;  %v2523_v23 = vmul.f32 %v5565_v46, %v5565_v46  ;;  %v2635_v61 = vmul.f32 0.044715, %v2575_v18  ;;  %v6755_v50 = vld [vmem:[#allocation64_spill] sm:$0xff]  ;;  %3170 = vmatprep.mubr.bf16.mxu0 %v4165_v35  ;;  %v2585_v18 = vmul.f32 %v2525_v63, %v5553_v28 }
 0x174   : > { %v5555_v49 = vpop.f32.mrb[44].mxu0  ;;  %v5557_v13 = vpop.f32.mrb[44].mxu1  ;;  %6740 = vst [vmem:[#allocation104_spill] sm:$0xff] %v5571_v14  ;;  %v2638_v55 = vmul.f32 0.044715, %v2578_v47 }
 0x175   : > { %6736 = vst [vmem:[#allocation100_spill] sm:$0xff] %v5555_v49  ;;  %6737 = vst [vmem:[#allocation101_spill] sm:$0xff] %v5557_v13  ;;  %v5567_v44 = vpop.f32.mrb[45].mxu0  ;;  %v5569_v34 = vpop.f32.mrb[45].mxu1  ;;  %v2990_v60 = vmul.f32 %v2930_v40, %v5335_v36  ;;  %v2583_v40 = vmul.f32 %v2523_v23, %v5565_v46 }
 0x176   : > { %6738 = vst [vmem:[#allocation102_spill] sm:$0xff] %v5567_v44  ;;  %6739 = vst [vmem:[#allocation103_spill] sm:$0xff] %v5569_v34  ;;  %v5582_v34 = vpop.f32.mrb[46].mxu0  ;;  %v5584_v14 = vpop.f32.mrb[46].mxu1  ;;  %v6753_v44 = vld [vmem:[#allocation72_spill] sm:$0xff] }
 0x177   : > { %6745 = vst [vmem:[#allocation54_spill] sm:$0xff] %v5582_v34  ;;  %6746 = vst [vmem:[#allocation70_spill] sm:$0xff] %v5584_v14  ;;  %v5594_v32 = vpop.f32.mrb[47].mxu0  ;;  %v5596_v21 = vpop.f32.mrb[47].mxu1  ;;  %v2576_v14 = vmul.f32 %v2516_v58, %v5535_v17  ;;  %v6752_v34 = vld [vmem:[#allocation40_spill] sm:$0xff]  ;;  %v5615_v58 = vadd.f32 1.0, %v4217_v8 }
 0x178   : > { %6749 = vst [vmem:[#allocation14_spill] sm:$0xff] %v5594_v32  ;;  %6750 = vst [vmem:[#allocation83_spill] sm:$0xff] %v5596_v21  ;;  %v5598_v15 = vpop.permute.xlu0 %3266  ;;  %v5604_v25 = vadd.f32 %v6753_v44, %v6752_v34  ;;  %v2694_v44 = vadd.f32 %v2634_v16, %v5460_v4  ;;  %v2521_v34 = vmul.f32 %v5580_v37, %v5580_v37  ;;  %v6756_v21 = vld [vmem:[#allocation61_spill] sm:$0xff]  ;;  %v6757_v32 = vld [vmem:[#allocation75_spill] sm:$0xff]  ;;  %v2753_v8 = vmul.f32 0.7978846, %v2693_v3  ;;  %v5633_v35 = vpop.permute.xlu1 %3271 }
 0x179   : > { %6751 = vst [vmem:[#allocation105_spill] sm:$0xff] %v5598_v15  ;;  %v2989_v15 = vmul.f32 %v2929_v38, %v6755_v50  ;;  %v5622_v0 = vadd.f32 %v6757_v32, %v6756_v21  ;;  %v2524_v38 = vmul.f32 %v5590_v41, %v5590_v41  ;;  %v2697_v16 = vadd.f32 %v2637_v12, %v5482_v52  ;;  %v6802_v52 = vld [vmem:[#allocation58_spill] sm:$0xff] }
 0x17a   : > { %6754 = vst [vmem:[#allocation40_spill] sm:$0xff] %v5604_v25  ;;  %6761 = vst [vmem:[#allocation75_spill] sm:$0xff] %v5633_v35  ;;  %v2695_v32 = vadd.f32 %v2635_v61, %v5504_v53  ;;  %v2636_v21 = vmul.f32 0.044715, %v2576_v14  ;;  %v2519_v63 = vmul.f32 %v5604_v25, %v5604_v25  ;;  %v5642_v12 = vmul.f32 0.5, %v5527_v57  ;;  %v6764_v35 = vld [vmem:[#allocation18_spill] sm:$0xff] }
 0x17b   : > { %6758 = vst [vmem:[#allocation72_spill] sm:$0xff] %v5622_v0  ;;  %v3048_v50 = vpack.c.bf16 %v2990_v60, %v2989_v15  ;;  %v2586_v15 = vmul.f32 %v2526_v42, %v5576_v45  ;;  %v2754_v47 = vmul.f32 0.7978846, %v2694_v44  ;;  %v2581_v23 = vmul.f32 %v2521_v34, %v5580_v37 }
 0x17c   : > { %v5627_v36 = vpop.f32.mrb[48].mxu1  ;;  %v5644_v3 = vpop.permute.xlu0 %3276  ;;  %v5649_v61 = vadd.f32 %v5433_v26, %v6764_v35  ;;  %v2522_v42 = vmul.f32 %v5622_v0, %v5622_v0  ;;  %v2584_v57 = vmul.f32 %v2524_v38, %v5590_v41  ;;  %4224 = vtanh.f32 %v2753_v8 }
 0x17d   : > { %6759 = vst [vmem:[#allocation64_spill] sm:$0xff] %v5627_v36  ;;  %v5631_v13 = vpop.f32.mrb[49].mxu1  ;;  %3870 = vmatprep.subr.bf16.mxu0 %v3048_v50  ;;  %6763 = vst [vmem:[#allocation107_spill] sm:$0xff] %v5644_v3  ;;  %v2645_v50 = vmul.f32 0.044715, %v2585_v18  ;;  %v2698_v34 = vadd.f32 %v2638_v55, %v5531_v54  ;;  %v2696_v26 = vadd.f32 %v2636_v21, %v5535_v17  ;;  %4226 = vtanh.f32 %v2754_v47  ;;  %v6767_v18 = vld [vmem:[#allocation16_spill] sm:$0xff]  ;;  %v5667_v8 = vpop.permute.xlu1 %3281 }
 0x17e   : > { %6760 = vst [vmem:[#allocation61_spill] sm:$0xff] %v5631_v13  ;;  %v5639_v60 = vpop.f32.mrb[50].mxu1  ;;  %6765 = vst [vmem:[#allocation18_spill] sm:$0xff] %v5649_v61  ;;  %3871 = vmatpush3.bf16.msra.mxu0 %v3040_v48  ;;  %v5653_v13 = vadd.f32 1.0, %v4219_v20  ;;  %v2757_v44 = vmul.f32 0.7978846, %v2697_v16  ;;  %v2579_v48 = vmul.f32 %v2519_v63, %v5604_v25  ;;  %v5665_v38 = vadd.f32 %v5441_v31, %v6767_v18 }
 0x17f   : > { %6762 = vst [vmem:[#allocation106_spill] sm:$0xff] %v5639_v60  ;;  %v5651_v14 = vpop.f32.mrb[51].mxu1  ;;  %v4221_v60 = vpop.eup %4220  ;;  %v2643_v3 = vmul.f32 0.044715, %v2583_v40  ;;  %v2755_v36 = vmul.f32 0.7978846, %v2695_v32  ;;  %v2582_v16 = vmul.f32 %v2522_v42, %v5622_v0  ;;  %v2705_v55 = vadd.f32 %v2645_v50, %v5553_v28 }
 0x180   : > { %6766 = vst [vmem:[#allocation108_spill] sm:$0xff] %v5651_v14  ;;  %v2646_v35 = vmul.f32 0.044715, %v2586_v15  ;;  %v2641_v20 = vmul.f32 0.044715, %v2581_v23  ;;  %v2529_v14 = vmul.f32 %v5649_v61, %v5649_v61  ;;  %6768 = vst [vmem:[#allocation16_spill] sm:$0xff] %v5665_v38  ;;  %v4223_v15 = vpop.eup %4222  ;;  %v5677_v47 = vpop.permute.xlu0 %3286  ;;  %4228 = vtanh.f32 %v2757_v44 }
 0x181   : > { %6769 = vst [vmem:[#allocation109_spill] sm:$0xff] %v5667_v8  ;;  %v2644_v40 = vmul.f32 0.044715, %v2584_v57  ;;  %v6770_v32 = vld [vmem:[#allocation17_spill] sm:$0xff]  ;;  %6773 = vst [vmem:[#allocation111_spill] sm:$0xff] %v5677_v47  ;;  %v2703_v31 = vadd.f32 %v2643_v3, %v5565_v46  ;;  %v6774_v18 = vld [vmem:[#allocation15_spill] sm:$0xff]  ;;  %4230 = vtanh.f32 %v2755_v36  ;;  %v2527_v3 = vmul.f32 %v5665_v38, %v5665_v38 }
 0x182   : > { %v5673_v21 = vadd.f32 %v5449_v19, %v6770_v32  ;;  %v2758_v23 = vmul.f32 0.7978846, %v2698_v34  ;;  %v5682_v8 = vadd.f32 %v5462_v30, %v6774_v18  ;;  %v2756_v50 = vmul.f32 0.7978846, %v2696_v26 }
 0x183   : > { %v2639_v57 = vmul.f32 0.044715, %v2579_v48  ;;  %v2706_v19 = vadd.f32 %v2646_v35, %v5576_v45  ;;  %v2589_v44 = vmul.f32 %v2529_v14, %v5649_v61  ;;  %v2871_v34 = vadd.f32 1.0, %v4221_v60  ;;  %v6779_v48 = vld [vmem:[#allocation49_spill] sm:$0xff]  ;;  %v6780_v35 = vld [vmem:[#allocation76_spill] sm:$0xff] }
 0x184   : > { %6771 = vst [vmem:[#allocation17_spill] sm:$0xff] %v5673_v21  ;;  %v5675_v63 = vpop.f32.mrb[52].mxu1  ;;  %6775 = vst [vmem:[#allocation15_spill] sm:$0xff] %v5682_v8  ;;  %v2765_v30 = vmul.f32 0.7978846, %v2705_v55  ;;  %v2704_v18 = vadd.f32 %v2644_v40, %v5590_v41  ;;  %v2530_v36 = vmul.f32 %v5673_v21, %v5673_v21  ;;  %v2872_v26 = vadd.f32 1.0, %v4223_v15  ;;  %v5705_v40 = vpop.permute.xlu1 %3291 }
 0x185   : > { %6772 = vst [vmem:[#allocation110_spill] sm:$0xff] %v5675_v63  ;;  %v5684_v42 = vpop.f32.mrb[53].mxu1  ;;  %v2701_v63 = vadd.f32 %v2641_v20, %v5580_v37  ;;  %4232 = vtanh.f32 %v2758_v23  ;;  %v2763_v20 = vmul.f32 0.7978846, %v2703_v31  ;;  %v2528_v14 = vmul.f32 %v5682_v8, %v5682_v8  ;;  %6781 = vst [vmem:[#allocation49_spill] sm:$0xff] %v5705_v40  ;;  %v5707_v37 = vpop.permute.xlu0 %1285 }
 0x186   : > { %6776 = vst [vmem:[#allocation112_spill] sm:$0xff] %v5684_v42  ;;  %v5687_v32 = vpop.f32.mrb[54].mxu1  ;;  %4234 = vtanh.f32 %v2756_v50  ;;  %v2699_v60 = vadd.f32 %v2639_v57, %v5604_v25  ;;  %v2766_v55 = vmul.f32 0.7978846, %v2706_v19  ;;  %v4225_v42 = vpop.eup %4224  ;;  %6782 = vst [vmem:[#allocation76_spill] sm:$0xff] %v5707_v37  ;;  %v2587_v49 = vmul.f32 %v2527_v3, %v5665_v38  ;;  %v6784_v37 = vld [vmem:[#allocation52_spill] sm:$0xff] }
 0x187   : > { %6777 = vst [vmem:[#allocation113_spill] sm:$0xff] %v5687_v32  ;;  %v5693_v47 = vpop.f32.mrb[55].mxu1  ;;  %v5700_v32 = vadd.f32 %v6780_v35, %v6779_v48  ;;  %v2761_v15 = vmul.f32 0.7978846, %v2701_v63  ;;  %v2649_v23 = vmul.f32 0.044715, %v2589_v44  ;;  %4236 = vtanh.f32 %v2765_v30  ;;  %v4227_v57 = vpop.eup %4226 }
 0x188   : > { %6778 = vst [vmem:[#allocation114_spill] sm:$0xff] %v5693_v47  ;;  %v2642_v47 = vmul.f32 0.044715, %v2582_v16  ;;  %v2931_v48 = vmul.f32 0.5, %v2871_v34  ;;  %v2764_v31 = vmul.f32 0.7978846, %v2704_v18  ;;  %v2590_v35 = vmul.f32 %v2530_v36, %v5673_v21 }
 0x189   : > { %v2932_v54 = vmul.f32 0.5, %v2872_v26  ;;  %v2520_v16 = vmul.f32 %v5700_v32, %v5700_v32  ;;  %4238 = vtanh.f32 %v2763_v20  ;;  %v2588_v19 = vmul.f32 %v2528_v14, %v5682_v8  ;;  %v6785_v63 = vld [vmem:[#allocation81_spill] sm:$0xff] }
 0x18a   : > { %v5718_v44 = vmul.f32 %v6785_v63, %v6784_v37  ;;  %v5723_v34 = vmul.f32 0.5, %v5615_v58  ;;  %v2759_v30 = vmul.f32 0.7978846, %v2699_v60  ;;  %v5726_v18 = vadd.f32 %v2642_v47, %v5622_v0  ;;  %v5730_v26 = vpop.eup %4228  ;;  %v6789_v47 = vld [vmem:[#allocation65_spill] sm:$0xff]  ;;  %v5745_v0 = vpop.permute.xlu1 %1290 }
 0x18b   : > { %4240 = vtanh.f32 %v2766_v55  ;;  %v2709_v20 = vadd.f32 %v2649_v23, %v5649_v61  ;;  %v2647_v14 = vmul.f32 0.044715, %v2587_v49  ;;  %v2991_v40 = vmul.f32 %v2931_v48, %v5396_v10  ;;  %v5737_v58 = vpop.eup %4230  ;;  %6790 = vst [vmem:[#allocation65_spill] sm:$0xff] %v5745_v0  ;;  %v5747_v49 = vpop.permute.xlu0 %1295  ;;  %v6792_v23 = vld [vmem:[#allocation53_spill] sm:$0xff]  ;;  %v6793_v48 = vld [vmem:[#allocation82_spill] sm:$0xff]  ;;  %v6798_v0 = vld [vmem:[#allocation56_spill] sm:$0xff] }
 0x18c   : > { %v5711_v50 = vpop.f32.mrb[56].mxu1  ;;  %4242 = vtanh.f32 %v2764_v31  ;;  %v2650_v60 = vmul.f32 0.044715, %v2590_v35  ;;  %v5741_v55 = vmul.f32 %v6785_v63, %v6789_v47  ;;  %6791 = vst [vmem:[#allocation117_spill] sm:$0xff] %v5747_v49  ;;  %v2580_v10 = vmul.f32 %v2520_v16, %v5700_v32  ;;  %v6794_v35 = vld [vmem:[#allocation66_spill] sm:$0xff] }
 0x18d   : > { %6783 = vst [vmem:[#allocation115_spill] sm:$0xff] %v5711_v50  ;;  %v5720_v3 = vpop.f32.mrb[57].mxu1  ;;  %v2992_v50 = vmul.f32 %v2932_v54, %v5422_v51  ;;  %4244 = vtanh.f32 %v2761_v15  ;;  %v2648_v51 = vmul.f32 0.044715, %v2588_v19  ;;  %v5752_v31 = vmul.f32 %v6793_v48, %v6792_v23  ;;  %v6795_v15 = vld [vmem:[#allocation55_spill] sm:$0xff] }
 0x18e   : > { %6786 = vst [vmem:[#allocation52_spill] sm:$0xff] %v5720_v3  ;;  %v5728_v36 = vpop.f32.mrb[58].mxu1  ;;  %v5756_v63 = vmul.f32 %v6793_v48, %v6794_v35  ;;  %v2874_v25 = vadd.f32 1.0, %v4227_v57  ;;  %v2707_v49 = vadd.f32 %v2647_v14, %v5665_v38  ;;  %v5763_v16 = vmul.f32 %v5413_v27, %v6795_v15 }
 0x18f   : > { %6787 = vst [vmem:[#allocation81_spill] sm:$0xff] %v5728_v36  ;;  %v5735_v3 = vpop.f32.mrb[59].mxu1  ;;  %v3041_v36 = vpack.c.bf16 %v5478_v22, %v5469_v11  ;;  %v3049_v54 = vpack.c.bf16 %v2992_v50, %v2991_v40  ;;  %v5758_v11 = vpop.eup %4232  ;;  %v2769_v22 = vmul.f32 0.7978846, %v2709_v20  ;;  %v6796_v40 = vld [vmem:[#allocation67_spill] sm:$0xff]  ;;  %v2710_v48 = vadd.f32 %v2650_v60, %v5673_v21  ;;  %v6799_v20 = vld [vmem:[#allocation85_spill] sm:$0xff] }
 0x190   : > { %6788 = vst [vmem:[#allocation116_spill] sm:$0xff] %v5735_v3  ;;  %v2873_v3 = vadd.f32 1.0, %v4225_v42  ;;  %v5767_v50 = vmul.f32 %v5413_v27, %v6796_v40  ;;  %v5769_v19 = vpop.eup %4234  ;;  %v2934_v57 = vmul.f32 0.5, %v2874_v25  ;;  %v5774_v61 = vmul.f32 %v6799_v20, %v6798_v0  ;;  %v6806_v21 = vld [vmem:[#allocation21_spill] sm:$0xff] }
 0x191   : > { %3872 = vmatprep.subr.bf16.mxu0 %v3049_v54  ;;  %v2708_v14 = vadd.f32 %v2648_v51, %v5682_v8  ;;  %v6800_v54 = vld [vmem:[#allocation68_spill] sm:$0xff]  ;;  %v5783_v27 = vmul.f32 %v5443_v2, %v6802_v52  ;;  %v5793_v51 = vadd.f32 %v5490_v56, %v6806_v21  ;;  %v5799_v52 = vpop.permute.xlu0 %1305  ;;  %v2770_v21 = vmul.f32 0.7978846, %v2710_v48 }
 0x192   : > { %6797 = vst [vmem:[#allocation53_spill] sm:$0xff] %v5767_v50  ;;  %3873 = vmatpush3.bf16.msra.mxu0 %v3041_v36  ;;  %v2933_v42 = vmul.f32 0.5, %v2873_v3  ;;  %v5779_v38 = vmul.f32 %v6799_v20, %v6800_v54  ;;  %v6804_v50 = vld [vmem:[#allocation71_spill] sm:$0xff]  ;;  %v4237_v3 = vpop.eup %4236  ;;  %v2994_v36 = vmul.f32 %v2934_v57, %v5460_v4  ;;  %v3042_v20 = vpack.c.bf16 %v5472_v43, %v5454_v24  ;;  %v6812_v43 = vld [vmem:[#allocation20_spill] sm:$0xff] }
 0x193   : > { %6803 = vst [vmem:[#allocation66_spill] sm:$0xff] %v5783_v27  ;;  %v5787_v60 = vmul.f32 %v5443_v2, %v6804_v50  ;;  %v4239_v8 = vpop.eup %4238  ;;  %6808 = vst [vmem:[#allocation85_spill] sm:$0xff] %v5799_v52  ;;  %v2640_v27 = vmul.f32 0.044715, %v2580_v10  ;;  %v2767_v2 = vmul.f32 0.7978846, %v2707_v49  ;;  %v2533_v24 = vmul.f32 %v5793_v51, %v5793_v51 }
 0x194   : > { %6801 = vst [vmem:[#allocation82_spill] sm:$0xff] %v5779_v38  ;;  %v2993_v25 = vmul.f32 %v2933_v42, %v5431_v29  ;;  %v5797_v38 = vpop.permute.xlu1 %1300  ;;  %v6810_v50 = vld [vmem:[#allocation88_spill] sm:$0xff]  ;;  %v6811_v29 = vld [vmem:[#allocation73_spill] sm:$0xff]  ;;  %v5813_v57 = vadd.f32 %v5499_v7, %v6812_v43  ;;  %v6813_v10 = vld [vmem:[#allocation62_spill] sm:$0xff]  ;;  %4246 = vtanh.f32 %v2759_v30  ;;  %v2762_v30 = vmul.f32 0.7978846, %v5726_v18 }
 0x195   : > { %6805 = vst [vmem:[#allocation55_spill] sm:$0xff] %v5787_v60  ;;  %6807 = vst [vmem:[#allocation67_spill] sm:$0xff] %v5797_v38  ;;  %v6809_v60 = vld [vmem:[#allocation59_spill] sm:$0xff]  ;;  %v5807_v4 = vmul.f32 %v6810_v50, %v6811_v29  ;;  %v4241_v56 = vpop.eup %4240  ;;  %v5817_v49 = vmul.f32 %v5642_v12, %v6813_v10  ;;  %v6815_v52 = vld [vmem:[#allocation60_spill] sm:$0xff]  ;;  %4248 = vtanh.f32 %v2769_v22  ;;  %v2593_v7 = vmul.f32 %v2533_v24, %v5793_v51 }
 0x196   : > { %v5803_v0 = vmul.f32 %v6810_v50, %v6809_v60  ;;  %v3050_v42 = vpack.c.bf16 %v2994_v36, %v2993_v25  ;;  %v6816_v38 = vld [vmem:[#allocation89_spill] sm:$0xff]  ;;  %v6817_v50 = vld [vmem:[#allocation78_spill] sm:$0xff]  ;;  %v4243_v25 = vpop.eup %4242  ;;  %v2768_v36 = vmul.f32 0.7978846, %v2708_v14  ;;  %v2531_v43 = vmul.f32 %v5813_v57, %v5813_v57 }
 0x197   : > { %6814 = vst [vmem:[#allocation68_spill] sm:$0xff] %v5817_v49  ;;  %v5821_v60 = vmul.f32 %v6816_v38, %v6815_v52  ;;  %v5825_v48 = vmul.f32 %v6816_v38, %v6817_v50  ;;  %v5830_v12 = vpop.eup %4244  ;;  %v2700_v10 = vadd.f32 %v2640_v27, %v5700_v32  ;;  %v2885_v49 = vadd.f32 1.0, %v4237_v3  ;;  %v6820_v14 = vld [vmem:[#allocation22_spill] sm:$0xff]  ;;  %v5841_v52 = vpop.permute.xlu0 %1315  ;;  %v6823_v50 = vld [vmem:[#allocation63_spill] sm:$0xff] }
 0x198   : > { %3874 = vmatprep.subr.bf16.mxu0 %v3050_v42  ;;  %6819 = vst [vmem:[#allocation88_spill] sm:$0xff] %v5830_v12  ;;  %4250 = vtanh.f32 %v2767_v2  ;;  %v2653_v38 = vmul.f32 0.044715, %v2593_v7  ;;  %v2591_v22 = vmul.f32 %v2531_v43, %v5813_v57  ;;  %v5837_v42 = vadd.f32 %v5506_v5, %v6820_v14  ;;  %v5839_v24 = vpop.permute.xlu1 %1310  ;;  %6822 = vst [vmem:[#allocation20_spill] sm:$0xff] %v5841_v52  ;;  %v6824_v7 = vld [vmem:[#allocation79_spill] sm:$0xff] }
 0x199   : > { %6818 = vst [vmem:[#allocation21_spill] sm:$0xff] %v5825_v48  ;;  %3875 = vmatpush3.bf16.msra.mxu0 %v3042_v20  ;;  %4252 = vtanh.f32 %v2770_v21  ;;  %6821 = vst [vmem:[#allocation73_spill] sm:$0xff] %v5839_v24  ;;  %v2883_v12 = vadd.f32 1.0, %v4239_v8  ;;  %v2886_v48 = vadd.f32 1.0, %v4241_v56  ;;  %v2884_v18 = vadd.f32 1.0, %v4243_v25 }
 0x19a   : > { %v5845_v27 = vmul.f32 %v5466_v9, %v6823_v50  ;;  %4254 = vtanh.f32 %v2768_v36  ;;  %v2713_v3 = vadd.f32 %v2653_v38, %v5793_v51  ;;  %v2651_v20 = vmul.f32 0.044715, %v2591_v22  ;;  %v6825_v22 = vld [vmem:[#allocation19_spill] sm:$0xff] }
 0x19b   : > { %v2534_v2 = vmul.f32 %v5837_v42, %v5837_v42  ;;  %v2924_v5 = vmul.f32 0.5, %v5653_v13  ;;  %4256 = vtanh.f32 %v2762_v30  ;;  %v2760_v21 = vmul.f32 0.7978846, %v2700_v10 }
 0x19c   : > { %v5853_v8 = vmul.f32 %v5466_v9, %v6824_v7  ;;  %v2945_v56 = vmul.f32 0.5, %v2885_v49  ;;  %v2773_v25 = vmul.f32 0.7978846, %v2713_v3  ;;  %v2711_v43 = vadd.f32 %v2651_v20, %v5813_v57  ;;  %v6826_v49 = vld [vmem:[#allocation69_spill] sm:$0xff]  ;;  %v5868_v20 = vpop.permute.xlu1 %1320 }
 0x19d   : > { %v2594_v36 = vmul.f32 %v2534_v2, %v5837_v42  ;;  %v2943_v14 = vmul.f32 0.5, %v2883_v12  ;;  %v2946_v38 = vmul.f32 0.5, %v2886_v48  ;;  %v5859_v52 = vadd.f32 %v5515_v33, %v6825_v22  ;;  %6827 = vst [vmem:[#allocation62_spill] sm:$0xff] %v5868_v20  ;;  %v5870_v12 = vpop.permute.xlu0 %1347 }
 0x19e   : > { %v2875_v13 = vadd.f32 1.0, %v5737_v58  ;;  %v2944_v30 = vmul.f32 0.5, %v2884_v18  ;;  %4258 = vtanh.f32 %v2773_v25  ;;  %v2771_v10 = vmul.f32 0.7978846, %v2711_v43  ;;  %v5862_v9 = vpop.eup %4246  ;;  %6828 = vst [vmem:[#allocation89_spill] sm:$0xff] %v5870_v12  ;;  %v6829_v18 = vld [vmem:[#allocation74_spill] sm:$0xff] }
 0x19f   : > { %v2654_v24 = vmul.f32 0.044715, %v2594_v36  ;;  %v5866_v3 = vmul.f32 %v5723_v34, %v6826_v49  ;;  %4260 = vtanh.f32 %v2760_v21  ;;  %v2532_v33 = vmul.f32 %v5859_v52, %v5859_v52  ;;  %v4249_v48 = vpop.eup %4248 }
 0x1a0   : > { %v2876_v58 = vadd.f32 1.0, %v5769_v19  ;;  %v5876_v2 = vmul.f32 %v2924_v5, %v6829_v18  ;;  %4262 = vtanh.f32 %v2771_v10  ;;  %v2935_v43 = vmul.f32 0.5, %v2875_v13 }
 0x1a1   : > { %v2714_v25 = vadd.f32 %v2654_v24, %v5837_v42  ;;  %v5880_v36 = vmul.f32 %v2945_v56, %v5553_v28  ;;  %v5883_v22 = vmul.f32 %v2943_v14, %v5565_v46  ;;  %v5886_v21 = vmul.f32 %v2946_v38, %v5576_v45 }
 0x1a2   : > { %v4251_v34 = vpop.eup %4250  ;;  %v2592_v19 = vmul.f32 %v2532_v33, %v5859_v52  ;;  %v5890_v5 = vmul.f32 %v2944_v30, %v5590_v41  ;;  %v2936_v18 = vmul.f32 0.5, %v2876_v58  ;;  %v1058_v24 = vmul.f32 %v5492_v59, %v6789_v47  ;;  %v5903_v33 = vpop.permute.xlu1 %1114 }
 0x1a3   : > { %v4253_v49 = vpop.eup %4252  ;;  %v2774_v10 = vmul.f32 0.7978846, %v2714_v25  ;;  %v2889_v13 = vadd.f32 1.0, %v4249_v48  ;;  %v2995_v56 = vmul.f32 %v2935_v43, %v5504_v53  ;;  %v1086_v46 = vmul.f32 %v5492_v59, %v6784_v37  ;;  %v5905_v47 = vpop.permute.xlu0 %1119 }
 0x1a4   : > { %v2652_v28 = vmul.f32 0.044715, %v2592_v19  ;;  %v4255_v45 = vpop.eup %4254  ;;  %v2996_v14 = vmul.f32 %v2936_v18, %v5535_v17  ;;  %v1062_v38 = vadd.f32 %v1058_v24, %v5718_v44  ;;  %v3043_v41 = vpack.c.bf16 %v5525_v39, %v5495_v62  ;;  %v6830_v17 = vld [vmem:[#allocation94_spill] sm:$0xff] }
 0x1a5   : > { %4264 = vtanh.f32 %v2774_v10  ;;  %v5901_v30 = vpop.eup %4256  ;;  %v2887_v58 = vadd.f32 1.0, %v4251_v34  ;;  %v2890_v53 = vadd.f32 1.0, %v4253_v49  ;;  %v1090_v59 = vsub.f32 %v5741_v55, %v1086_v46 }
 0x1a6   : > { %v2712_v48 = vadd.f32 %v2652_v28, %v5859_v52  ;;  %v3051_v37 = vpack.c.bf16 %v2996_v14, %v2995_v56  ;;  %v1056_v25 = vmul.f32 %v6830_v17, %v6794_v35  ;;  %v5913_v44 = vmul.f32 %v6830_v17, %v6792_v23 }
 0x1a7   : > { %v2877_v62 = vadd.f32 1.0, %v5730_v26  ;;  %v2949_v39 = vmul.f32 0.5, %v2889_v13  ;;  %v2888_v43 = vadd.f32 1.0, %v4255_v45  ;;  %v2878_v34 = vadd.f32 1.0, %v5758_v11  ;;  %v5935_v46 = vpop.permute.xlu0 %1143 }
 0x1a8   : > { %v2772_v19 = vmul.f32 0.7978846, %v2712_v48  ;;  %v4259_v49 = vpop.eup %4258  ;;  %3876 = vmatprep.subr.bf16.mxu0 %v3051_v37  ;;  %v1060_v10 = vadd.f32 %v1056_v25, %v5752_v31  ;;  %v1088_v55 = vsub.f32 %v5756_v63, %v5913_v44  ;;  %v1059_v35 = vmul.f32 %v5517_v6, %v6796_v40  ;;  %v5933_v40 = vpop.permute.xlu1 %1138  ;;  %v6832_v48 = vld [vmem:[#allocation97_spill] sm:$0xff]  ;;  %v6836_v44 = vld [vmem:[#allocation18_spill] sm:$0xff]  ;;  %v6848_v37 = vld [vmem:[#allocation95_spill] sm:$0xff] }
 0x1a9   : > { %v2937_v18 = vmul.f32 0.5, %v2877_v62  ;;  %v5922_v23 = vpop.eup %4260  ;;  %v2947_v24 = vmul.f32 0.5, %v2887_v58  ;;  %v2893_v26 = vadd.f32 1.0, %v4259_v49  ;;  %3877 = vmatpush3.bf16.msra.mxu0 %v3043_v41  ;;  %v2938_v13 = vmul.f32 0.5, %v2878_v34  ;;  %v6831_v41 = vld [vmem:[#allocation91_spill] sm:$0xff] }
 0x1aa   : > { %4266 = vtanh.f32 %v2772_v19  ;;  %v4263_v28 = vpop.eup %4262  ;;  %v2950_v11 = vmul.f32 0.5, %v2890_v53  ;;  %v5925_v56 = vadd.f32 %v1059_v35, %v5763_v16  ;;  %v5929_v31 = vmul.f32 %v5517_v6, %v6795_v15  ;;  %v6833_v16 = vld [vmem:[#allocation53_spill] sm:$0xff]  ;;  %v6834_v6 = vld [vmem:[#allocation56_spill] sm:$0xff] }
 0x1ab   : > { %v1057_v63 = vmul.f32 %v5522_v1, %v6800_v54  ;;  %v2948_v45 = vmul.f32 0.5, %v2888_v43  ;;  %v2891_v14 = vadd.f32 1.0, %v4263_v28  ;;  %v2997_v58 = vmul.f32 %v2937_v18, %v6831_v41  ;;  %v6835_v54 = vld [vmem:[#allocation66_spill] sm:$0xff]  ;;  %v6839_v28 = vld [vmem:[#allocation100_spill] sm:$0xff] }
 0x1ac   : > { %v2998_v53 = vmul.f32 %v2938_v13, %v6832_v48  ;;  %v5946_v15 = vmul.f32 %v5522_v1, %v6834_v6  ;;  %v1070_v25 = vadd.f32 %v6835_v54, %v1062_v38  ;;  %v5950_v62 = vmul.f32 %v2949_v39, %v6836_v44  ;;  %v6837_v18 = vld [vmem:[#allocation82_spill] sm:$0xff]  ;;  %v6838_v13 = vld [vmem:[#allocation71_spill] sm:$0xff]  ;;  %v6842_v6 = vld [vmem:[#allocation16_spill] sm:$0xff] }
 0x1ad   : > { %v5942_v17 = vadd.f32 %v1057_v63, %v5774_v61  ;;  %v2953_v43 = vmul.f32 0.5, %v2893_v26  ;;  %v2951_v19 = vmul.f32 0.5, %v2891_v14  ;;  %v1074_v61 = vmul.f32 %v6839_v28, %v6838_v13  ;;  %v6840_v63 = vld [vmem:[#allocation55_spill] sm:$0xff]  ;;  %v6841_v48 = vld [vmem:[#allocation58_spill] sm:$0xff]  ;;  %v6843_v39 = vld [vmem:[#allocation17_spill] sm:$0xff] }
 0x1ae   : > { %v3052_v34 = vpack.c.bf16 %v2998_v53, %v2997_v58  ;;  %v1098_v41 = vadd.f32 %v6840_v63, %v1090_v59  ;;  %v1102_v1 = vmul.f32 %v6839_v28, %v6841_v48  ;;  %v5960_v38 = vmul.f32 %v2947_v24, %v6842_v6  ;;  %v6844_v14 = vld [vmem:[#allocation25_spill] sm:$0xff]  ;;  %v6846_v44 = vld [vmem:[#allocation15_spill] sm:$0xff]  ;;  %v6847_v63 = vld [vmem:[#allocation92_spill] sm:$0xff]  ;;  %v1125_v48 = vpop.permute.xlu1 %1124  ;;  %v1149_v24 = vpop.permute.xlu0 %1148 }
 0x1af   : > { %v4265_v49 = vpop.eup %4264  ;;  %v5963_v54 = vmul.f32 %v2950_v11, %v6843_v39  ;;  %v6845_v58 = vld [vmem:[#allocation101_spill] sm:$0xff]  ;;  %v5970_v35 = vmul.f32 %v2948_v45, %v6846_v44  ;;  %v1078_v13 = vadd.f32 %v1074_v61, %v1070_v25  ;;  %v3044_v28 = vpack.c.bf16 %v6848_v37, %v6847_v63  ;;  %v6851_v63 = vld [vmem:[#allocation23_spill] sm:$0xff] }
 0x1b0   : > { %v2894_v26 = vadd.f32 1.0, %v4265_v49  ;;  %3878 = vmatprep.subr.bf16.mxu0 %v3052_v34  ;;  %v5967_v53 = vadd.f32 %v6845_v58, %v6844_v14  ;;  %v1106_v59 = vsub.f32 %v1098_v41, %v1102_v1  ;;  %v5975_v6 = vmul.f32 %v2953_v43, %v5793_v51  ;;  %v6849_v43 = vld [vmem:[#allocation102_spill] sm:$0xff] }
 0x1b1   : > { %v1068_v49 = vadd.f32 %v5803_v0, %v1060_v10  ;;  %v5981_v39 = vmul.f32 %v2951_v19, %v5813_v57  ;;  %v1158_v45 = vmul.f32 %v1125_v48, %v1078_v13  ;;  %3879 = vmatpush3.bf16.msra.mxu0 %v3044_v28  ;;  %v1174_v1 = vmul.f32 %v1149_v24, %v1078_v13  ;;  %v6850_v57 = vld [vmem:[#allocation59_spill] sm:$0xff] }
 0x1b2   : > { %v2954_v11 = vmul.f32 0.5, %v2894_v26  ;;  %v2537_v34 = vmul.f32 %v5967_v53, %v5967_v53  ;;  %v1162_v25 = vmul.f32 %v1149_v24, %v1106_v59  ;;  %v1170_v61 = vmul.f32 %v1125_v48, %v1106_v59  ;;  %v6852_v28 = vld [vmem:[#allocation103_spill] sm:$0xff] }
 0x1b3   : > { %v1072_v26 = vmul.f32 %v6849_v43, %v6811_v29  ;;  %v1096_v0 = vadd.f32 %v5807_v4, %v1088_v55  ;;  %v1100_v10 = vmul.f32 %v6849_v43, %v6850_v57  ;;  %v6853_v48 = vld [vmem:[#allocation31_spill] sm:$0xff] }
 0x1b4   : > { %v4267_v41 = vpop.eup %4266  ;;  %v5984_v37 = vmul.f32 %v2954_v11, %v5837_v42  ;;  %v2597_v51 = vmul.f32 %v2537_v34, %v5967_v53  ;;  %v1166_v58 = vsub.f32 %v1158_v45, %v1162_v25  ;;  %v1178_v19 = vadd.f32 %v1174_v1, %v1170_v61  ;;  %v6854_v11 = vld [vmem:[#allocation41_spill] sm:$0xff]  ;;  %v6855_v34 = vld [vmem:[#allocation36_spill] sm:$0xff]  ;;  %v6856_v25 = vld [vmem:[#allocation46_spill] sm:$0xff] }
 0x1b5   : > { %v2892_v14 = vadd.f32 1.0, %v4267_v41  ;;  %v1076_v59 = vadd.f32 %v1072_v26, %v1068_v49  ;;  %v5994_v42 = vadd.f32 %v6852_v28, %v6851_v63  ;;  %v1104_v43 = vsub.f32 %v1096_v0, %v1100_v10 }
 0x1b6   : > { %v2657_v44 = vmul.f32 0.044715, %v2597_v51  ;;  %v5997_v24 = vmul.f32 %v6853_v48, %v1166_v58  ;;  %v1207_v29 = vmul.f32 %v6854_v11, %v1166_v58  ;;  %v6001_v45 = vmul.f32 %v6855_v34, %v1166_v58 }
 0x1b7   : > { %v2952_v13 = vmul.f32 0.5, %v2892_v14  ;;  %v6004_v4 = vmul.f32 %v6854_v11, %v1178_v19  ;;  %v1203_v55 = vmul.f32 %v6853_v48, %v1178_v19  ;;  %v6008_v49 = vmul.f32 %v6856_v25, %v1178_v19  ;;  %v6859_v48 = vld [vmem:[#allocation54_spill] sm:$0xff] }
 0x1b8   : > { %v1245_v61 = vmul.f32 %v6855_v34, %v1178_v19  ;;  %v1249_v1 = vmul.f32 %v6856_v25, %v1166_v58  ;;  %v2717_v51 = vadd.f32 %v2657_v44, %v5967_v53  ;;  %v1156_v63 = vmul.f32 %v5903_v33, %v1076_v59 }
 0x1b9   : > { %v6012_v41 = vmul.f32 %v2952_v13, %v5859_v52  ;;  %v6018_v14 = vadd.f32 %v1207_v29, %v1203_v55  ;;  %v1160_v52 = vmul.f32 %v5933_v40, %v1104_v43  ;;  %v1168_v58 = vmul.f32 %v5903_v33, %v1104_v43  ;;  %v6858_v13 = vld [vmem:[#allocation78_spill] sm:$0xff]  ;;  %v6861_v55 = vld [vmem:[#allocation21_spill] sm:$0xff] }
 0x1ba   : > { %v6023_v28 = vadd.f32 %v1249_v1, %v1245_v61  ;;  %v2777_v19 = vmul.f32 0.7978846, %v2717_v51  ;;  %v1172_v44 = vmul.f32 %v5933_v40, %v1076_v59  ;;  %v2535_v0 = vmul.f32 %v5994_v42, %v5994_v42  ;;  %v6862_v61 = vld [vmem:[#allocation60_spill] sm:$0xff]  ;;  %v6863_v51 = vld [vmem:[#allocation26_spill] sm:$0xff] }
 0x1bb   : > { %v1071_v10 = vadd.f32 %v5821_v60, %v5925_v56  ;;  %v1075_v11 = vmul.f32 %v6859_v48, %v6858_v13  ;;  %v1164_v29 = vsub.f32 %v1156_v63, %v1160_v52  ;;  %v6860_v34 = vsub.f32 %v6833_v16, %v5929_v31  ;;  %v6864_v43 = vld [vmem:[#allocation70_spill] sm:$0xff]  ;;  %v6865_v56 = vld [vmem:[#allocation32_spill] sm:$0xff]  ;;  %v6867_v52 = vld [vmem:[#allocation37_spill] sm:$0xff] }
 0x1bc   : > { %6857 = vst [vmem:[#allocation22_spill] sm:$0xff] %v6023_v28  ;;  %4268 = vtanh.f32 %v2777_v19  ;;  %v1103_v33 = vmul.f32 %v6859_v48, %v6862_v61  ;;  %v1176_v40 = vadd.f32 %v1172_v44, %v1168_v58  ;;  %v2595_v59 = vmul.f32 %v2535_v0, %v5994_v42  ;;  %v6866_v63 = vld [vmem:[#allocation42_spill] sm:$0xff]  ;;  %v6868_v16 = vld [vmem:[#allocation47_spill] sm:$0xff]  ;;  %v1154_v48 = vpop.permute.xlu0 %1153 }
 0x1bd   : > { %v1099_v25 = vadd.f32 %v6861_v55, %v6860_v34  ;;  %v1079_v1 = vadd.f32 %v1075_v11, %v1071_v10  ;;  %v6043_v60 = vadd.f32 %v6864_v43, %v6863_v51  ;;  %v6046_v13 = vmul.f32 %v1164_v29, %v6865_v56  ;;  %v1130_v55 = vpop.permute.xlu1 %1129 }
 0x1be   : > { %v1205_v19 = vmul.f32 %v1164_v29, %v6866_v63  ;;  %v6050_v31 = vmul.f32 %v1164_v29, %v6867_v52  ;;  %v1247_v34 = vmul.f32 %v1164_v29, %v6868_v16  ;;  %v6054_v58 = vmul.f32 %v1176_v40, %v6866_v63 }
 0x1bf   : > { %v1201_v44 = vmul.f32 %v1176_v40, %v6865_v56  ;;  %v6058_v0 = vmul.f32 %v1176_v40, %v6868_v16  ;;  %v1243_v10 = vmul.f32 %v1176_v40, %v6867_v52  ;;  %v2655_v11 = vmul.f32 0.044715, %v2595_v59 }
 0x1c0   : > { %v1107_v61 = vsub.f32 %v1099_v25, %v1103_v33  ;;  %v1159_v51 = vmul.f32 %v1130_v55, %v1079_v1  ;;  %v1175_v43 = vmul.f32 %v1154_v48, %v1079_v1  ;;  %v2538_v40 = vmul.f32 %v6043_v60, %v6043_v60  ;;  %v6869_v33 = vld [vmem:[#allocation14_spill] sm:$0xff] }
 0x1c1   : > { %v6063_v29 = vadd.f32 %v1205_v19, %v1201_v44  ;;  %v6067_v26 = vadd.f32 %v1247_v34, %v1243_v10  ;;  %v2715_v56 = vadd.f32 %v2655_v11, %v5994_v42  ;;  %v1069_v25 = vadd.f32 %v5845_v27, %v5942_v17  ;;  %v6872_v27 = vld [vmem:[#allocation83_spill] sm:$0xff] }
 0x1c2   : > { %v1163_v16 = vmul.f32 %v1154_v48, %v1107_v61  ;;  %v1171_v12 = vmul.f32 %v1130_v55, %v1107_v61  ;;  %v1073_v59 = vmul.f32 %v6869_v33, %v6824_v7  ;;  %v6870_v1 = vsub.f32 %v6837_v18, %v5946_v15  ;;  %v6871_v61 = vld [vmem:[#allocation24_spill] sm:$0xff]  ;;  %v6873_v15 = vld [vmem:[#allocation33_spill] sm:$0xff]  ;;  %v6874_v18 = vld [vmem:[#allocation43_spill] sm:$0xff] }
 0x1c3   : > { %v1101_v52 = vmul.f32 %v6869_v33, %v6823_v50  ;;  %v2775_v34 = vmul.f32 0.7978846, %v2715_v56  ;;  %v2598_v44 = vmul.f32 %v2538_v40, %v6043_v60  ;;  %v6085_v17 = vadd.f32 %v6872_v27, %v6871_v61  ;;  %v6875_v56 = vld [vmem:[#allocation38_spill] sm:$0xff]  ;;  %v6877_v40 = vld [vmem:[#allocation48_spill] sm:$0xff] }
 0x1c4   : > { %v1097_v19 = vadd.f32 %v5853_v8, %v6870_v1  ;;  %v1167_v48 = vsub.f32 %v1159_v51, %v1163_v16  ;;  %v1179_v55 = vadd.f32 %v1175_v43, %v1171_v12  ;;  %v1077_v10 = vadd.f32 %v1073_v59, %v1069_v25 }
 0x1c5   : > { %v2879_v7 = vadd.f32 1.0, %v5862_v9  ;;  %4270 = vtanh.f32 %v2775_v34  ;;  %v2658_v1 = vmul.f32 0.044715, %v2598_v44  ;;  %v2536_v44 = vmul.f32 %v6085_v17, %v6085_v17  ;;  %v6884_v9 = vld [vmem:[#allocation39_spill] sm:$0xff] }
 0x1c6   : > { %v1105_v11 = vsub.f32 %v1097_v19, %v1101_v52  ;;  %v4269_v63 = vpop.eup %4268  ;;  %v6089_v8 = vmul.f32 %v6873_v15, %v1167_v48  ;;  %v6092_v50 = vmul.f32 %v6874_v18, %v1179_v55  ;;  %v1204_v12 = vmul.f32 %v6873_v15, %v1179_v55 }
 0x1c7   : > { %v2897_v51 = vadd.f32 1.0, %v4269_v63  ;;  %v1208_v43 = vmul.f32 %v6874_v18, %v1167_v48  ;;  %v6097_v16 = vmul.f32 %v6875_v56, %v1167_v48  ;;  %v6100_v25 = vmul.f32 %v6877_v40, %v1179_v55 }
 0x1c8   : > { %v1246_v33 = vmul.f32 %v6875_v56, %v1179_v55  ;;  %v1250_v59 = vmul.f32 %v6877_v40, %v1167_v48  ;;  %v1157_v34 = vmul.f32 %v5905_v47, %v1077_v10  ;;  %v2718_v27 = vadd.f32 %v2658_v1, %v6043_v60  ;;  %v6880_v40 = vld [vmem:[#allocation68_spill] sm:$0xff] }
 0x1c9   : > { %6876 = vst [vmem:[#allocation63_spill] sm:$0xff] %v6097_v16  ;;  %6878 = vst [vmem:[#allocation79_spill] sm:$0xff] %v6100_v25  ;;  %v2957_v19 = vmul.f32 0.5, %v2897_v51  ;;  %v6106_v52 = vadd.f32 %v1208_v43, %v1204_v12  ;;  %v1161_v15 = vmul.f32 %v5935_v46, %v1105_v11  ;;  %v1169_v18 = vmul.f32 %v5905_v47, %v1105_v11  ;;  %v6881_v11 = vld [vmem:[#allocation88_spill] sm:$0xff] }
 0x1ca   : > { %v6111_v61 = vadd.f32 %v1250_v59, %v1246_v33  ;;  %v1173_v48 = vmul.f32 %v5935_v46, %v1077_v10  ;;  %v2880_v12 = vadd.f32 1.0, %v5922_v23  ;;  %v2778_v51 = vmul.f32 0.7978846, %v2718_v27  ;;  %v6883_v10 = vld [vmem:[#allocation44_spill] sm:$0xff] }
 0x1cb   : > { %v6117_v55 = vmul.f32 %v2957_v19, %v5967_v53  ;;  %v1165_v43 = vsub.f32 %v1157_v34, %v1161_v15  ;;  %v2939_v56 = vmul.f32 0.5, %v2879_v7  ;;  %v3045_v33 = vpack.c.bf16 %v5876_v2, %v6880_v40  ;;  %v6882_v19 = vld [vmem:[#allocation34_spill] sm:$0xff] }
 0x1cc   : > { %6879 = vst [vmem:[#allocation19_spill] sm:$0xff] %v6111_v61  ;;  %v1177_v59 = vadd.f32 %v1173_v48, %v1169_v18  ;;  %v2596_v1 = vmul.f32 %v2536_v44, %v6085_v17  ;;  %v2940_v47 = vmul.f32 0.5, %v2880_v12  ;;  %v2881_v53 = vadd.f32 1.0, %v6881_v11  ;;  %v6885_v34 = vld [vmem:[#allocation50_spill] sm:$0xff]  ;;  %v6886_v44 = vld [vmem:[#allocation40_spill] sm:$0xff] }
 0x1cd   : > { %4272 = vtanh.f32 %v2778_v51  ;;  %v1181_v46 = vmul.f32 %v1165_v43, %v6882_v19  ;;  %v1206_v63 = vmul.f32 %v1165_v43, %v6883_v10  ;;  %v1223_v57 = vmul.f32 %v1165_v43, %v6884_v9 }
 0x1ce   : > { %v1185_v23 = vmul.f32 %v1177_v59, %v6883_v10  ;;  %v1202_v7 = vmul.f32 %v1177_v59, %v6882_v19  ;;  %v1227_v27 = vmul.f32 %v1177_v59, %v6885_v34  ;;  %v1244_v2 = vmul.f32 %v1177_v59, %v6884_v9 }
 0x1cf   : > { %v4271_v15 = vpop.eup %4270  ;;  %v1248_v18 = vmul.f32 %v1165_v43, %v6885_v34  ;;  %v2656_v48 = vmul.f32 0.044715, %v2596_v1  ;;  %v2999_v12 = vmul.f32 %v2939_v56, %v6886_v44  ;;  %v3000_v51 = vmul.f32 %v2940_v47, %v5700_v32  ;;  %v6899_v34 = vld [vmem:[#allocation108_spill] sm:$0xff] }
 0x1d0   : > { %v2895_v40 = vadd.f32 1.0, %v4271_v15  ;;  %v1189_v11 = vsub.f32 %v1181_v46, %v1185_v23  ;;  %v1210_v20 = vadd.f32 %v1206_v63, %v1202_v7  ;;  %v1231_v61 = vsub.f32 %v1223_v57, %v1227_v27  ;;  %v6896_v23 = vld [vmem:[#allocation30_spill] sm:$0xff]  ;;  %v4171_v15 = vld [vmem:[%s6563_s9 + $0xc] ss:$16 sps:$4 sm:$0xff]  }
 0x1d1   : > { %v1252_v25 = vadd.f32 %v1248_v18, %v1244_v2  ;;  %v2716_v10 = vadd.f32 %v2656_v48, %v6085_v17  ;;  %v3053_v19 = vpack.c.bf16 %v3000_v51, %v2999_v12  ;;  %v2882_v16 = vadd.f32 1.0, %v5901_v30  ;;  %v6900_v51 = vld [vmem:[#allocation51_spill] sm:$0xff]  ;;  %3790 = vmatprep.mubr.msk.bf16.mxu1 %vm3131_vm1, %v4171_v15 }
 0x1d2   : > { %v2955_v28 = vmul.f32 0.5, %v2895_v40  ;;  %v6887_v9 = vsub.f32 %v6046_v13, %v6054_v58  ;;  %v6145_v56 = vadd.f32 %v1210_v20, %v6063_v29  ;;  %v6888_v32 = vsub.f32 %v6050_v31, %v6058_v0  ;;  %v6889_v13 = vld [vmem:[#allocation29_spill] sm:$0xff]  ;;  %v6890_v58 = vld [vmem:[#allocation64_spill] sm:$0xff]  ;;  %v6891_v29 = vld [vmem:[#allocation99_spill] sm:$0xff] }
 0x1d3   : > { %v6153_v57 = vadd.f32 %v1252_v25, %v6067_v26  ;;  %v2776_v59 = vmul.f32 0.7978846, %v2716_v10  ;;  %3880 = vmatprep.subr.bf16.mxu0 %v3053_v19  ;;  %v2941_v30 = vmul.f32 0.5, %v2881_v53  ;;  %v2942_v1 = vmul.f32 0.5, %v2882_v16  ;;  %v6892_v0 = vld [vmem:[#allocation27_spill] sm:$0xff]  ;;  %v6894_v26 = vld [vmem:[#allocation13_spill] sm:$0xff] }
 0x1d4   : > { %v6142_v43 = vadd.f32 %v1189_v11, %v6887_v9  ;;  %v6150_v63 = vadd.f32 %v1231_v61, %v6888_v32  ;;  %v6156_v47 = vmul.f32 %v2955_v28, %v5994_v42  ;;  %3881 = vmatpush3.bf16.msra.mxu0 %v3045_v33  ;;  %v6160_v20 = vadd.f32 %v6890_v58, %v6889_v13  ;;  %v6893_v61 = vld [vmem:[#allocation61_spill] sm:$0xff]  ;;  %v6895_v53 = vld [vmem:[#allocation72_spill] sm:$0xff]  ;;  %v6897_v42 = vld [vmem:[#allocation106_spill] sm:$0xff] }
 0x1d5   : > { %v3046_v31 = vpack.c.bf16 %v5866_v3, %v6891_v29  ;;  %v6166_v46 = vadd.f32 %v6893_v61, %v6892_v0  ;;  %4274 = vtanh.f32 %v2776_v59  ;;  %v3001_v25 = vmul.f32 %v2941_v30, %v6894_v26  ;;  %v6898_v3 = vld [vmem:[#allocation28_spill] sm:$0xff]  ;;  %v6901_v40 = vld [vmem:[#allocation110_spill] sm:$0xff]  ;;  %v6903_v59 = vld [vmem:[#allocation35_spill] sm:$0xff] }
 0x1d6   : > { %v3002_v16 = vmul.f32 %v2942_v1, %v6895_v53  ;;  %v6172_v28 = vadd.f32 %v6897_v42, %v6896_v23  ;;  %v2541_v33 = vmul.f32 %v6160_v20, %v6160_v20  ;;  %v6180_v27 = vadd.f32 %v6899_v34, %v6898_v3  ;;  %v6904_v30 = vld [vmem:[#allocation112_spill] sm:$0xff]  ;;  %v6906_v23 = vld [vmem:[#allocation113_spill] sm:$0xff] }
 0x1d7   : > { %v2539_v7 = vmul.f32 %v6166_v46, %v6166_v46  ;;  %v3055_v2 = vpack.c.bf16 %v5890_v5, %v5883_v22  ;;  %v4273_v18 = vpop.eup %4272  ;;  %v3056_v12 = vpack.c.bf16 %v5886_v21, %v5880_v36  ;;  %v6193_v11 = vadd.f32 %v6901_v40, %v6900_v51  ;;  %v4163_v36 = vld [vmem:[%s6563_s9] ss:$16 sps:$4 sm:$0xff]   ;;  %v4166_v13 = vld [vmem:[%s6563_s9 + $0x24] ss:$16 sps:$4 sm:$0xff]   ;;  %v6907_v51 = vld [vmem:[#allocation45_spill] sm:$0xff] }
 0x1d8   : > { %v3054_v48 = vpack.c.bf16 %v3002_v16, %v3001_v25  ;;  %v2542_v44 = vmul.f32 %v6172_v28, %v6172_v28  ;;  %v2898_v10 = vadd.f32 1.0, %v4273_v18  ;;  %v2601_v19 = vmul.f32 %v2541_v33, %v6160_v20  ;;  %v6905_v16 = vld [vmem:[#allocation57_spill] sm:$0xff]  ;;  %v6908_v40 = vld [vmem:[#allocation114_spill] sm:$0xff] }
 0x1d9   : > { %v2599_v22 = vmul.f32 %v2539_v7, %v6166_v46  ;;  %v2540_v5 = vmul.f32 %v6180_v27, %v6180_v27  ;;  %3188 = vmatpush1.bf16.msra.mxu1 %v3055_v2  ;;  %v6902_v21 = vmov 0   ;;  %v2545_v32 = vmul.f32 %v6193_v11, %v6193_v11 }
 0x1da   : > { %3882 = vmatprep.subr.bf16.mxu0 %v3054_v48  ;;  %v2602_v9 = vmul.f32 %v2542_v44, %v6172_v28  ;;  %3189 = vmatprep.subr.bf16.mxu1 %v6902_v21  ;;  %v6208_v1 = vadd.f32 %v6904_v30, %v6903_v59  ;;  %v2958_v58 = vmul.f32 0.5, %v2898_v10  ;;  %v2661_v29 = vmul.f32 0.044715, %v2601_v19 }
 0x1db   : > { %3883 = vmatpush3.bf16.msra.mxu0 %v3046_v31  ;;  %v2659_v0 = vmul.f32 0.044715, %v2599_v22  ;;  %v2600_v61 = vmul.f32 %v2540_v5, %v6180_v27  ;;  %v2605_v25 = vmul.f32 %v2545_v32, %v6193_v11  ;;  %v6220_v42 = vadd.f32 %v6906_v23, %v6905_v16 }
 0x1dc   : > { %v2662_v26 = vmul.f32 0.044715, %v2602_v9  ;;  %v2543_v53 = vmul.f32 %v6208_v1, %v6208_v1  ;;  %v6223_v33 = vmul.f32 %v2958_v58, %v6043_v60  ;;  %v2721_v31 = vadd.f32 %v2661_v29, %v6160_v20  ;;  %v4168_v29 = vld [vmem:[%s6563_s9 + $0x20] ss:$16 sps:$4 sm:$0xff]  }
 0x1dd   : > { %v2719_v7 = vadd.f32 %v2659_v0, %v6166_v46  ;;  %v2660_v3 = vmul.f32 0.044715, %v2600_v61  ;;  %3190 = vmatpush1.bf16.msra.mxu1 %v3056_v12  ;;  %v2665_v2 = vmul.f32 0.044715, %v2605_v25  ;;  %v2546_v18 = vmul.f32 %v6220_v42, %v6220_v42 }
 0x1de   : > { %v2722_v34 = vadd.f32 %v2662_v26, %v6172_v28  ;;  %3171 = vmatmul.mubr.bf16.vlgmr.msra.gmra.mrb[48].mxu0 %v4163_v36  ;;  %v2603_v15 = vmul.f32 %v2543_v53, %v6208_v1  ;;  %3191 = vmatprep.subr.bf16.mxu1 %v6902_v21  ;;  %v2781_v48 = vmul.f32 0.7978846, %v2721_v31  ;;  %v6235_v10 = vadd.f32 %v6908_v40, %v6907_v51 }
 0x1df   : > { %v2779_v60 = vmul.f32 0.7978846, %v2719_v7  ;;  %v2720_v44 = vadd.f32 %v2660_v3, %v6180_v27  ;;  %3178 = vmatprep.mubr.bf16.mxu0 %v4166_v13  ;;  %v4275_v12 = vpop.eup %4274  ;;  %v2725_v22 = vadd.f32 %v2665_v2, %v6193_v11  ;;  %v2606_v9 = vmul.f32 %v2546_v18, %v6220_v42  ;;  %v6909_v7 = vld [vmem:[#allocation84_spill] sm:$0xff]  ;;  %v6910_v3 = vld [vmem:[#allocation115_spill] sm:$0xff] }
 0x1e0   : > { %v2782_v19 = vmul.f32 0.7978846, %v2722_v34  ;;  %v2663_v5 = vmul.f32 0.044715, %v2603_v15  ;;  %v2896_v36 = vadd.f32 1.0, %v4275_v12  ;;  %4276 = vtanh.f32 %v2781_v48 }
 0x1e1   : > { %v2780_v32 = vmul.f32 0.7978846, %v2720_v44  ;;  %v2544_v59 = vmul.f32 %v6235_v10, %v6235_v10  ;;  %4278 = vtanh.f32 %v2779_v60  ;;  %v2785_v30 = vmul.f32 0.7978846, %v2725_v22  ;;  %v6915_v60 = vld [vmem:[#allocation80_spill] sm:$0xff] }
 0x1e2   : > { %v2723_v13 = vadd.f32 %v2663_v5, %v6208_v1  ;;  %v2666_v58 = vmul.f32 0.044715, %v2606_v9  ;;  %v2956_v0 = vmul.f32 0.5, %v2896_v36  ;;  %4280 = vtanh.f32 %v2782_v19  ;;  %v6916_v44 = vld [vmem:[#allocation116_spill] sm:$0xff] }
 0x1e3   : > { %v2604_v61 = vmul.f32 %v2544_v59, %v6235_v10  ;;  %v3057_v26 = vpack.c.bf16 %v5970_v35, %v5960_v38  ;;  %4282 = vtanh.f32 %v2780_v32  ;;  %v3058_v16 = vpack.c.bf16 %v5963_v54, %v5950_v62  ;;  %v6911_v35 = vld [vmem:[#allocation77_spill] sm:$0xff]  ;;  %v6912_v38 = vld [vmem:[#allocation52_spill] sm:$0xff]  ;;  %v6913_v62 = vld [vmem:[#allocation86_spill] sm:$0xff] }
 0x1e4   : > { %v2783_v25 = vmul.f32 0.7978846, %v2723_v13  ;;  %v2726_v53 = vadd.f32 %v2666_v58, %v6220_v42  ;;  %v6252_v23 = vmul.f32 %v2956_v0, %v6085_v17  ;;  %4284 = vtanh.f32 %v2785_v30  ;;  %v6914_v54 = vld [vmem:[#allocation81_spill] sm:$0xff] }
 0x1e5   : > { %v2664_v31 = vmul.f32 0.044715, %v2604_v61  ;;  %3192 = vmatpush1.bf16.msra.mxu1 %v3057_v26  ;;  %v6256_v34 = vadd.f32 %v6910_v3, %v6909_v7  ;;  %v6261_v15 = vadd.f32 %v6912_v38, %v6911_v35  ;;  %v6265_v17 = vadd.f32 %v6914_v54, %v6913_v62 }
 0x1e6   : > { %4286 = vtanh.f32 %v2783_v25  ;;  %v2786_v2 = vmul.f32 0.7978846, %v2726_v53  ;;  %3179 = vmatmul.mubr.bf16.gmra.mrb[52].mxu0 %v4168_v29  ;;  %3193 = vmatprep.subr.bf16.mxu1 %v6902_v21  ;;  %v6272_v51 = vadd.f32 %v6916_v44, %v6915_v60  ;;  %v3059_v40 = vpack.c.bf16 %v6012_v41, %v5981_v39 }
 0x1e7   : > { %v2724_v18 = vadd.f32 %v2664_v31, %v6235_v10  ;;  %v2549_v48 = vmul.f32 %v6256_v34, %v6256_v34  ;;  %v2547_v12 = vmul.f32 %v6261_v15, %v6261_v15  ;;  %v2550_v19 = vmul.f32 %v6265_v17, %v6265_v17 }
 0x1e8   : > { %4288 = vtanh.f32 %v2786_v2  ;;  %v3060_v22 = vpack.c.bf16 %v5984_v37, %v5975_v6  ;;  %v2548_v36 = vmul.f32 %v6272_v51, %v6272_v51  ;;  %v3061_v39 = vpack.c.bf16 %v6252_v23, %v6156_v47 }
 0x1e9   : > { %v2784_v5 = vmul.f32 0.7978846, %v2724_v18  ;;  %3194 = vmatpush1.bf16.msra.mxu1 %v3058_v16  ;;  %v2609_v9 = vmul.f32 %v2549_v48, %v6256_v34  ;;  %v2607_v41 = vmul.f32 %v2547_v12, %v6261_v15  ;;  %v2610_v32 = vmul.f32 %v2550_v19, %v6265_v17 }
 0x1ea   : > { %3195 = vmatprep.subr.bf16.mxu1 %v6902_v21  ;;  %v3062_v59 = vpack.c.bf16 %v6223_v33, %v6117_v55  ;;  %v6917_v6 = vsub.f32 %v5997_v24, %v6004_v4  ;;  %v4277_v30 = vpop.eup %4276  ;;  %v2608_v58 = vmul.f32 %v2548_v36, %v6272_v51  ;;  %v1214_v47 = vadd.f32 %v6145_v56, %v6018_v14 }
 0x1eb   : > { %4290 = vtanh.f32 %v2784_v5  ;;  %v2669_v13 = vmul.f32 0.044715, %v2609_v9  ;;  %v4279_v29 = vpop.eup %4278  ;;  %v2901_v0 = vadd.f32 1.0, %v4277_v30  ;;  %v2667_v61 = vmul.f32 0.044715, %v2607_v41 }
 0x1ec   : > { %v1193_v37 = vadd.f32 %v6142_v43, %v6917_v6  ;;  %v2670_v26 = vmul.f32 0.044715, %v2610_v32  ;;  %v6918_v25 = vsub.f32 %v6089_v8, %v6092_v50  ;;  %v4281_v16 = vpop.eup %4280  ;;  %v2899_v24 = vadd.f32 1.0, %v4279_v29 }
 0x1ed   : > { %v2729_v4 = vadd.f32 %v2669_v13, %v6256_v34  ;;  %v2668_v43 = vmul.f32 0.044715, %v2608_v58  ;;  %3196 = vmatpush1.bf16.msra.mxu1 %v3059_v40  ;;  %v1215_v23 = vadd.f32 %v1214_v47, %v6106_v52  ;;  %v4283_v31 = vpop.eup %4282  ;;  %v2961_v7 = vmul.f32 0.5, %v2901_v0 }
 0x1ee   : > { %v1194_v53 = vadd.f32 %v1193_v37, %v6918_v25  ;;  %v2902_v3 = vadd.f32 1.0, %v4281_v16  ;;  %v2727_v14 = vadd.f32 %v2667_v61, %v6261_v15  ;;  %v2730_v56 = vadd.f32 %v2670_v26, %v6265_v17  ;;  %3197 = vmatprep.subr.bf16.mxu1 %v6902_v21  ;;  %v4285_v2 = vpop.eup %4284  ;;  %v6920_v61 = vld [vmem:[#allocation22_spill] sm:$0xff] }
 0x1ef   : > { %v2959_v8 = vmul.f32 0.5, %v2899_v24  ;;  %v2900_v50 = vadd.f32 1.0, %v4283_v31  ;;  %v2789_v35 = vmul.f32 0.7978846, %v2729_v4  ;;  %v2728_v38 = vadd.f32 %v2668_v43, %v6272_v51  ;;  %v6921_v24 = vld [vmem:[#allocation63_spill] sm:$0xff] }
 0x1f0   : > { %v4287_v62 = vpop.eup %4286  ;;  %v2962_v54 = vmul.f32 0.5, %v2902_v3  ;;  %v2905_v18 = vadd.f32 1.0, %v4285_v2  ;;  %v2787_v48 = vmul.f32 0.7978846, %v2727_v14  ;;  %v6309_v52 = vmul.f32 %v2961_v7, %v6160_v20  ;;  %v6922_v4 = vld [vmem:[#allocation79_spill] sm:$0xff] }
 0x1f1   : > { %v2960_v60 = vmul.f32 0.5, %v2900_v50  ;;  %v2903_v44 = vadd.f32 1.0, %v4287_v62  ;;  %4292 = vtanh.f32 %v2789_v35  ;;  %3198 = vmatpush1.bf16.msra.mxu1 %v3060_v22  ;;  %v3019_v12 = vmul.f32 %v2959_v8, %v6166_v46 }
 0x1f2   : > { %v4289_v40 = vpop.eup %4288  ;;  %v3022_v19 = vmul.f32 %v2962_v54, %v6172_v28  ;;  %4294 = vtanh.f32 %v2787_v48  ;;  %v2790_v5 = vmul.f32 0.7978846, %v2730_v56  ;;  %3199 = vmatprep.subr.bf16.mxu1 %v6902_v21  ;;  %v2965_v36 = vmul.f32 0.5, %v2905_v18 }
 0x1f3   : > { %v3020_v9 = vmul.f32 %v2960_v60, %v6180_v27  ;;  %v2906_v41 = vadd.f32 1.0, %v4289_v40  ;;  %v2788_v32 = vmul.f32 0.7978846, %v2728_v38  ;;  %v1195_v6 = vrot.slane %v1194_v53, 4 }
 0x1f4   : > { %4296 = vtanh.f32 %v2790_v5  ;;  %v3064_v20 = vpack.c.bf16 %v3022_v19, %v6309_v52  ;;  %v2963_v22 = vmul.f32 0.5, %v2903_v44  ;;  %v1216_v58 = vrot.slane %v1215_v23, 4 }
 0x1f5   : > { %v4291_v37 = vpop.eup %4290  ;;  %v2966_v30 = vmul.f32 0.5, %v2906_v41  ;;  %4298 = vtanh.f32 %v2788_v32  ;;  %3200 = vmatpush1.bf16.msra.mxu1 %v3061_v39  ;;  %v3063_v46 = vpack.c.bf16 %v3020_v9, %v3019_v12  ;;  %v1196_v13 = vadd.f32 %v1195_v6, %v1194_v53 }
 0x1f6   : > { %v2904_v28 = vadd.f32 1.0, %v4291_v37  ;;  %3201 = vmatprep.subr.bf16.mxu1 %v6902_v21  ;;  %v6919_v27 = vsub.f32 %v6001_v45, %v6008_v49  ;;  %v3025_v29 = vmul.f32 %v2965_v36, %v6193_v11  ;;  %v1256_v26 = vadd.f32 %v6153_v57, %v6920_v61  ;;  %v6924_v49 = vld [vmem:[#allocation19_spill] sm:$0xff] }
 0x1f7   : > { %v3026_v0 = vmul.f32 %v2966_v30, %v6220_v42  ;;  %v1197_v39 = vrot.slane %v1196_v13, 2  ;;  %v1217_v16 = vadd.f32 %v1216_v58, %v1215_v23  ;;  %v6923_v43 = vsub.f32 %v6921_v24, %v6922_v4  ;;  %v6925_v4 = vld [vmem:[#allocation87_spill] sm:$0xff] }
 0x1f8   : > { %v1235_v47 = vadd.f32 %v6150_v63, %v6919_v27  ;;  %v2964_v25 = vmul.f32 0.5, %v2904_v28  ;;  %v3023_v31 = vmul.f32 %v2963_v22, %v6208_v1  ;;  %v1257_v63 = vadd.f32 %v1256_v26, %v6924_v49  ;;  %v6926_v49 = vld [vmem:[#allocation90_spill] sm:$0xff] }
 0x1f9   : > { %3202 = vmatpush1.bf16.msra.mxu1 %v3062_v59  ;;  %v3066_v45 = vpack.c.bf16 %v3026_v0, %v3025_v29  ;;  %v1198_v57 = vadd.f32 %v1197_v39, %v1196_v13  ;;  %v1218_v42 = vrot.slane %v1217_v16, 2 }
 0x1fa   : > { %v1236_v53 = vadd.f32 %v1235_v47, %v6923_v43  ;;  %v3024_v11 = vmul.f32 %v2964_v25, %v6235_v10  ;;  %3203 = vmatprep.subr.bf16.mxu1 %v6902_v21  ;;  %v1258_v3 = vrot.slane %v1257_v63, 4 }
 0x1fb   : > { %v4293_v7 = vpop.eup %4292  ;;  %v1219_v1 = vadd.f32 %v1218_v42, %v1217_v16  ;;  %v1199_v10 = vrot.slane %v1198_v57, 1 }
 0x1fc   : > { %v1237_v23 = vrot.slane %v1236_v53, 4  ;;  %v4295_v14 = vpop.eup %4294  ;;  %v2909_v56 = vadd.f32 1.0, %v4293_v7  ;;  %v3065_v2 = vpack.c.bf16 %v3024_v11, %v3023_v31  ;;  %v1259_v33 = vadd.f32 %v1258_v3, %v1257_v63  ;;  %v6927_v7 = vld [vmem:[#allocation93_spill] sm:$0xff] }
 0x1fd   : > { %v2907_v8 = vadd.f32 1.0, %v4295_v14  ;;  %3204 = vmatpush1.bf16.msra.mxu1 %v3063_v46  ;;  %v1220_v62 = vrot.slane %v1219_v1, 1  ;;  %v1200_v5 = vadd.f32 %v1199_v10, %v1198_v57  ;;  %v4176_v10 = vld [vmem:[%s6565_s11 + $0x8] sm:$0xff]  }
 0x1fe   : > { %v1238_v55 = vadd.f32 %v1237_v23, %v1236_v53  ;;  %v4297_v59 = vpop.eup %4296  ;;  %v2969_v50 = vmul.f32 0.5, %v2909_v56  ;;  %3205 = vmatprep.subr.bf16.mxu1 %v6902_v21  ;;  %v1260_v18 = vrot.slane %v1259_v33, 2 }
 0x1ff   : > { %v4299_v35 = vpop.eup %4298  ;;  %v2910_v38 = vadd.f32 1.0, %v4297_v59  ;;  %v2967_v48 = vmul.f32 0.5, %v2907_v8  ;;  %v1221_v36 = vadd.f32 %v1220_v62, %v1219_v1  ;;  %v6928_v1 = vld [vmem:[#allocation96_spill] sm:$0xff]  ;;  %v4393_v62 = vmov 0.0  }
 0x200   : > { %v1239_v54 = vrot.slane %v1238_v55, 2  ;;  %v2908_v52 = vadd.f32 1.0, %v4299_v35  ;;  %v1261_v40 = vadd.f32 %v1260_v18, %v1259_v33  ;;  %v3029_v12 = vmul.f32 %v2969_v50, %v6256_v34  ;;  %v4177_v35 = vld [vmem:[%s6565_s11 + $0x10] sm:$0xff]   ;;  %v6929_v18 = vld [vmem:[#allocation105_spill] sm:$0xff] }
 0x201   : > { %v2970_v60 = vmul.f32 0.5, %v2910_v38  ;;  %3206 = vmatpush1.bf16.msra.mxu1 %v3064_v20  ;;  %v3027_v6 = vmul.f32 %v2967_v48, %v6261_v15  ;;  %v4169_v15 = vld [vmem:[%s6563_s9 + $0x8] ss:$16 sps:$4 sm:$0xff]  }
 0x202   : > { %v1240_v44 = vadd.f32 %v1239_v54, %v1238_v55  ;;  %v2968_v19 = vmul.f32 0.5, %v2908_v52  ;;  %3207 = vmatprep.subr.bf16.mxu1 %v6902_v21  ;;  %v1262_v32 = vrot.slane %v1261_v40, 1  ;;  %v4178_v38 = vld [vmem:[%s6565_s11 + $0x18] sm:$0xff]  }
 0x203   : > { %v3030_v9 = vmul.f32 %v2970_v60, %v6265_v17  ;;  %v4172_v17 = vld [vmem:[%s6563_s9 + $0x2c] ss:$16 sps:$4 sm:$0xff]   ;;  %v6930_v60 = vld [vmem:[#allocation98_spill] sm:$0xff] }
 0x204   : > { %v1241_v41 = vrot.slane %v1240_v44, 1  ;;  %v3028_v37 = vmul.f32 %v2968_v19, %v6272_v51  ;;  %v1263_v30 = vadd.f32 %v1262_v32, %v1261_v40  ;;  %v4174_v51 = vld [vmem:[%s6563_s9 + $0x28] ss:$16 sps:$4 sm:$0xff]  }
 0x205   : > { %3208 = vmatpush1.bf16.msra.mxu1 %v3065_v2  ;;  %v3068_v20 = vpack.c.bf16 %v3030_v9, %v3029_v12  ;;  %v6931_v19 = vld [vmem:[#allocation75_spill] sm:$0xff] }
 0x206   : > { %v1242_v22 = vadd.f32 %v1241_v41, %v1240_v44  ;;  %3209 = vmatprep.subr.bf16.mxu1 %v6902_v21  ;;  %v3067_v34 = vpack.c.bf16 %v3028_v37, %v3027_v6  ;;  %v6344_v28 = vsel %vm1264_vm2, %v1221_v36, %v1263_v30  ;;  %v6932_v41 = vld [vmem:[#allocation104_spill] sm:$0xff] }
 0x208   : > { %v6342_v46 = vsel %vm1264_vm2, %v1200_v5, %v1242_v22 }
 0x209   : > { %3210 = vmatpush1.bf16.msra.mxu1 %v3066_v45 }
 0x20a   : > { %3211 = vmatprep.subr.bf16.mxu1 %v6902_v21 }
 0x20d   : > { %3212 = vmatpush1.bf16.msra.mxu1 %v3067_v34 }
 0x20e   : > { %3213 = vmatprep.subr.bf16.mxu1 %v6902_v21  ;;  %v4175_v21 = vld [vmem:[%s6565_s11] sm:$0xff]  }
 0x20f   : > { %4035 = vmatprep.mubr.msk.bf16.mxu0 %vm3314_vm3, %v4175_v21 }
 0x211   : > { %3214 = vmatpush1.bf16.msra.mxu1 %v3068_v20 }
 0x214   : > { %3220 = vmatmul.mubr.bf16.vlgmr.msra.gmra.mrb[60].mxu1 %v4169_v15 }
 0x215   : > { %3791 = vmatprep.mubr.msk.bf16.mxu1 %vm3131_vm1, %v4172_v17 }
 0x21c   : > { %3228 = vmatmul.mubr.bf16.gmra.mrb[64].mxu1 %v4174_v51 }
 0x2b1   : > { %v3884_v13 = vpop.f32.mrb[48].mxu0 }
 0x2b2   : > { %v3885_v58 = vpop.f32.mrb[49].mxu0 }
 0x2b3   : > { %v3886_v27 = vadd.f32 %v3885_v58, %v3884_v13  ;;  %v3887_v47 = vpop.f32.mrb[50].mxu0  ;;  %v6933_v58 = vld [vmem:[#allocation111_spill] sm:$0xff] }
 0x2b4   : > { %v3888_v29 = vpop.f32.mrb[51].mxu0 }
 0x2b5   : > { %v3889_v0 = vadd.f32 %v3888_v29, %v3887_v47  ;;  %v3173_v43 = vadd.f32 %v3886_v27, %v6925_v4  ;;  %v6935_v4 = vld [vmem:[#allocation49_spill] sm:$0xff] }
 0x2b7   : > { %v3176_v63 = vadd.f32 %v3889_v0, %v6926_v49 }
 0x2b9   : > { %v3890_v61 = vpop.f32.mrb[52].mxu0 }
 0x2ba   : > { %v3891_v26 = vpop.f32.mrb[53].mxu0 }
 0x2bb   : > { %v3892_v25 = vadd.f32 %v3891_v26, %v3890_v61  ;;  %v3893_v39 = vpop.f32.mrb[54].mxu0  ;;  %v6934_v61 = vld [vmem:[#allocation107_spill] sm:$0xff] }
 0x2bc   : > { %v3894_v16 = vpop.f32.mrb[55].mxu0 }
 0x2bd   : > { %v3895_v24 = vadd.f32 %v3894_v16, %v3893_v39  ;;  %v3181_v3 = vadd.f32 %v3892_v25, %v6927_v7 }
 0x2bf   : > { %v3184_v8 = vadd.f32 %v3895_v24, %v6928_v1 }
 0x2e7   : > { %v3221_v53 = vpop.f32.mrb[60].mxu1 }
 0x2e8   : > { %v3222_v31 = vadd.f32 %v3221_v53, %v3173_v43  ;;  %v3223_v45 = vpop.f32.mrb[61].mxu1 }
 0x2e9   : > { %v3224_v11 = vpop.f32.mrb[62].mxu1 }
 0x2ea   : > { %v3225_v57 = vadd.f32 %v3224_v11, %v3176_v63  ;;  %v3226_v42 = vpop.f32.mrb[63].mxu1  ;;  %v6936_v63 = vld [vmem:[#allocation109_spill] sm:$0xff] }
 0x2ec   : > { %v3244_v23 = vpack.c.bf16 %v3225_v57, %v3222_v31 }
 0x2ee   : > { %4031 = vmatprep.subr.bf16.mxu0 %v3244_v23 }
 0x2ef   : > { %v3229_v14 = vpop.f32.mrb[64].mxu1  ;;  %4032 = vmatpush3.bf16.msra.mxu0 %v3244_v23 }
 0x2f0   : > { %v3230_v56 = vadd.f32 %v3229_v14, %v3181_v3  ;;  %v3231_v2 = vpop.f32.mrb[65].mxu1 }
 0x2f1   : > { %v3232_v55 = vpop.f32.mrb[66].mxu1 }
 0x2f2   : > { %v3233_v33 = vadd.f32 %v3232_v55, %v3184_v8  ;;  %v3234_v59 = vpop.f32.mrb[67].mxu1 }
 0x2f4   : > { %v3245_v50 = vpack.c.bf16 %v3233_v33, %v3230_v56 }
 0x2f6   : > { %4033 = vmatprep.subr.bf16.mxu0 %v3245_v50 }
 0x2f7   : > { %4034 = vmatpush3.bf16.msra.mxu0 %v3245_v50 }
 0x2f8   : > { %4043 = vmatprep.subr.bf16.mxu0 %v4393_v62 }
 0x2fa   : > { %4036 = vmatmul.mubr.msk.bf16.vlgmr.msra.gmra.mrb[56].mxu0 %vm3314_vm3, %v4176_v10  ;;  %v4320_v10 = vld [vmem:[%s4557_s17 + $0x8] sm:$0xff] }
 0x2fb   : > { %4039 = vmatprep.mubr.msk.bf16.mxu0 %vm3314_vm3, %v4177_v35  ;;  %v1268_v35 = vmul.f32 %v4320_v10, %v4320_v10  ;;  %v4325_v10 = vld [vmem:[%s4557_s17 + $0x28] sm:$0xff] }
 0x302   : > { %4040 = vmatmul.mubr.msk.bf16.gmra.mrb[60].mxu0 %vm3314_vm3, %v4178_v38  ;;  %v4321_v38 = vld [vmem:[%s4557_s17] sm:$0xff] }
 0x303   : > { %4051 = vmatprep.mubr.msk.bf16.mxu0 %vm4394_vm4, %v4393_v62 }
 0x3cd   : > { %v4037_v54 = vpop.f32.mrb[56].mxu0 }
 0x3ce   : > { %v6381_v48 = vadd.f32 %v4037_v54, %v6929_v18  ;;  %v3361_v52 = vpop.f32.mrb[57].mxu0  ;;  %v1267_v54 = vmul.f32 %v4321_v38, %v4321_v38 }
 0x3cf   : > { %v6384_v44 = vadd.f32 %v3361_v52, %v6930_v60  ;;  %v4038_v40 = vpop.f32.mrb[58].mxu0 }
 0x3d0   : > { %v3394_v12 = vmul.f32 %v6381_v48, %v6381_v48  ;;  %v6389_v5 = vadd.f32 %v4038_v40, %v6931_v19  ;;  %v3364_v9 = vpop.f32.mrb[59].mxu0 }
 0x3d1   : > { %v3392_v36 = vmul.f32 %v6384_v44, %v6384_v44  ;;  %v6394_v32 = vadd.f32 %v3364_v9, %v6932_v41 }
 0x3d2   : > { %v3402_v6 = vmul.f32 %v3394_v12, %v6381_v48  ;;  %v3395_v37 = vmul.f32 %v6389_v5, %v6389_v5  ;;  %v4322_v12 = vld [vmem:[%s4557_s17 + $0x10] sm:$0xff] }
 0x3d3   : > { %v3400_v20 = vmul.f32 %v3392_v36, %v6384_v44  ;;  %v3393_v22 = vmul.f32 %v6394_v32, %v6394_v32  ;;  %v1269_v19 = vmul.f32 %v4322_v12, %v4322_v12 }
 0x3d4   : > { %v3410_v30 = vmul.f32 0.044715, %v3402_v6  ;;  %v3403_v34 = vmul.f32 %v3395_v37, %v6389_v5  ;;  %v6937_v6 = vld [vmem:[#allocation65_spill] sm:$0xff] }
 0x3d5   : > { %v3408_v15 = vmul.f32 0.044715, %v3400_v20  ;;  %v3401_v17 = vmul.f32 %v3393_v22, %v6394_v32  ;;  %v4041_v51 = vpop.f32.mrb[60].mxu0  ;;  %v1324_v37 = vmul.f32 %v6937_v6, %v1268_v35  ;;  %v6938_v20 = vld [vmem:[#allocation76_spill] sm:$0xff]  ;;  %v1272_v35 = vmul.f32 %v4325_v10, %v4325_v10 }
 0x3d6   : > { %v3418_v21 = vadd.f32 %v3410_v30, %v6381_v48  ;;  %v3411_v13 = vmul.f32 0.044715, %v3403_v34  ;;  %v6406_v27 = vadd.f32 %v4041_v51, %v6933_v58  ;;  %v3377_v47 = vpop.f32.mrb[61].mxu0  ;;  %v1323_v22 = vmul.f32 %v6938_v20, %v1267_v54 }
 0x3d7   : > { %v3416_v29 = vadd.f32 %v3408_v15, %v6384_v44  ;;  %v3409_v0 = vmul.f32 0.044715, %v3401_v17  ;;  %v6410_v26 = vadd.f32 %v3377_v47, %v6934_v61  ;;  %v4042_v25 = vpop.f32.mrb[62].mxu0  ;;  %v6939_v17 = vld [vmem:[#allocation117_spill] sm:$0xff] }
 0x3d8   : > { %v3426_v39 = vmul.f32 0.7978846, %v3418_v21  ;;  %v3419_v16 = vadd.f32 %v3411_v13, %v6389_v5  ;;  %v3398_v24 = vmul.f32 %v6406_v27, %v6406_v27  ;;  %v6416_v43 = vadd.f32 %v4042_v25, %v6935_v4  ;;  %v3380_v53 = vpop.f32.mrb[63].mxu0  ;;  %v4324_v4 = vld [vmem:[%s4557_s17 + $0x20] sm:$0xff] }
 0x3d9   : > { %v3424_v31 = vmul.f32 0.7978846, %v3416_v29  ;;  %v3417_v45 = vadd.f32 %v3409_v0, %v6394_v32  ;;  %v3396_v49 = vmul.f32 %v6410_v26, %v6410_v26  ;;  %v6422_v11 = vadd.f32 %v3380_v53, %v6936_v63  ;;  %v4323_v0 = vld [vmem:[%s4557_s17 + $0x18] sm:$0xff] }
 0x3da   : > { %4300 = vtanh.f32 %v3426_v39  ;;  %v3427_v57 = vmul.f32 0.7978846, %v3419_v16  ;;  %v3406_v42 = vmul.f32 %v3398_v24, %v6406_v27  ;;  %v3399_v23 = vmul.f32 %v6416_v43, %v6416_v43 }
 0x3db   : > { %4302 = vtanh.f32 %v3424_v31  ;;  %v3425_v7 = vmul.f32 0.7978846, %v3417_v45  ;;  %v3404_v3 = vmul.f32 %v3396_v49, %v6410_v26  ;;  %v3397_v14 = vmul.f32 %v6422_v11, %v6422_v11 }
 0x3dc   : > { %4304 = vtanh.f32 %v3427_v57  ;;  %v3414_v56 = vmul.f32 0.044715, %v3406_v42  ;;  %v3407_v2 = vmul.f32 %v3399_v23, %v6416_v43  ;;  %v1325_v51 = vmul.f32 %v6939_v17, %v1269_v19  ;;  %v6940_v57 = vld [vmem:[#allocation67_spill] sm:$0xff]  ;;  %v6942_v19 = vld [vmem:[#allocation73_spill] sm:$0xff] }
 0x3dd   : > { %4306 = vtanh.f32 %v3425_v7  ;;  %v3412_v1 = vmul.f32 0.044715, %v3404_v3  ;;  %v3405_v8 = vmul.f32 %v3397_v14, %v6422_v11  ;;  %v1331_v29 = vadd.f32 %v1324_v37, %v1323_v22  ;;  %v6943_v37 = vld [vmem:[#allocation20_spill] sm:$0xff] }
 0x3de   : > { %v3422_v55 = vadd.f32 %v3414_v56, %v6406_v27  ;;  %v3415_v33 = vmul.f32 0.044715, %v3407_v2  ;;  %v1270_v61 = vmul.f32 %v4323_v0, %v4323_v0  ;;  %v1271_v53 = vmul.f32 %v4324_v4, %v4324_v4  ;;  %v6945_v0 = vld [vmem:[#allocation89_spill] sm:$0xff] }
 0x3df   : > { %v3420_v59 = vadd.f32 %v3412_v1, %v6410_v26  ;;  %v3413_v50 = vmul.f32 0.044715, %v3405_v8  ;;  %v1332_v24 = vadd.f32 %v1331_v29, %v1325_v51  ;;  %v6941_v1 = vld [vmem:[#allocation85_spill] sm:$0xff] }
 0x3e0   : > { %v3430_v18 = vmul.f32 0.7978846, %v3422_v55  ;;  %v3423_v52 = vadd.f32 %v3415_v33, %v6416_v43  ;;  %v1326_v42 = vmul.f32 %v6940_v57, %v1270_v61  ;;  %v1327_v8 = vmul.f32 %v6941_v1, %v1271_v53 }
 0x3e1   : > { %v3428_v60 = vmul.f32 0.7978846, %v3420_v59  ;;  %v3421_v40 = vadd.f32 %v3413_v50, %v6422_v11 }
 0x3e2   : > { %4308 = vtanh.f32 %v3430_v18  ;;  %v3431_v9 = vmul.f32 0.7978846, %v3423_v52  ;;  %v1333_v55 = vadd.f32 %v1332_v24, %v1326_v42  ;;  %v4326_v18 = vld [vmem:[%s4557_s17 + $0x30] sm:$0xff] }
 0x3e3   : > { %4310 = vtanh.f32 %v3428_v60  ;;  %v3429_v36 = vmul.f32 0.7978846, %v3421_v40  ;;  %v1273_v52 = vmul.f32 %v4326_v18, %v4326_v18 }
 0x3e4   : > { %v4301_v41 = vpop.eup %4300  ;;  %4312 = vtanh.f32 %v3431_v9  ;;  %v1328_v9 = vmul.f32 %v6942_v19, %v1272_v35 }
 0x3e5   : > { %v4303_v30 = vpop.eup %4302  ;;  %v3442_v34 = vadd.f32 1.0, %v4301_v41  ;;  %4314 = vtanh.f32 %v3429_v36  ;;  %v1329_v20 = vmul.f32 %v6943_v37, %v1273_v52 }
 0x3e6   : > { %v4305_v15 = vpop.eup %4304  ;;  %v3440_v21 = vadd.f32 1.0, %v4303_v30 }
 0x3e7   : > { %v4307_v13 = vpop.eup %4306  ;;  %v3450_v58 = vmul.f32 0.5, %v3442_v34  ;;  %v3443_v47 = vadd.f32 1.0, %v4305_v15  ;;  %v4327_v34 = vld [vmem:[%s4557_s17 + $0x38] sm:$0xff]  ;;  %s569_s17 = scalar_select %p568_p13, %s4503_s22, 1 }
 0x3e8   : > { %v3448_v25 = vmul.f32 0.5, %v3440_v21  ;;  %v3441_v39 = vadd.f32 1.0, %v4307_v13  ;;  %v1274_v15 = vmul.f32 %v4327_v34, %v4327_v34  ;;  %s4401_s22 = smov [#allocation3]  }
 0x3e9   : > { %v3451_v16 = vmul.f32 0.5, %v3443_v47  ;;  %v3458_v45 = vmul.f32 %v3450_v58, %v6381_v48  ;;  %s3665_s23 = sshll.u32 %s569_s17, 3  ;;  %s4328_s17 = scalar_lea.vmem %s6512_s29, 64 }
 0x3ea   : > { %v3449_v31 = vmul.f32 0.5, %v3441_v39  ;;  %v3456_v23 = vmul.f32 %v3448_v25, %v6384_v44  ;;  %s571_s26 = scalar_lea.vmem %s6555_s1, %s3665_s23  ;;  %p4329_p0 = scmp.ne.s32.totalorder %s6512_s29, %s4328_s17 }
 0x3eb   : > { %v3459_v49 = vmul.f32 %v3451_v16, %v6389_v5  ;;  %s4332_s23 = sshll.u32 %s4401_s22, 4  ;;  %s4333_s23 = int_to_ptr.vmem [resolvable:$false] %s4332_s23 }
 0x3ec   : > { %v4309_v63 = vpop.eup %4308  ;;  %v3457_v7 = vmul.f32 %v3449_v31, %v6394_v32  ;;  %v1334_v32 = vadd.f32 %v1333_v55, %v1327_v8  ;;  %v4395_v31 = vmov 920167782   ;;  %p4330_p1 = pnand %p4329_p0, %p4521_p6  ;;  %s4334_s30 = scalar_lea.vmem %s4333_s23, 128 }
 0x3ed   : > { %v4311_v3 = vpop.eup %4310  ;;  %v3446_v14 = vadd.f32 1.0, %v4309_v63  ;;  %v3467_v56 = vpack.c.bf16 %v3459_v49, %v3458_v45  ;;  %v4396_v49 = vmov 1326507024   ;;  %p4335_p3 = scmp.lt.s32.totalorder %s6512_s29, %s4333_s23  ;;  %p4336_p4 = scmp.lt.s32.totalorder %s4334_s30, %s4328_s17 }
 0x3ee   : > { %v4313_v2 = vpop.eup %4312  ;;  %v3444_v33 = vadd.f32 1.0, %v4311_v3  ;;  %v3466_v48 = vpack.c.bf16 %v3457_v7, %v3456_v23  ;;  %v1335_v22 = vadd.f32 %v1334_v32, %v1328_v9  ;;  %v4397_v23 = vmov 2102212464   ;;  %p4331_p2 = pneg %p4330_p1 }
 0x3ef   : > { %v4315_v59 = vpop.eup %4314  ;;  %v3454_v5 = vmul.f32 0.5, %v3446_v14  ;;  %v3447_v50 = vadd.f32 1.0, %v4313_v2  ;;  %v4398_v3 = vmov 2475754826   ;;  %p4337_p5 = por %p4336_p4, %p4335_p3 }
 0x3f0   : > { %v3452_v38 = vmul.f32 0.5, %v3444_v33  ;;  %v3445_v54 = vadd.f32 1.0, %v4315_v59  ;;  %4044 = vmatpush3.bf16.msra.mxu0 %v3466_v48  ;;  %v4400_v33 = vmov 683565275  }
 0x3f1   : > { %v3455_v44 = vmul.f32 0.5, %v3447_v50  ;;  %4045 = vmatprep.subr.bf16.mxu0 %v4393_v62  ;;  %v3462_v40 = vmul.f32 %v3454_v5, %v6406_v27  ;;  %v1336_v27 = vadd.f32 %v1335_v22, %v1329_v20  ;;  %p4338_p7 = pnand %p4337_p5, %p4331_p2 }
 0x3f2   : > { %v3453_v60 = vmul.f32 0.5, %v3445_v54  ;;  %v3460_v36 = vmul.f32 %v3452_v38, %v6410_v26  ;;  %v4179_v26 = vld [vmem:[%s6567_s13] sm:$0xff]  }
 0x3f3   : > { %v3463_v12 = vmul.f32 %v3455_v44, %v6416_v43  ;;  %v6944_v43 = vld [vmem:[#allocation62_spill] sm:$0xff] }
 0x3f4   : > { %v3461_v41 = vmul.f32 %v3453_v60, %v6422_v11  ;;  %4046 = vmatpush3.bf16.msra.mxu0 %v3467_v56  ;;  %v1330_v11 = vmul.f32 %v6944_v43, %v1274_v15  ;;  %v4399_v56 = vmov 2131351028  }
 0x3f5   : > { %4047 = vmatprep.subr.bf16.mxu0 %v4393_v62  ;;  %v3469_v6 = vpack.c.bf16 %v3463_v12, %v3462_v40 }
 0x3f6   : > { %v3468_v30 = vpack.c.bf16 %v3461_v41, %v3460_v36  ;;  %v1337_v17 = vadd.f32 %v1336_v27, %v1330_v11 }
 0x3f8   : > { %4048 = vmatpush3.bf16.msra.mxu0 %v3468_v30  ;;  %v1338_v51 = vrot.slane %v1337_v17, 4 }
 0x3f9   : > { %4049 = vmatprep.subr.bf16.mxu0 %v4393_v62 }
 0x3fa   : > { %v1339_v21 = vadd.f32 %v1338_v51, %v1337_v17 }
 0x3fc   : > { %4050 = vmatpush3.bf16.msra.mxu0 %v3469_v6  ;;  %v1340_v13 = vrot.slane %v1339_v21, 2 }
 0x3fe   : > { %v1341_v58 = vadd.f32 %v1340_v13, %v1339_v21 }
 0x3ff   : > { %4052 = vmatmul.mubr.msk.bf16.vlgmr.msra.gmra.mrb[64].mxu0 %vm754_vm0, %v4179_v26 }
 0x400   : > { %v1342_v47 = vrot.slane %v1341_v58, 1 }
 0x402   : > { %v1343_v29 = vadd.f32 %v1342_v47, %v1341_v58 }
 0x404   : > { %v6468_v61 = vmul.f32 %v6945_v0, %v1343_v29 }
 0x406   : > { %v1354_v62 = vand.u32 2139095040, %v6468_v61  ;;  %v1351_v57 = vand.u32 2147483647, %v6468_v61  ;;  %vm1353_vm12 = vcmp.lt.s32.totalorder %v6468_v61, 0  ;;  %vm1443_vm4 = vweird.f32 %v6468_v61 }
 0x408   : > { %v1355_v25 = vshrl.u32 %v1354_v62, 23  ;;  %v1358_v10 = vand.u32 8388607, %v1351_v57  ;;  %vm1352_vm13 = vcmp.le.f32.partialorder %v1351_v57, 0.7853982 }
 0x40a   : > { %v3714_v39 = vadd.s32 4294967169, %v1355_v25  ;;  %v1359_v18 = vor.u32 8388608, %v1358_v10 }
 0x40c   : > { %v1361_v16 = vadd.s32 1, %v3714_v39  ;;  %v1399_v36 = vshll.u32 %v1359_v18, 8 }
 0x40e   : > { %vm1362_vm5 = vcmp.gt.s32.totalorder %v1361_v16, 0 }
 0x40f   : > { %v1363_v24 = vsel %vm1362_vm5, %v1361_v16, 0  ;;  %vm3563_vm5 = vcmask 1041408  }
 0x410   : > { %v1365_v4 = vand.u32 31, %v1363_v24  ;;  %v1364_v42 = vshrl.u32 %v1363_v24, 5 }
 0x412   : > { %v1366_v53 = vsub.s32 32, %v1365_v4  ;;  %v1377_v7 = vshll.u32 %v4397_v23, %v1365_v4  ;;  %v1380_v8 = vshll.u32 %v4395_v31, %v1365_v4  ;;  %v1368_v48 = vshll.u32 %v4400_v33, %v1365_v4 }
 0x413   : > { %v1371_v59 = vshll.u32 %v4398_v3, %v1365_v4  ;;  %v1374_v5 = vshll.u32 %v4399_v56, %v1365_v4  ;;  %vm1386_vm6 = vcmp.lt.s32.totalorder %v1364_v42, 4  ;;  %vm1383_vm7 = vcmp.lt.s32.totalorder %v1364_v42, 1 }
 0x414   : > { %v1378_v45 = vshrl.u32 %v4395_v31, %v1366_v53  ;;  %v1381_v63 = vshrl.u32 %v4396_v49, %v1366_v53  ;;  %v1369_v14 = vshrl.u32 %v4398_v3, %v1366_v53  ;;  %v1372_v2 = vshrl.u32 %v4399_v56, %v1366_v53 }
 0x415   : > { %v1375_v1 = vshrl.u32 %v4397_v23, %v1366_v53  ;;  %vm1385_vm8 = vcmp.lt.s32.totalorder %v1364_v42, 3  ;;  %vm1384_vm9 = vcmp.lt.s32.totalorder %v1364_v42, 2  ;;  %v1367_v30 = vshrl.u32 %v4400_v33, %v1366_v53 }
 0x416   : > { %v1379_v55 = vor.u32 %v1378_v45, %v1377_v7  ;;  %v1382_v50 = vor.u32 %v1381_v63, %v1380_v8  ;;  %v1370_v35 = vor.u32 %v1369_v14, %v1368_v48  ;;  %v1373_v38 = vor.u32 %v1372_v2, %v1371_v59 }
 0x417   : > { %v1376_v54 = vor.u32 %v1375_v1, %v1374_v5 }
 0x418   : > { %v1392_v44 = vsel %vm1386_vm6, %v1379_v55, 920167782  ;;  %v1396_v32 = vsel %vm1386_vm6, %v1382_v50, 1326507024  ;;  %v1391_v52 = vsel %vm1383_vm7, %v1370_v35, %v1373_v38  ;;  %v1387_v34 = vsel %vm1383_vm7, %v1367_v30, %v1370_v35 }
 0x419   : > { %v1393_v60 = vsel %vm1385_vm8, %v1376_v54, %v1392_v44  ;;  %v1395_v40 = vsel %vm1383_vm7, %v1373_v38, %v1376_v54  ;;  %v1397_v12 = vsel %vm1385_vm8, %v1379_v55, %v1396_v32  ;;  %v1388_v22 = vsel %vm1386_vm6, %v1376_v54, 2102212464 }
 0x41a   : > { %v1394_v19 = vsel %vm1384_vm9, %v1391_v52, %v1393_v60  ;;  %v1398_v9 = vsel %vm1384_vm9, %v1395_v40, %v1397_v12  ;;  %v1389_v15 = vsel %vm1385_vm8, %v1373_v38, %v1388_v22  ;;  %v581_v12 = vld [vmem:[%s571_s26] sm:$0xff] }
 0x41b   : > { %v6480_v41 = vmul.u32.u64.low %v1399_v36, %v1394_v19  ;;  %v6481_v6 = vmul.u32.u64.high %v1399_v36, %v1394_v19, %v6480_v41  ;;  %v6483_v37 = vmul.u32.u64.low %v1399_v36, %v1398_v9  ;;  %v6484_v20 = vmul.u32.u64.high %v1399_v36, %v1398_v9, %v6483_v37 }
 0x41c   : > { %v1390_v26 = vsel %vm1384_vm9, %v1387_v34, %v1389_v15  ;;  %v3475_v34 = vpop.permute.xlu1 %3474 }
 0x41d   : > { %v1409_v27 = vadd.s32 1, %v6481_v6  ;;  %vm1408_vm10 = vc.u32 %v6484_v20, %v6480_v41  ;;  %v1406_v11 = vmul.u32 %v1399_v36, %v1390_v26  ;;  %v1407_v4 = vadd.s32 %v6480_v41, %v6484_v20 }
 0x41e   : > { %v3540_v41 = vlaneseq }
 0x41f   : > { %v1410_v43 = vsel %vm1408_vm10, %v1409_v27, %v6481_v6 }
 0x420   : > { %v1411_v17 = vadd.s32 %v1410_v43, %v1406_v11 }
 0x422   : > { %v1412_v51 = vadd.s32 536870912, %v1411_v17 }
 0x424   : > { %v1413_v21 = vshrl.u32 %v1412_v51, 30 }
 0x426   : > { %v1414_v13 = vshll.u32 %v1413_v21, 30  ;;  %v1437_v2 = vsub.s32 4, %v1413_v21 }
 0x428   : > { %v1415_v58 = vsub.s32 %v1411_v17, %v1414_v13  ;;  %v1438_v1 = vsel %vm1353_vm12, %v1437_v2, %v1413_v21 }
 0x429   : > { %v1440_v8 = vsel %vm1352_vm13, 0, %v1438_v1 }
 0x42a   : > { %v1417_v47 = vsub.s32 0, %v1415_v58  ;;  %v1547_v55 = vadd.s32 3, %v1440_v8  ;;  %v1444_v10 = vand.u32 3, %v1440_v8 }
 0x42c   : > { %v3715_v29 = vmin.u32 %v1417_v47, %v1415_v58  ;;  %v1548_v59 = vand.u32 3, %v1547_v55  ;;  %vm1446_vm0 = vcmp.eq.s32.totalorder %v1444_v10, 0  ;;  %vm1449_vm1 = vcmp.eq.s32.totalorder %v1444_v10, 2 }
 0x42d   : > { %vm1445_vm3 = vcmp.lt.s32.totalorder %v1444_v10, 2 }
 0x42e   : > { %v1419_v0 = vclz %v3715_v29  ;;  %vm1550_vm14 = vcmp.eq.s32.totalorder %v1548_v59, 0  ;;  %vm1553_vm15 = vcmp.eq.s32.totalorder %v1548_v59, 2  ;;  %vm1549_vm2 = vcmp.lt.s32.totalorder %v1548_v59, 2 }
 0x430   : > { %v3716_v62 = vadd.s32 4294967294, %v1419_v0 }
 0x432   : > { %vm3717_vm11 = vcmp.lt.s32.totalorder %v3716_v62, 0 }
 0x433   : > { %v1422_v25 = vsel %vm3717_vm11, 0, %v3716_v62 }
 0x434   : > { %v1427_v39 = vsub.s32 4294967266, %v1422_v25  ;;  %v1423_v24 = vsub.s32 32, %v1422_v25  ;;  %v1424_v45 = vshll.u32 %v1415_v58, %v1422_v25 }
 0x436   : > { %v1428_v16 = vadd.s32 127, %v1427_v39  ;;  %v1425_v31 = vshrl.u32 %v1407_v4, %v1423_v24 }
 0x438   : > { %v1429_v53 = vshll.u32 %v1428_v16, 23  ;;  %v1426_v63 = vor.u32 %v1425_v31, %v1424_v45 }
 0x43a   : > { %v1430_v49 = vor.u32 4788187, %v1429_v53  ;;  %v1433_v23 = vcvt.s32.f32 %v1426_v63 }
 0x43c   : > { %v1431_v42 = vand.u32 2147483647, %v1430_v49 }
 0x43e   : > { %v1434_v7 = vmul.f32 %v1433_v23, %v1431_v42 }
 0x440   : > { %v1435_v3 = vxor.u32 2147483648, %v1434_v7 }
 0x442   : > { %v1436_v14 = vsel %vm1353_vm12, %v1435_v3, %v1434_v7 }
 0x443   : > { %v1439_v56 = vsel %vm1352_vm13, %v6468_v61, %v1436_v14  ;;  %v3541_v61 = vshrl.u32 %v3540_v41, 7 }
 0x444   : > { %4316 = vcosq.f32 %v1439_v56 }
 0x445   : > { %4318 = vsinq.f32 %v1439_v56  ;;  %v3542_v43 = vsub.s32 4, %v3541_v61 }
 0x447   : > { %v3543_v47 = vrot.slane %v581_v12, %v3542_v43 }
 0x44e   : > { %v4317_v33 = vpop.eup %4316 }
 0x44f   : > { %v4319_v48 = vpop.eup %4318  ;;  %v1450_v50 = vxor.u32 2147483648, %v4317_v33 }
 0x450   : > { %v1447_v5 = vxor.u32 2147483648, %v4319_v48 }
 0x451   : > { %v1555_v57 = vsel %vm1553_vm15, %v1450_v50, %v4319_v48  ;;  %v1451_v54 = vsel %vm1449_vm1, %v1450_v50, %v4319_v48 }
 0x452   : > { %v1552_v35 = vsel %vm1550_vm14, %v4317_v33, %v1447_v5  ;;  %v1448_v38 = vsel %vm1446_vm0, %v4317_v33, %v1447_v5 }
 0x453   : > { %v1556_v44 = vsel %vm1549_vm2, %v1552_v35, %v1555_v57  ;;  %v1452_v32 = vsel %vm1445_vm3, %v1448_v38, %v1451_v54 }
 0x454   : > { %v1557_v18 = vsel %vm1443_vm4, nan, %v1556_v44  ;;  %v1453_v52 = vsel %vm1443_vm4, nan, %v1452_v32 }
 0x455   : > { %v3531_v60 = vrot.slane %v1557_v18, 6  ;;  %v3547_v40 = vrot.slane %v1453_v52, 6  ;;  %v3529_v6 = vmul.f32 %v1453_v52, %v581_v12  ;;  %v3545_v22 = vmul.f32 %v1557_v18, %v581_v12 }
 0x457   : > { %v3533_v19 = vmul.f32 %v3531_v60, %v581_v12  ;;  %v3549_v9 = vmul.f32 %v3547_v40, %v581_v12 }
 0x459   : > { %v3535_v36 = vrot.slane %v3533_v19, 2  ;;  %v3551_v37 = vrot.slane %v3549_v9, 2 }
 0x45b   : > { %v3537_v20 = vsub.f32 %v3529_v6, %v3535_v36  ;;  %v3553_v30 = vadd.f32 %v3551_v37, %v3545_v22 }
 0x45d   : > { %v3538_v26 = vadd.f32 %v3537_v20, %v6342_v46  ;;  %v3554_v21 = vadd.f32 %v3553_v30, %v6344_v28 }
 0x4d2   : > { %v3523_v15 = vpop.f32.mrb[64].mxu0 }
 0x4d3   : > { %v3524_v27 = vadd.f32 %v3523_v15, %v3475_v34  ;;  %v4053_v11 = vpop.f32.mrb[65].mxu0 }
 0x4d4   : > { %v3526_v17 = vpop.f32.mrb[66].mxu0 }
 0x4d5   : > { %v3539_v51 = vadd.f32 %v3538_v26, %v3524_v27  ;;  %v3556_v13 = vrot.slane %v3524_v27, 2  ;;  %v4054_v58 = vpop.f32.mrb[67].mxu0 }
 0x4d7   : > { %v3558_v29 = vadd.f32 %v3556_v13, %v3554_v21  ;;  %v3544_v62 = vmul.f32 %v3543_v47, %v3539_v51 }
 0x4d9   : > { %v3559_v0 = vmul.f32 %v3558_v29, %v3543_v47 }
 0x4db   : > { %v3561_v46 = vrot.slane %v3559_v0, 6 }
 0x4dd   : > { %v3564_v28 = vsel %vm3563_vm5, %v3544_v62, %v3561_v46 }
 0x4de   : > { %3565 = vst [vmem:[%s567_s18] sm:$0xf] %v3564_v28 }
 0x4df   : > { %4341 = shalt.err (!%p4338_p7)
}
 0x4e0   : > { %s4342_s27 = scalar_lea.hbm %s6510_s25, 64  ;;  %s4346_s21 = scalar_lea.hbm %s6569_s15, 128 }
 0x4e1   : > { %p4343_p10 = scmp.ne.s32.totalorder %s6510_s25, %s4342_s27  ;;  %p4347_p13 = scmp.lt.u32.totalorder %s6510_s25, %s6569_s15 }
 0x4e2   : > { %p4348_p0 = scmp.lt.u32.totalorder %s4346_s21, %s4342_s27  ;;  %p4350_p2 = scmp.lt.u32.totalorder %s4342_s27, %s6510_s25 }
 0x4e3   : > { %p4344_p11 = pnand %p4343_p10, %p4521_p6 }
 0x4e4   : > { %p4349_p1 = por %p4348_p0, %p4347_p13 }
 0x4e5   : > { %p4345_p12 = pneg %p4344_p11 }
 0x4e6   : > { %p4351_p3 = por %p4350_p2, %p4349_p1 }
 0x4e8   : > { %p4352_p4 = pnand %p4351_p3, %p4345_p12 }
 0x4ea   : > { %4355 = shalt.err (!%p4352_p4)
}
 0x4eb   : > { %4059 = dma.vmem_to_hbm [thread:$0]  (%p4521_p6), %s6512_s29, 64, %s6510_s25, %s3567_s0  }
 0x4ec PF: > { %s6946_s20 = sld [smem:[#allocation6_spill]]  ;;  %p4062_p5 = pnand %p3659_p9, %p4525_p8 }
 0x4f2   : > { %s3592_s22 = sand.u32 1, %s6946_s20  }
 0x4f3   : > { %s3593_s23 = scalar_lea.sflag [#allocation4], %s3592_s22 }
 0x4f4   : > { %4373 = dma.done.wait (!%p4062_p5), %s3593_s23, 64  }
 0x4f5   : > { %4375 = vsyncadd (!%p4062_p5), %s3593_s23, 4294967232  ;;  %s6949_s21 = sld [smem:[#allocation10_spill]]  ;;  %s6950_s18 = sld [smem:[#allocation7_spill]] }
 0x4f6   : > { %s6951_s19 = sld [smem:[#allocation8_spill]]  ;;  %s6952_s20 = sld [smem:[#allocation11_spill]] }
 0x4fb   : > { %p25_p7 = scmp.ge.s32.totalorder %s6949_s21, 4  }
 0x4fd   :  { %27 = sbr.rel (!%p25_p7) target bundleno = 5 (0x5), region = 161 }
 0x504   :  { %3598 = vsyncpa [#allocation4], 1 }
 0x505   :  { %3600 = vsyncpa [#allocation4 + $0x1], 1 }

</bundles_post_ra>
